<compile_context>
chip_gen: v7x
topology: tpu7x:2x2x1
jax: 0.10.0
libtpu: 0.0.40
codegen_flags: <defaults>
</compile_context>

<pallas_src>
import math
from functools import partial

import jax
import jax.numpy as jnp
from jax.experimental import pallas as pl
from jax.experimental.pallas import tpu as pltpu

VMEM_LIMIT = 48 * 1024 * 1024
DEFAULT_TILE_M = 256
DEFAULT_TILE_N = 256
DEFAULT_TILE_K = 512
DEFAULT_ROW_TILE = 256
NEG_INF = -1e30


def _fit(dim, pref):
    """Preferred tile size if it divides `dim`, else the full dim (toy shapes)."""
    return pref if dim % pref == 0 else dim


# ----------------------------- tiled matmul ---------------------------------

def _matmul_kernel(x_ref, w_ref, o_ref, acc_ref, *, out_scale):
    @pl.when(pl.program_id(2) == 0)
    def _init():
        acc_ref[...] = jnp.zeros_like(acc_ref)

    acc_ref[...] += jnp.dot(x_ref[...], w_ref[...],
                            preferred_element_type=jnp.float32)

    @pl.when(pl.program_id(2) == pl.num_programs(2) - 1)
    def _done():
        acc = acc_ref[...]
        if out_scale != 1.0:
            acc = acc * out_scale
        o_ref[...] = acc.astype(o_ref.dtype)


def matmul(x, w, *, out_scale=1.0, out_dtype=None):
    """x: [M, K] @ w: [K, N] (weights pre-transposed [in, out]); bf16 in, f32 acc."""
    M, K = x.shape
    K2, N = w.shape
    assert K == K2
    out_dtype = out_dtype or x.dtype
    tm, tn, tk = _fit(M, DEFAULT_TILE_M), _fit(N, DEFAULT_TILE_N), _fit(K, DEFAULT_TILE_K)
    return pl.pallas_call(
        partial(_matmul_kernel, out_scale=float(out_scale)),
        out_shape=jax.ShapeDtypeStruct((M, N), out_dtype),
        grid=(M // tm, N // tn, K // tk),
        in_specs=[
            pl.BlockSpec((tm, tk), lambda i, j, k: (i, k)),
            pl.BlockSpec((tk, tn), lambda i, j, k: (k, j)),
        ],
        out_specs=pl.BlockSpec((tm, tn), lambda i, j, k: (i, j)),
        scratch_shapes=[pltpu.VMEM((tm, tn), jnp.float32)],
        compiler_params=pltpu.CompilerParams(
            dimension_semantics=("parallel", "parallel", "arbitrary"),
            vmem_limit_bytes=VMEM_LIMIT,
        ),
    )(x, w)


# ------------------- SiluAndMul fused into down-proj matmul ------------------

def _silu_mul_matmul_kernel(gu_ref, w_ref, o_ref, acc_ref, *, out_scale):
    @pl.when(pl.program_id(2) == 0)
    def _init():
        acc_ref[...] = jnp.zeros_like(acc_ref)

    g = gu_ref[:, 0, :].astype(jnp.float32)
    u = gu_ref[:, 1, :].astype(jnp.float32)
    act = (g * jax.nn.sigmoid(g) * u).astype(w_ref.dtype)
    acc_ref[...] += jnp.dot(act, w_ref[...], preferred_element_type=jnp.float32)

    @pl.when(pl.program_id(2) == pl.num_programs(2) - 1)
    def _done():
        acc = acc_ref[...]
        if out_scale != 1.0:
            acc = acc * out_scale
        o_ref[...] = acc.astype(o_ref.dtype)


def silu_mul_matmul(gate_up, w_down, *, out_scale=1.0):
    """gate_up: [M, 2, I] (gate=index 0, up=index 1); w_down: [I, H] -> [M, H]."""
    M, two, I = gate_up.shape
    assert two == 2
    I2, N = w_down.shape
    assert I == I2
    tm, tn, tk = _fit(M, DEFAULT_TILE_M), _fit(N, DEFAULT_TILE_N), _fit(I, DEFAULT_TILE_K)
    return pl.pallas_call(
        partial(_silu_mul_matmul_kernel, out_scale=float(out_scale)),
        out_shape=jax.ShapeDtypeStruct((M, N), gate_up.dtype),
        grid=(M // tm, N // tn, I // tk),
        in_specs=[
            pl.BlockSpec((tm, 2, tk), lambda i, j, k: (i, 0, k)),
            pl.BlockSpec((tk, tn), lambda i, j, k: (k, j)),
        ],
        out_specs=pl.BlockSpec((tm, tn), lambda i, j, k: (i, j)),
        scratch_shapes=[pltpu.VMEM((tm, tn), jnp.float32)],
        compiler_params=pltpu.CompilerParams(
            dimension_semantics=("parallel", "parallel", "arbitrary"),
            vmem_limit_bytes=VMEM_LIMIT,
        ),
    )(gate_up, w_down)


# ------------------------------ RMSNorm kernels ------------------------------

def _rmsnorm_kernel(x_ref, w_ref, o_ref, *, eps):
    x = x_ref[...].astype(jnp.float32)
    var = jnp.mean(x * x, axis=-1, keepdims=True)
    y = (x * jax.lax.rsqrt(var + eps)).astype(o_ref.dtype)
    o_ref[...] = y * w_ref[...].astype(o_ref.dtype)


def rmsnorm(x, w, eps):
    N, H = x.shape
    tr = _fit(N, DEFAULT_ROW_TILE)
    return pl.pallas_call(
        partial(_rmsnorm_kernel, eps=eps),
        out_shape=jax.ShapeDtypeStruct((N, H), x.dtype),
        grid=(N // tr,),
        in_specs=[
            pl.BlockSpec((tr, H), lambda i: (i, 0)),
            pl.BlockSpec((1, H), lambda i: (0, 0)),
        ],
        out_specs=pl.BlockSpec((tr, H), lambda i: (i, 0)),
        compiler_params=pltpu.CompilerParams(
            dimension_semantics=("parallel",),
            vmem_limit_bytes=VMEM_LIMIT,
        ),
    )(x, w.reshape(1, H))


def _add_rmsnorm_kernel(x_ref, r_ref, w_ref, h_ref, res_ref, *, eps):
    res = x_ref[...] + r_ref[...]
    res_ref[...] = res
    xf = res.astype(jnp.float32)
    var = jnp.mean(xf * xf, axis=-1, keepdims=True)
    y = (xf * jax.lax.rsqrt(var + eps)).astype(h_ref.dtype)
    h_ref[...] = y * w_ref[...].astype(h_ref.dtype)


def add_rmsnorm(x, residual, w, eps):
    """Fused `residual = x + residual; hidden = RMSNorm(residual)`; residual aliased."""
    N, H = x.shape
    tr = _fit(N, DEFAULT_ROW_TILE)
    return pl.pallas_call(
        partial(_add_rmsnorm_kernel, eps=eps),
        out_shape=(jax.ShapeDtypeStruct((N, H), x.dtype),
                   jax.ShapeDtypeStruct((N, H), x.dtype)),
        grid=(N // tr,),
        in_specs=[
            pl.BlockSpec((tr, H), lambda i: (i, 0)),
            pl.BlockSpec((tr, H), lambda i: (i, 0)),
            pl.BlockSpec((1, H), lambda i: (0, 0)),
        ],
        out_specs=(pl.BlockSpec((tr, H), lambda i: (i, 0)),
                   pl.BlockSpec((tr, H), lambda i: (i, 0))),
        input_output_aliases={1: 1},   # residual stream updated in place
        compiler_params=pltpu.CompilerParams(
            dimension_semantics=("parallel",),
            vmem_limit_bytes=VMEM_LIMIT,
        ),
    )(x, residual, w.reshape(1, H))


# --------------- qkv prep: split + qk-norm + RoPE + scaling -------------------

def _qkv_prep_kernel(qkv_ref, cos_ref, sin_ref, qn_ref, kn_ref,
                     q_ref, k_ref, v_ref, *,
                     num_q_heads, num_kv_heads, head_dim, eps, use_qk_norm, sm_scale):
    half = head_dim // 2
    x = qkv_ref[0]                                        # (tr, Hq + 2*Hkv, D)
    q = x[:, :num_q_heads, :].astype(jnp.float32)
    k = x[:, num_q_heads:num_q_heads + num_kv_heads, :].astype(jnp.float32)
    v = x[:, num_q_heads + num_kv_heads:, :]

    if use_qk_norm:
        qvar = jnp.mean(q * q, axis=-1, keepdims=True)
        q = q * jax.lax.rsqrt(qvar + eps) * qn_ref[0, :].astype(jnp.float32)
        kvar = jnp.mean(k * k, axis=-1, keepdims=True)
        k = k * jax.lax.rsqrt(kvar + eps) * kn_ref[0, :].astype(jnp.float32)

    cos = cos_ref[0][:, None, :]                          # (tr, 1, half)
    sin = sin_ref[0][:, None, :]

    def rope(t):
        t1 = t[..., :half]
        t2 = t[..., half:]
        return jnp.concatenate([t1 * cos - t2 * sin, t2 * cos + t1 * sin], axis=-1)

    q = rope(q) * sm_scale          # fold head_dim**-0.5 into q
    k = rope(k)
    q_ref[0] = q.astype(q_ref.dtype)
    k_ref[0] = k.astype(k_ref.dtype)
    v_ref[0] = v


def qkv_prep(qkv, cos, sin, q_norm_w, k_norm_w, cfg):
    """qkv: [B, S, Hq+2Hkv, D] -> q [B,S,Hq,D] (roped, scaled), k [B,S,Hkv,D], v."""
    B, S, NH, D = qkv.shape
    Hq, Hkv = cfg["num_heads"], cfg["num_kv_heads"]
    half = D // 2
    tr = _fit(S, DEFAULT_ROW_TILE)
    kern = partial(_qkv_prep_kernel,
                   num_q_heads=Hq, num_kv_heads=Hkv, head_dim=D,
                   eps=cfg["rms_norm_eps"], use_qk_norm=bool(cfg["qk_norm"]),
                   sm_scale=D ** -0.5)
    return pl.pallas_call(
        kern,
        out_shape=(jax.ShapeDtypeStruct((B, S, Hq, D), qkv.dtype),
                   jax.ShapeDtypeStruct((B, S, Hkv, D), qkv.dtype),
                   jax.ShapeDtypeStruct((B, S, Hkv, D), qkv.dtype)),
        grid=(B, S // tr),
        in_specs=[
            pl.BlockSpec((1, tr, NH, D), lambda b, s: (b, s, 0, 0)),
            pl.BlockSpec((1, tr, half), lambda b, s: (b, s, 0)),
            pl.BlockSpec((1, tr, half), lambda b, s: (b, s, 0)),
            pl.BlockSpec((1, D), lambda b, s: (0, 0)),
            pl.BlockSpec((1, D), lambda b, s: (0, 0)),
        ],
        out_specs=(
            pl.BlockSpec((1, tr, Hq, D), lambda b, s: (b, s, 0, 0)),
            pl.BlockSpec((1, tr, Hkv, D), lambda b, s: (b, s, 0, 0)),
            pl.BlockSpec((1, tr, Hkv, D), lambda b, s: (b, s, 0, 0)),
        ),
        compiler_params=pltpu.CompilerParams(
            dimension_semantics=("parallel", "parallel"),
            vmem_limit_bytes=VMEM_LIMIT,
        ),
    )(qkv, cos, sin, q_norm_w.reshape(1, D), k_norm_w.reshape(1, D))


# ---------------------- flash-style causal attention -------------------------

def _flash_attn_kernel(q_ref, k_ref, v_ref, o_ref, m_ref, l_ref, acc_ref, *,
                       num_q_heads, num_kv_heads, tq, tkv):
    qi = pl.program_id(1)
    ki = pl.program_id(2)
    group = num_q_heads // num_kv_heads

    @pl.when(ki == 0)
    def _init():
        m_ref[...] = jnp.full_like(m_ref, -jnp.inf)
        l_ref[...] = jnp.zeros_like(l_ref)
        acc_ref[...] = jnp.zeros_like(acc_ref)

    q_start = qi * tq
    k_start = ki * tkv

    def process(masked):
        if masked:
            row = q_start + jax.lax.broadcasted_iota(jnp.int32, (tq, tkv), 0)
            col = k_start + jax.lax.broadcasted_iota(jnp.int32, (tq, tkv), 1)
            causal = col <= row
        for hk in range(num_kv_heads):
            k_h = k_ref[0, :, hk, :]                  # (tkv, D)  shared by group
            v_h = v_ref[0, :, hk, :]                  # (tkv, D)
            for g in range(group):
                h = hk * group + g
                q_h = q_ref[0, :, h, :]               # (tq, D)  bf16, pre-scaled
                s = jax.lax.dot_general(
                    q_h, k_h, (((1,), (1,)), ((), ())),
                    preferred_element_type=jnp.float32)          # (tq, tkv)
                if masked:
                    s = jnp.where(causal, s, NEG_INF)
                m_prev = m_ref[h]                     # (tq, 1) contiguous slab
                l_prev = l_ref[h]
                m_new = jnp.maximum(m_prev, jnp.max(s, axis=-1, keepdims=True))
                alpha = jnp.exp(m_prev - m_new)
                p = jnp.exp(s - m_new)
                l_ref[h] = alpha * l_prev + jnp.sum(p, axis=-1, keepdims=True)
                acc_ref[h] = alpha * acc_ref[h] + jnp.dot(
                    p.astype(v_h.dtype), v_h, preferred_element_type=jnp.float32)
                m_ref[h] = m_new

    # KV block fully below the diagonal: no mask needed.
    @pl.when(k_start + (tkv - 1) <= q_start)
    def _full():
        process(masked=False)

    # KV block straddling the diagonal: apply the causal mask.
    # Blocks entirely above the diagonal do no compute at all.
    @pl.when(jnp.logical_and(k_start <= q_start + (tq - 1),
                             k_start + (tkv - 1) > q_start))
    def _diag():
        process(masked=True)

    @pl.when(ki == pl.num_programs(2) - 1)
    def _finalize():
        for h in range(num_q_heads):
            inv_l = pl.reciprocal(l_ref[h], approx=True)
            o_ref[0, :, h, :] = (acc_ref[h] * inv_l).astype(o_ref.dtype)


def flash_causal_attention(q, k, v):
    """q: [B, S, Hq, D] (pre-scaled); k, v: [B, S, Hkv, D] -> [B, S, Hq, D]."""
    B, S, Hq, D = q.shape
    Hkv = k.shape[2]
    tq = _fit(S, 256)
    tkv = tq                      # equal tiles so the KV index clamp below is valid
    kern = partial(_flash_attn_kernel, num_q_heads=Hq, num_kv_heads=Hkv,
                   tq=tq, tkv=tkv)
    # KV blocks above the causal diagonal are never computed; clamping their
    # block index to the Q block index keeps the index_map constant across the
    # skipped steps, so Pallas does not re-DMA K/V from HBM for them.
    kv_map = lambda b, i, j: (b, jnp.minimum(j, i), 0, 0)
    return pl.pallas_call(
        kern,
        out_shape=jax.ShapeDtypeStruct((B, S, Hq, D), q.dtype),
        grid=(B, S // tq, S // tkv),
        in_specs=[
            pl.BlockSpec((1, tq, Hq, D), lambda b, i, j: (b, i, 0, 0)),
            pl.BlockSpec((1, tkv, Hkv, D), kv_map),
            pl.BlockSpec((1, tkv, Hkv, D), kv_map),
        ],
        out_specs=pl.BlockSpec((1, tq, Hq, D), lambda b, i, j: (b, i, 0, 0)),
        scratch_shapes=[
            pltpu.VMEM((Hq, tq, 1), jnp.float32),    # running max   (head-major)
            pltpu.VMEM((Hq, tq, 1), jnp.float32),    # running denom (head-major)
            pltpu.VMEM((Hq, tq, D), jnp.float32),    # output accumulator
        ],
        compiler_params=pltpu.CompilerParams(
            dimension_semantics=("parallel", "parallel", "arbitrary"),
            vmem_limit_bytes=VMEM_LIMIT,
        ),
    )(q, k, v)


# ------------------------------ decoder layer --------------------------------

def rope_cos_sin(positions, head_dim, base):
    """Neox-style RoPE tables; computed once per forward (hoisted out of layers)."""
    half = head_dim // 2
    inv_freq = 1.0 / (base ** (jnp.arange(half, dtype=jnp.float32) / half))
    freqs = positions.astype(jnp.float32)[..., None] * inv_freq   # [B, S, half]
    return jnp.cos(freqs), jnp.sin(freqs)


def llama_decoder_layer(params, cos, sin, hidden_states, residual, cfg):
    """LlamaDecoderLayer.forward (prefill).  Returns (hidden_states, residual)."""
    B, S, H = hidden_states.shape
    Hq, Hkv, D = cfg["num_heads"], cfg["num_kv_heads"], cfg["head_dim"]
    I = cfg["intermediate_size"]
    eps = cfg["rms_norm_eps"]
    depth_scale = (cfg["scale_depth"] / math.sqrt(cfg["num_layers"])
                   if cfg["scale_depth"] > 0 else 1.0)

    x2 = hidden_states.reshape(B * S, H)
    if residual is None:
        residual2 = x2
        h2 = rmsnorm(x2, params["input_ln"], eps)
    else:
        h2, residual2 = add_rmsnorm(x2, residual.reshape(B * S, H),
                                    params["input_ln"], eps)

    # ---- self attention ----
    qkv = matmul(h2, params["wqkv"])                          # [B*S, (Hq+2Hkv)*D]
    qkv = qkv.reshape(B, S, Hq + 2 * Hkv, D)                  # free reshape
    q, k, v = qkv_prep(qkv, cos, sin, params["q_norm"], params["k_norm"], cfg)
    # TODO(synk): paged KV-cache write/read not modeled; prefill causal attention only.
    attn = flash_causal_attention(q, k, v)                    # [B, S, Hq, D]
    attn_out = matmul(attn.reshape(B * S, Hq * D), params["wo"],
                      out_scale=depth_scale)                  # depth scale folded in

    h2, residual2 = add_rmsnorm(attn_out, residual2, params["post_ln"], eps)

    # ---- MLP ----
    gate_up = matmul(h2, params["w_gate_up"])                 # [B*S, 2I]
    mlp_out = silu_mul_matmul(gate_up.reshape(B * S, 2, I), params["w_down"],
                              out_scale=depth_scale)          # SiluAndMul fused

    return mlp_out.reshape(B, S, H), residual2.reshape(B, S, H)


def init_layer_params(key, cfg):
    H, D = cfg["hidden_size"], cfg["head_dim"]
    Hq, Hkv = cfg["num_heads"], cfg["num_kv_heads"]
    I = cfg["intermediate_size"]

    def w(k, shape):
        return (0.02 * jax.random.normal(k, shape, dtype=jnp.float32)).astype(jnp.bfloat16)

    k0, k1, k2, k3 = jax.random.split(key, 4)
    return {
        # all linear weights pre-transposed: [in_features, out_features], bf16
        "wqkv": w(k0, (H, (Hq + 2 * Hkv) * D)),
        "wo": w(k1, (Hq * D, H)),
        "w_gate_up": w(k2, (H, 2 * I)),
        "w_down": w(k3, (I, H)),
        "input_ln": jnp.ones((H,), jnp.bfloat16),
        "post_ln": jnp.ones((H,), jnp.bfloat16),
        "q_norm": jnp.ones((D,), jnp.bfloat16),
        "k_norm": jnp.ones((D,), jnp.bfloat16),
    }


# ---------------------------------- main --------------------------------------

if __name__ == "__main__":
    cfg = dict(
        hidden_size=32,
        num_heads=4,
        num_kv_heads=2,
        head_dim=8,               # hidden_size // num_heads
        intermediate_size=64,
        num_layers=2,
        rms_norm_eps=1e-6,
        rope_theta=10000.0,
        qk_norm=True,
        scale_depth=1.4,
    )

    key = jax.random.PRNGKey(0)
    pk1, pk2, hk = jax.random.split(key, 3)
    params1 = init_layer_params(pk1, cfg)
    params2 = init_layer_params(pk2, cfg)

    B, S = 2, 8
    hidden = jax.random.normal(hk, (B, S, cfg["hidden_size"]),
                               dtype=jnp.float32).astype(jnp.bfloat16)
    positions = jnp.broadcast_to(jnp.arange(S, dtype=jnp.int32), (B, S))
    cos, sin = rope_cos_sin(positions, cfg["head_dim"], cfg["rope_theta"])

    layer = jax.jit(partial(llama_decoder_layer, cfg=cfg))

    # First decoder layer (residual is None), then a second stacked layer.
    h1, r1 = layer(params1, cos, sin, hidden, None)
    h2, r2 = layer(params2, cos, sin, h1, r1)

    jax.block_until_ready(h2)
    jax.block_until_ready(r2)
    print("KERNEL_OK")
</pallas_src>

<mosaic_0001>
module attributes {stable_mosaic.version = 11 : i64} {
  func.func @_matmul_kernel(%arg0: i32, %arg1: i32, %arg2: i32, %arg3: memref<16x32xbf16, #tpu.memory_space<vmem>>, %arg4: memref<32x64xbf16, #tpu.memory_space<vmem>>, %arg5: memref<16x64xbf16, #tpu.memory_space<vmem>>, %arg6: memref<16x64xf32, #tpu.memory_space<vmem>>) attributes {dimension_semantics = [#tpu.dimension_semantics<parallel>, #tpu.dimension_semantics<parallel>, #tpu.dimension_semantics<arbitrary>], iteration_bounds = array<i64: 1, 1, 1>, scalar_prefetch = 0 : i64, scratch_operands = 1 : i64, tpu.core_type = #tpu.core_type<tc>, window_params = [{transform_indices = @transform_0, window_bounds = array<i64: 16, 32>}, {transform_indices = @transform_1, window_bounds = array<i64: 32, 64>}, {transform_indices = @transform_2, window_bounds = array<i64: 16, 64>}]} {
    %c0_i32 = arith.constant 0 : i32
    %0 = arith.cmpi eq, %arg2, %c0_i32 : i32
    %1 = arith.extui %0 : i1 to i32
    %c0_i32_0 = arith.constant 0 : i32
    %2 = arith.cmpi ne, %1, %c0_i32_0 : i32
    scf.if %2 {
      %cst_10 = arith.constant 0.000000e+00 : f32
      %12 = vector.broadcast %cst_10 : f32 to vector<16x64xf32>
      %c0_11 = arith.constant 0 : index
      %c0_12 = arith.constant 0 : index
      %13 = vector.load %arg6[%c0_11, %c0_12] : memref<16x64xf32, #tpu.memory_space<vmem>>, vector<16x64xf32>
      tpu.vector_store %arg6[%c0_11, %c0_12], %12 {strides = array<i32>} : memref<16x64xf32, #tpu.memory_space<vmem>>, vector<16x64xf32>,
    } else {
    }
    %c0 = arith.constant 0 : index
    %c0_1 = arith.constant 0 : index
    %3 = vector.load %arg6[%c0, %c0_1] : memref<16x64xf32, #tpu.memory_space<vmem>>, vector<16x64xf32>
    %c0_2 = arith.constant 0 : index
    %c0_3 = arith.constant 0 : index
    %4 = vector.load %arg3[%c0_2, %c0_3] : memref<16x32xbf16, #tpu.memory_space<vmem>>, vector<16x32xbf16>
    %c0_4 = arith.constant 0 : index
    %c0_5 = arith.constant 0 : index
    %5 = vector.load %arg4[%c0_4, %c0_5] : memref<32x64xbf16, #tpu.memory_space<vmem>>, vector<32x64xbf16>
    %cst = arith.constant dense<0.000000e+00> : vector<16x64xf32>
    %6 = tpu.matmul %4, %5, %cst {dimension_numbers = #tpu.dot_dimension_numbers<[1], [0], [0], [1], [0, 0, 1, 1], [], []>} : vector<16x32xbf16>, vector<32x64xbf16>, vector<16x64xf32> -> vector<16x64xf32>
    %7 = arith.addf %3, %6 : vector<16x64xf32>
    %c0_6 = arith.constant 0 : index
    %c0_7 = arith.constant 0 : index
    %8 = vector.load %arg6[%c0_6, %c0_7] : memref<16x64xf32, #tpu.memory_space<vmem>>, vector<16x64xf32>
    tpu.vector_store %arg6[%c0_6, %c0_7], %7 {strides = array<i32>} : memref<16x64xf32, #tpu.memory_space<vmem>>, vector<16x64xf32>,
    %c0_i32_8 = arith.constant 0 : i32
    %9 = arith.cmpi eq, %arg2, %c0_i32_8 : i32
    %10 = arith.extui %9 : i1 to i32
    %c0_i32_9 = arith.constant 0 : i32
    %11 = arith.cmpi ne, %10, %c0_i32_9 : i32
    scf.if %11 {
      %c0_10 = arith.constant 0 : index
      %c0_11 = arith.constant 0 : index
      %12 = vector.load %arg6[%c0_10, %c0_11] : memref<16x64xf32, #tpu.memory_space<vmem>>, vector<16x64xf32>
      %13 = arith.truncf %12 : vector<16x64xf32> to vector<16x64xbf16>
      %c0_12 = arith.constant 0 : index
      %c0_13 = arith.constant 0 : index
      %14 = vector.load %arg5[%c0_12, %c0_13] : memref<16x64xbf16, #tpu.memory_space<vmem>>, vector<16x64xbf16>
      tpu.vector_store %arg5[%c0_12, %c0_13], %13 {strides = array<i32>} : memref<16x64xbf16, #tpu.memory_space<vmem>>, vector<16x64xbf16>,
    } else {
    }
    return
  }
  func.func @transform_0(%arg0: i32, %arg1: i32, %arg2: i32) -> (i32, i32) {
    %c0_i32 = arith.constant 0 : i32
    return %arg0, %arg2 : i32, i32
  }
  func.func @transform_1(%arg0: i32, %arg1: i32, %arg2: i32) -> (i32, i32) {
    %c0_i32 = arith.constant 0 : i32
    return %arg2, %arg1 : i32, i32
  }
  func.func @transform_2(%arg0: i32, %arg1: i32, %arg2: i32) -> (i32, i32) {
    %c0_i32 = arith.constant 0 : i32
    return %arg0, %arg1 : i32, i32
  }
}

module attributes {stable_mosaic.version = 11 : i64} {
  func.func @_rmsnorm_kernel(%arg0: i32, %arg1: memref<16x32xbf16, #tpu.memory_space<vmem>>, %arg2: memref<1x32xbf16, #tpu.memory_space<vmem>>, %arg3: memref<16x32xbf16, #tpu.memory_space<vmem>>) attributes {dimension_semantics = [#tpu.dimension_semantics<parallel>], iteration_bounds = array<i64: 1>, scalar_prefetch = 0 : i64, scratch_operands = 0 : i64, tpu.core_type = #tpu.core_type<tc>, window_params = [{transform_indices = @transform_0, window_bounds = array<i64: 16, 32>}, {pipeline_mode = #tpu.pipeline_mode<synchronous>, transform_indices = @transform_1, window_bounds = array<i64: 1, 32>}, {transform_indices = @transform_2, window_bounds = array<i64: 16, 32>}]} {
    %c0 = arith.constant 0 : index
    %c0_0 = arith.constant 0 : index
    %0 = vector.load %arg1[%c0, %c0_0] : memref<16x32xbf16, #tpu.memory_space<vmem>>, vector<16x32xbf16>
    %1 = arith.extf %0 : vector<16x32xbf16> to vector<16x32xf32>
    %2 = arith.mulf %1, %1 : vector<16x32xf32>
    %cst = arith.constant dense<0.000000e+00> : vector<16xf32>
    %3 = vector.multi_reduction <add>, %2, %cst [1] : vector<16x32xf32> to vector<16xf32>
    %4 = vector.shape_cast %3 : vector<16xf32> to vector<16x1xf32>
    %cst_1 = arith.constant 3.200000e+01 : f32
    %5 = vector.broadcast %cst_1 : f32 to vector<16x1xf32>
    %6 = arith.divf %4, %5 : vector<16x1xf32>
    %cst_2 = arith.constant 9.99999997E-7 : f32
    %7 = vector.broadcast %cst_2 : f32 to vector<16x1xf32>
    %8 = arith.addf %6, %7 : vector<16x1xf32>
    %9 = math.rsqrt %8 : vector<16x1xf32>
    %10 = vector.broadcast %9 : vector<16x1xf32> to vector<16x32xf32>
    %11 = arith.mulf %1, %10 : vector<16x32xf32>
    %12 = arith.truncf %11 : vector<16x32xf32> to vector<16x32xbf16>
    %c0_3 = arith.constant 0 : index
    %c0_4 = arith.constant 0 : index
    %13 = vector.load %arg2[%c0_3, %c0_4] : memref<1x32xbf16, #tpu.memory_space<vmem>>, vector<1x32xbf16>
    %14 = vector.broadcast %13 : vector<1x32xbf16> to vector<16x32xbf16>
    %15 = arith.mulf %12, %14 : vector<16x32xbf16>
    %c0_5 = arith.constant 0 : index
    %c0_6 = arith.constant 0 : index
    %16 = vector.load %arg3[%c0_5, %c0_6] : memref<16x32xbf16, #tpu.memory_space<vmem>>, vector<16x32xbf16>
    tpu.vector_store %arg3[%c0_5, %c0_6], %15 {strides = array<i32>} : memref<16x32xbf16, #tpu.memory_space<vmem>>, vector<16x32xbf16>,
    return
  }
  func.func @transform_0(%arg0: i32) -> (i32, i32) {
    %c0_i32 = arith.constant 0 : i32
    %c0_i32_0 = arith.constant 0 : i32
    return %arg0, %c0_i32 : i32, i32
  }
  func.func @transform_1(%arg0: i32) -> (i32, i32) {
    %c0_i32 = arith.constant 0 : i32
    %c0_i32_0 = arith.constant 0 : i32
    %c0_i32_1 = arith.constant 0 : i32
    return %c0_i32, %c0_i32_0 : i32, i32
  }
  func.func @transform_2(%arg0: i32) -> (i32, i32) {
    %c0_i32 = arith.constant 0 : i32
    %c0_i32_0 = arith.constant 0 : i32
    return %arg0, %c0_i32 : i32, i32
  }
}

module attributes {stable_mosaic.version = 11 : i64} {
  func.func @_qkv_prep_kernel(%arg0: i32, %arg1: i32, %arg2: memref<1x8x8x8xbf16, #tpu.memory_space<vmem>>, %arg3: memref<1x8x4xf32, #tpu.memory_space<vmem>>, %arg4: memref<1x8x4xf32, #tpu.memory_space<vmem>>, %arg5: memref<1x8xbf16, #tpu.memory_space<vmem>>, %arg6: memref<1x8xbf16, #tpu.memory_space<vmem>>, %arg7: memref<1x8x4x8xbf16, #tpu.memory_space<vmem>>, %arg8: memref<1x8x2x8xbf16, #tpu.memory_space<vmem>>, %arg9: memref<1x8x2x8xbf16, #tpu.memory_space<vmem>>) attributes {dimension_semantics = [#tpu.dimension_semantics<parallel>, #tpu.dimension_semantics<parallel>], iteration_bounds = array<i64: 2, 1>, scalar_prefetch = 0 : i64, scratch_operands = 0 : i64, tpu.core_type = #tpu.core_type<tc>, window_params = [{transform_indices = @transform_0, window_bounds = array<i64: 1, 8, 8, 8>}, {transform_indices = @transform_1, window_bounds = array<i64: 1, 8, 4>}, {transform_indices = @transform_2, window_bounds = array<i64: 1, 8, 4>}, {pipeline_mode = #tpu.pipeline_mode<synchronous>, transform_indices = @transform_3, window_bounds = array<i64: 1, 8>}, {pipeline_mode = #tpu.pipeline_mode<synchronous>, transform_indices = @transform_4, window_bounds = array<i64: 1, 8>}, {transform_indices = @transform_5, window_bounds = array<i64: 1, 8, 4, 8>}, {transform_indices = @transform_6, window_bounds = array<i64: 1, 8, 2, 8>}, {transform_indices = @transform_7, window_bounds = array<i64: 1, 8, 2, 8>}]} {
    %c0 = arith.constant 0 : index
    %c0_0 = arith.constant 0 : index
    %c0_1 = arith.constant 0 : index
    %c0_2 = arith.constant 0 : index
    %0 = vector.load %arg2[%c0, %c0_0, %c0_1, %c0_2] : memref<1x8x8x8xbf16, #tpu.memory_space<vmem>>, vector<1x8x8x8xbf16>
    %1 = vector.shape_cast %0 : vector<1x8x8x8xbf16> to vector<8x8x8xbf16>
    %2 = vector.extract_strided_slice %1 {offsets = [0, 0, 0], sizes = [8, 4, 8], strides = [1, 1, 1]} : vector<8x8x8xbf16> to vector<8x4x8xbf16>
    %3 = arith.extf %2 : vector<8x4x8xbf16> to vector<8x4x8xf32>
    %4 = vector.extract_strided_slice %1 {offsets = [0, 4, 0], sizes = [8, 2, 8], strides = [1, 1, 1]} : vector<8x8x8xbf16> to vector<8x2x8xbf16>
    %5 = arith.extf %4 : vector<8x2x8xbf16> to vector<8x2x8xf32>
    %6 = vector.extract_strided_slice %1 {offsets = [0, 6, 0], sizes = [8, 2, 8], strides = [1, 1, 1]} : vector<8x8x8xbf16> to vector<8x2x8xbf16>
    %7 = arith.mulf %3, %3 : vector<8x4x8xf32>
    %cst = arith.constant dense<0.000000e+00> : vector<8x4xf32>
    %8 = vector.multi_reduction <add>, %7, %cst [2] : vector<8x4x8xf32> to vector<8x4xf32>
    %9 = vector.shape_cast %8 : vector<8x4xf32> to vector<8x4x1xf32>
    %cst_3 = arith.constant 8.000000e+00 : f32
    %10 = vector.broadcast %cst_3 : f32 to vector<8x4x1xf32>
    %11 = arith.divf %9, %10 : vector<8x4x1xf32>
    %cst_4 = arith.constant 9.99999997E-7 : f32
    %12 = vector.broadcast %cst_4 : f32 to vector<8x4x1xf32>
    %13 = arith.addf %11, %12 : vector<8x4x1xf32>
    %14 = math.rsqrt %13 : vector<8x4x1xf32>
    %15 = vector.broadcast %14 : vector<8x4x1xf32> to vector<8x4x8xf32>
    %16 = arith.mulf %3, %15 : vector<8x4x8xf32>
    %c0_5 = arith.constant 0 : index
    %c0_6 = arith.constant 0 : index
    %17 = vector.load %arg5[%c0_5, %c0_6] : memref<1x8xbf16, #tpu.memory_space<vmem>>, vector<1x8xbf16>
    %18 = vector.shape_cast %17 : vector<1x8xbf16> to vector<8xbf16>
    %19 = arith.extf %18 : vector<8xbf16> to vector<8xf32>
    %20 = vector.shape_cast %19 : vector<8xf32> to vector<1x1x8xf32>
    %21 = vector.broadcast %20 : vector<1x1x8xf32> to vector<8x4x8xf32>
    %22 = arith.mulf %16, %21 : vector<8x4x8xf32>
    %23 = arith.mulf %5, %5 : vector<8x2x8xf32>
    %cst_7 = arith.constant dense<0.000000e+00> : vector<8x2xf32>
    %24 = vector.multi_reduction <add>, %23, %cst_7 [2] : vector<8x2x8xf32> to vector<8x2xf32>
    %25 = vector.shape_cast %24 : vector<8x2xf32> to vector<8x2x1xf32>
    %cst_8 = arith.constant 8.000000e+00 : f32
    %26 = vector.broadcast %cst_8 : f32 to vector<8x2x1xf32>
    %27 = arith.divf %25, %26 : vector<8x2x1xf32>
    %cst_9 = arith.constant 9.99999997E-7 : f32
    %28 = vector.broadcast %cst_9 : f32 to vector<8x2x1xf32>
    %29 = arith.addf %27, %28 : vector<8x2x1xf32>
    %30 = math.rsqrt %29 : vector<8x2x1xf32>
    %31 = vector.broadcast %30 : vector<8x2x1xf32> to vector<8x2x8xf32>
    %32 = arith.mulf %5, %31 : vector<8x2x8xf32>
    %c0_10 = arith.constant 0 : index
    %c0_11 = arith.constant 0 : index
    %33 = vector.load %arg6[%c0_10, %c0_11] : memref<1x8xbf16, #tpu.memory_space<vmem>>, vector<1x8xbf16>
    %34 = vector.shape_cast %33 : vector<1x8xbf16> to vector<8xbf16>
    %35 = arith.extf %34 : vector<8xbf16> to vector<8xf32>
    %36 = vector.shape_cast %35 : vector<8xf32> to vector<1x1x8xf32>
    %37 = vector.broadcast %36 : vector<1x1x8xf32> to vector<8x2x8xf32>
    %38 = arith.mulf %32, %37 : vector<8x2x8xf32>
    %c0_12 = arith.constant 0 : index
    %c0_13 = arith.constant 0 : index
    %c0_14 = arith.constant 0 : index
    %39 = vector.load %arg3[%c0_12, %c0_13, %c0_14] : memref<1x8x4xf32, #tpu.memory_space<vmem>>, vector<1x8x4xf32>
    %40 = vector.shape_cast %39 : vector<1x8x4xf32> to vector<8x4xf32>
    %41 = vector.shape_cast %40 : vector<8x4xf32> to vector<8x1x4xf32>
    %c0_15 = arith.constant 0 : index
    %c0_16 = arith.constant 0 : index
    %c0_17 = arith.constant 0 : index
    %42 = vector.load %arg4[%c0_15, %c0_16, %c0_17] : memref<1x8x4xf32, #tpu.memory_space<vmem>>, vector<1x8x4xf32>
    %43 = vector.shape_cast %42 : vector<1x8x4xf32> to vector<8x4xf32>
    %44 = vector.shape_cast %43 : vector<8x4xf32> to vector<8x1x4xf32>
    %45 = vector.extract_strided_slice %22 {offsets = [0, 0, 0], sizes = [8, 4, 4], strides = [1, 1, 1]} : vector<8x4x8xf32> to vector<8x4x4xf32>
    %46 = vector.extract_strided_slice %22 {offsets = [0, 0, 4], sizes = [8, 4, 4], strides = [1, 1, 1]} : vector<8x4x8xf32> to vector<8x4x4xf32>
    %47 = vector.broadcast %41 : vector<8x1x4xf32> to vector<8x4x4xf32>
    %48 = arith.mulf %45, %47 : vector<8x4x4xf32>
    %49 = vector.broadcast %44 : vector<8x1x4xf32> to vector<8x4x4xf32>
    %50 = arith.mulf %46, %49 : vector<8x4x4xf32>
    %51 = arith.subf %48, %50 : vector<8x4x4xf32>
    %52 = vector.broadcast %41 : vector<8x1x4xf32> to vector<8x4x4xf32>
    %53 = arith.mulf %46, %52 : vector<8x4x4xf32>
    %54 = vector.broadcast %44 : vector<8x1x4xf32> to vector<8x4x4xf32>
    %55 = arith.mulf %45, %54 : vector<8x4x4xf32>
    %56 = arith.addf %53, %55 : vector<8x4x4xf32>
    %57 = tpu.concatenate %51, %56 in 2 : vector<8x4x4xf32>, vector<8x4x4xf32> -> vector<8x4x8xf32>
    %cst_18 = arith.constant 0.353553385 : f32
    %58 = vector.broadcast %cst_18 : f32 to vector<8x4x8xf32>
    %59 = arith.mulf %57, %58 : vector<8x4x8xf32>
    %60 = vector.extract_strided_slice %38 {offsets = [0, 0, 0], sizes = [8, 2, 4], strides = [1, 1, 1]} : vector<8x2x8xf32> to vector<8x2x4xf32>
    %61 = vector.extract_strided_slice %38 {offsets = [0, 0, 4], sizes = [8, 2, 4], strides = [1, 1, 1]} : vector<8x2x8xf32> to vector<8x2x4xf32>
    %62 = vector.broadcast %41 : vector<8x1x4xf32> to vector<8x2x4xf32>
    %63 = arith.mulf %60, %62 : vector<8x2x4xf32>
    %64 = vector.broadcast %44 : vector<8x1x4xf32> to vector<8x2x4xf32>
    %65 = arith.mulf %61, %64 : vector<8x2x4xf32>
    %66 = arith.subf %63, %65 : vector<8x2x4xf32>
    %67 = vector.broadcast %41 : vector<8x1x4xf32> to vector<8x2x4xf32>
    %68 = arith.mulf %61, %67 : vector<8x2x4xf32>
    %69 = vector.broadcast %44 : vector<8x1x4xf32> to vector<8x2x4xf32>
    %70 = arith.mulf %60, %69 : vector<8x2x4xf32>
    %71 = arith.addf %68, %70 : vector<8x2x4xf32>
    %72 = tpu.concatenate %66, %71 in 2 : vector<8x2x4xf32>, vector<8x2x4xf32> -> vector<8x2x8xf32>
    %73 = arith.truncf %59 : vector<8x4x8xf32> to vector<8x4x8xbf16>
    %c0_19 = arith.constant 0 : index
    %c0_20 = arith.constant 0 : index
    %c0_21 = arith.constant 0 : index
    %c0_22 = arith.constant 0 : index
    %74 = vector.load %arg7[%c0_19, %c0_20, %c0_21, %c0_22] : memref<1x8x4x8xbf16, #tpu.memory_space<vmem>>, vector<1x8x4x8xbf16>
    %75 = vector.shape_cast %74 : vector<1x8x4x8xbf16> to vector<8x4x8xbf16>
    %76 = vector.shape_cast %73 : vector<8x4x8xbf16> to vector<1x8x4x8xbf16>
    tpu.vector_store %arg7[%c0_19, %c0_20, %c0_21, %c0_22], %76 {strides = array<i32>} : memref<1x8x4x8xbf16, #tpu.memory_space<vmem>>, vector<1x8x4x8xbf16>,
    %77 = arith.truncf %72 : vector<8x2x8xf32> to vector<8x2x8xbf16>
    %c0_23 = arith.constant 0 : index
    %c0_24 = arith.constant 0 : index
    %c0_25 = arith.constant 0 : index
    %c0_26 = arith.constant 0 : index
    %78 = vector.load %arg8[%c0_23, %c0_24, %c0_25, %c0_26] : memref<1x8x2x8xbf16, #tpu.memory_space<vmem>>, vector<1x8x2x8xbf16>
    %79 = vector.shape_cast %78 : vector<1x8x2x8xbf16> to vector<8x2x8xbf16>
    %80 = vector.shape_cast %77 : vector<8x2x8xbf16> to vector<1x8x2x8xbf16>
    tpu.vector_store %arg8[%c0_23, %c0_24, %c0_25, %c0_26], %80 {strides = array<i32>} : memref<1x8x2x8xbf16, #tpu.memory_space<vmem>>, vector<1x8x2x8xbf16>,
    %c0_27 = arith.constant 0 : index
    %c0_28 = arith.constant 0 : index
    %c0_29 = arith.constant 0 : index
    %c0_30 = arith.constant 0 : index
    %81 = vector.load %arg9[%c0_27, %c0_28, %c0_29, %c0_30] : memref<1x8x2x8xbf16, #tpu.memory_space<vmem>>, vector<1x8x2x8xbf16>
    %82 = vector.shape_cast %81 : vector<1x8x2x8xbf16> to vector<8x2x8xbf16>
    %83 = vector.shape_cast %6 : vector<8x2x8xbf16> to vector<1x8x2x8xbf16>
    tpu.vector_store %arg9[%c0_27, %c0_28, %c0_29, %c0_30], %83 {strides = array<i32>} : memref<1x8x2x8xbf16, #tpu.memory_space<vmem>>, vector<1x8x2x8xbf16>,
    return
  }
  func.func @transform_0(%arg0: i32, %arg1: i32) -> (i32, i32, i32, i32) {
    %c0_i32 = arith.constant 0 : i32
    %c0_i32_0 = arith.constant 0 : i32
    %c0_i32_1 = arith.constant 0 : i32
    return %arg0, %arg1, %c0_i32, %c0_i32_0 : i32, i32, i32, i32
  }
  func.func @transform_1(%arg0: i32, %arg1: i32) -> (i32, i32, i32) {
    %c0_i32 = arith.constant 0 : i32
    %c0_i32_0 = arith.constant 0 : i32
    return %arg0, %arg1, %c0_i32 : i32, i32, i32
  }
  func.func @transform_2(%arg0: i32, %arg1: i32) -> (i32, i32, i32) {
    %c0_i32 = arith.constant 0 : i32
    %c0_i32_0 = arith.constant 0 : i32
    return %arg0, %arg1, %c0_i32 : i32, i32, i32
  }
  func.func @transform_3(%arg0: i32, %arg1: i32) -> (i32, i32) {
    %c0_i32 = arith.constant 0 : i32
    %c0_i32_0 = arith.constant 0 : i32
    %c0_i32_1 = arith.constant 0 : i32
    return %c0_i32, %c0_i32_0 : i32, i32
  }
  func.func @transform_4(%arg0: i32, %arg1: i32) -> (i32, i32) {
    %c0_i32 = arith.constant 0 : i32
    %c0_i32_0 = arith.constant 0 : i32
    %c0_i32_1 = arith.constant 0 : i32
    return %c0_i32, %c0_i32_0 : i32, i32
  }
  func.func @transform_5(%arg0: i32, %arg1: i32) -> (i32, i32, i32, i32) {
    %c0_i32 = arith.constant 0 : i32
    %c0_i32_0 = arith.constant 0 : i32
    %c0_i32_1 = arith.constant 0 : i32
    return %arg0, %arg1, %c0_i32, %c0_i32_0 : i32, i32, i32, i32
  }
  func.func @transform_6(%arg0: i32, %arg1: i32) -> (i32, i32, i32, i32) {
    %c0_i32 = arith.constant 0 : i32
    %c0_i32_0 = arith.constant 0 : i32
    %c0_i32_1 = arith.constant 0 : i32
    return %arg0, %arg1, %c0_i32, %c0_i32_0 : i32, i32, i32, i32
  }
  func.func @transform_7(%arg0: i32, %arg1: i32) -> (i32, i32, i32, i32) {
    %c0_i32 = arith.constant 0 : i32
    %c0_i32_0 = arith.constant 0 : i32
    %c0_i32_1 = arith.constant 0 : i32
    return %arg0, %arg1, %c0_i32, %c0_i32_0 : i32, i32, i32, i32
  }
}

module attributes {stable_mosaic.version = 11 : i64} {
  func.func @_flash_attn_kernel(%arg0: i32, %arg1: i32, %arg2: i32, %arg3: memref<1x8x4x8xbf16, #tpu.memory_space<vmem>>, %arg4: memref<1x8x2x8xbf16, #tpu.memory_space<vmem>>, %arg5: memref<1x8x2x8xbf16, #tpu.memory_space<vmem>>, %arg6: memref<1x8x4x8xbf16, #tpu.memory_space<vmem>>, %arg7: memref<4x8x1xf32, #tpu.memory_space<vmem>>, %arg8: memref<4x8x1xf32, #tpu.memory_space<vmem>>, %arg9: memref<4x8x8xf32, #tpu.memory_space<vmem>>) attributes {dimension_semantics = [#tpu.dimension_semantics<parallel>, #tpu.dimension_semantics<parallel>, #tpu.dimension_semantics<arbitrary>], iteration_bounds = array<i64: 2, 1, 1>, scalar_prefetch = 0 : i64, scratch_operands = 3 : i64, tpu.core_type = #tpu.core_type<tc>, window_params = [{transform_indices = @transform_0, window_bounds = array<i64: 1, 8, 4, 8>}, {transform_indices = @transform_1, window_bounds = array<i64: 1, 8, 2, 8>}, {transform_indices = @transform_2, window_bounds = array<i64: 1, 8, 2, 8>}, {transform_indices = @transform_3, window_bounds = array<i64: 1, 8, 4, 8>}]} {
    %c0_i32 = arith.constant 0 : i32
    %0 = arith.cmpi eq, %arg2, %c0_i32 : i32
    %1 = arith.extui %0 : i1 to i32
    %c0_i32_0 = arith.constant 0 : i32
    %2 = arith.cmpi ne, %1, %c0_i32_0 : i32
    scf.if %2 {
      %cst = arith.constant 0xFF800000 : f32
      %19 = vector.broadcast %cst : f32 to vector<4x8x1xf32>
      %c0 = arith.constant 0 : index
      %c0_8 = arith.constant 0 : index
      %c0_9 = arith.constant 0 : index
      %20 = vector.load %arg7[%c0, %c0_8, %c0_9] : memref<4x8x1xf32, #tpu.memory_space<vmem>>, vector<4x8x1xf32>
      tpu.vector_store %arg7[%c0, %c0_8, %c0_9], %19 {strides = array<i32>} : memref<4x8x1xf32, #tpu.memory_space<vmem>>, vector<4x8x1xf32>,
      %cst_10 = arith.constant 0.000000e+00 : f32
      %21 = vector.broadcast %cst_10 : f32 to vector<4x8x1xf32>
      %c0_11 = arith.constant 0 : index
      %c0_12 = arith.constant 0 : index
      %c0_13 = arith.constant 0 : index
      %22 = vector.load %arg8[%c0_11, %c0_12, %c0_13] : memref<4x8x1xf32, #tpu.memory_space<vmem>>, vector<4x8x1xf32>
      tpu.vector_store %arg8[%c0_11, %c0_12, %c0_13], %21 {strides = array<i32>} : memref<4x8x1xf32, #tpu.memory_space<vmem>>, vector<4x8x1xf32>,
      %cst_14 = arith.constant 0.000000e+00 : f32
      %23 = vector.broadcast %cst_14 : f32 to vector<4x8x8xf32>
      %c0_15 = arith.constant 0 : index
      %c0_16 = arith.constant 0 : index
      %c0_17 = arith.constant 0 : index
      %24 = vector.load %arg9[%c0_15, %c0_16, %c0_17] : memref<4x8x8xf32, #tpu.memory_space<vmem>>, vector<4x8x8xf32>
      tpu.vector_store %arg9[%c0_15, %c0_16, %c0_17], %23 {strides = array<i32>} : memref<4x8x8xf32, #tpu.memory_space<vmem>>, vector<4x8x8xf32>,
    } else {
    }
    %c8_i32 = arith.constant 8 : i32
    %3 = arith.muli %arg1, %c8_i32 : i32
    %c8_i32_1 = arith.constant 8 : i32
    %4 = arith.muli %arg2, %c8_i32_1 : i32
    %c7_i32 = arith.constant 7 : i32
    %5 = arith.addi %4, %c7_i32 : i32
    %6 = arith.cmpi sle, %5, %3 : i32
    %7 = arith.extui %6 : i1 to i32
    %c0_i32_2 = arith.constant 0 : i32
    %8 = arith.cmpi ne, %7, %c0_i32_2 : i32
    scf.if %8 {
      %c0 = arith.constant 0 : index
      %c0_8 = arith.constant 0 : index
      %c0_9 = arith.constant 0 : index
      %c0_10 = arith.constant 0 : index
      %19 = vector.load %arg4[%c0, %c0_8, %c0_9, %c0_10] : memref<1x8x2x8xbf16, #tpu.memory_space<vmem>>, vector<1x8x1x8xbf16>
      %20 = vector.shape_cast %19 : vector<1x8x1x8xbf16> to vector<8x8xbf16>
      %c0_11 = arith.constant 0 : index
      %c0_12 = arith.constant 0 : index
      %c0_13 = arith.constant 0 : index
      %c0_14 = arith.constant 0 : index
      %21 = vector.load %arg5[%c0_11, %c0_12, %c0_13, %c0_14] : memref<1x8x2x8xbf16, #tpu.memory_space<vmem>>, vector<1x8x1x8xbf16>
      %22 = vector.shape_cast %21 : vector<1x8x1x8xbf16> to vector<8x8xbf16>
      %c0_15 = arith.constant 0 : index
      %c0_16 = arith.constant 0 : index
      %c0_17 = arith.constant 0 : index
      %c0_18 = arith.constant 0 : index
      %23 = vector.load %arg3[%c0_15, %c0_16, %c0_17, %c0_18] : memref<1x8x4x8xbf16, #tpu.memory_space<vmem>>, vector<1x8x1x8xbf16>
      %24 = vector.shape_cast %23 : vector<1x8x1x8xbf16> to vector<8x8xbf16>
      %cst = arith.constant dense<0.000000e+00> : vector<8x8xf32>
      %25 = tpu.matmul %24, %20, %cst {dimension_numbers = #tpu.dot_dimension_numbers<[1], [1], [0], [0], [0, 0, 1, 0], [], []>} : vector<8x8xbf16>, vector<8x8xbf16>, vector<8x8xf32> -> vector<8x8xf32>
      %c0_19 = arith.constant 0 : index
      %c0_20 = arith.constant 0 : index
      %c0_21 = arith.constant 0 : index
      %26 = vector.load %arg7[%c0_19, %c0_20, %c0_21] : memref<4x8x1xf32, #tpu.memory_space<vmem>>, vector<1x8x1xf32>
      %27 = vector.shape_cast %26 : vector<1x8x1xf32> to vector<8x1xf32>
      %c0_22 = arith.constant 0 : index
      %c0_23 = arith.constant 0 : index
      %c0_24 = arith.constant 0 : index
      %28 = vector.load %arg8[%c0_22, %c0_23, %c0_24] : memref<4x8x1xf32, #tpu.memory_space<vmem>>, vector<1x8x1xf32>
      %29 = vector.shape_cast %28 : vector<1x8x1xf32> to vector<8x1xf32>
      %cst_25 = arith.constant dense<0xFF800000> : vector<8xf32>
      %30 = vector.multi_reduction <maximumf>, %25, %cst_25 [1] : vector<8x8xf32> to vector<8xf32>
      %31 = vector.shape_cast %30 : vector<8xf32> to vector<8x1xf32>
      %32 = arith.maximumf %27, %31 : vector<8x1xf32>
      %33 = arith.subf %27, %32 : vector<8x1xf32>
      %34 = math.exp %33 : vector<8x1xf32>
      %35 = vector.broadcast %32 : vector<8x1xf32> to vector<8x8xf32>
      %36 = arith.subf %25, %35 : vector<8x8xf32>
      %37 = math.exp %36 : vector<8x8xf32>
      %38 = arith.mulf %34, %29 : vector<8x1xf32>
      %cst_26 = arith.constant dense<0.000000e+00> : vector<8xf32>
      %39 = vector.multi_reduction <add>, %37, %cst_26 [1] : vector<8x8xf32> to vector<8xf32>
      %40 = vector.shape_cast %39 : vector<8xf32> to vector<8x1xf32>
      %41 = arith.addf %38, %40 : vector<8x1xf32>
      %c0_27 = arith.constant 0 : index
      %c0_28 = arith.constant 0 : index
      %c0_29 = arith.constant 0 : index
      %42 = vector.load %arg8[%c0_27, %c0_28, %c0_29] : memref<4x8x1xf32, #tpu.memory_space<vmem>>, vector<1x8x1xf32>
      %43 = vector.shape_cast %42 : vector<1x8x1xf32> to vector<8x1xf32>
      %44 = vector.shape_cast %41 : vector<8x1xf32> to vector<1x8x1xf32>
      tpu.vector_store %arg8[%c0_27, %c0_28, %c0_29], %44 {strides = array<i32>} : memref<4x8x1xf32, #tpu.memory_space<vmem>>, vector<1x8x1xf32>,
      %c0_30 = arith.constant 0 : index
      %c0_31 = arith.constant 0 : index
      %c0_32 = arith.constant 0 : index
      %45 = vector.load %arg9[%c0_30, %c0_31, %c0_32] : memref<4x8x8xf32, #tpu.memory_space<vmem>>, vector<1x8x8xf32>
      %46 = vector.shape_cast %45 : vector<1x8x8xf32> to vector<8x8xf32>
      %47 = vector.broadcast %34 : vector<8x1xf32> to vector<8x8xf32>
      %48 = arith.mulf %47, %46 : vector<8x8xf32>
      %49 = arith.truncf %37 : vector<8x8xf32> to vector<8x8xbf16>
      %cst_33 = arith.constant dense<0.000000e+00> : vector<8x8xf32>
      %50 = tpu.matmul %49, %22, %cst_33 {dimension_numbers = #tpu.dot_dimension_numbers<[1], [0], [0], [1], [0, 0, 1, 1], [], []>} : vector<8x8xbf16>, vector<8x8xbf16>, vector<8x8xf32> -> vector<8x8xf32>
      %51 = arith.addf %48, %50 : vector<8x8xf32>
      %c0_34 = arith.constant 0 : index
      %c0_35 = arith.constant 0 : index
      %c0_36 = arith.constant 0 : index
      %52 = vector.load %arg9[%c0_34, %c0_35, %c0_36] : memref<4x8x8xf32, #tpu.memory_space<vmem>>, vector<1x8x8xf32>
      %53 = vector.shape_cast %52 : vector<1x8x8xf32> to vector<8x8xf32>
      %54 = vector.shape_cast %51 : vector<8x8xf32> to vector<1x8x8xf32>
      tpu.vector_store %arg9[%c0_34, %c0_35, %c0_36], %54 {strides = array<i32>} : memref<4x8x8xf32, #tpu.memory_space<vmem>>, vector<1x8x8xf32>,
      %c0_37 = arith.constant 0 : index
      %c0_38 = arith.constant 0 : index
      %c0_39 = arith.constant 0 : index
      %55 = vector.load %arg7[%c0_37, %c0_38, %c0_39] : memref<4x8x1xf32, #tpu.memory_space<vmem>>, vector<1x8x1xf32>
      %56 = vector.shape_cast %55 : vector<1x8x1xf32> to vector<8x1xf32>
      %57 = vector.shape_cast %32 : vector<8x1xf32> to vector<1x8x1xf32>
      tpu.vector_store %arg7[%c0_37, %c0_38, %c0_39], %57 {strides = array<i32>} : memref<4x8x1xf32, #tpu.memory_space<vmem>>, vector<1x8x1xf32>,
      %c0_40 = arith.constant 0 : index
      %c0_41 = arith.constant 0 : index
      %c1 = arith.constant 1 : index
      %c0_42 = arith.constant 0 : index
      %58 = vector.load %arg3[%c0_40, %c0_41, %c1, %c0_42] : memref<1x8x4x8xbf16, #tpu.memory_space<vmem>>, vector<1x8x1x8xbf16>
      %59 = vector.shape_cast %58 : vector<1x8x1x8xbf16> to vector<8x8xbf16>
      %cst_43 = arith.constant dense<0.000000e+00> : vector<8x8xf32>
      %60 = tpu.matmul %59, %20, %cst_43 {dimension_numbers = #tpu.dot_dimension_numbers<[1], [1], [0], [0], [0, 0, 1, 0], [], []>} : vector<8x8xbf16>, vector<8x8xbf16>, vector<8x8xf32> -> vector<8x8xf32>
      %c1_44 = arith.constant 1 : index
      %c0_45 = arith.constant 0 : index
      %c0_46 = arith.constant 0 : index
      %61 = vector.load %arg7[%c1_44, %c0_45, %c0_46] : memref<4x8x1xf32, #tpu.memory_space<vmem>>, vector<1x8x1xf32>
      %62 = vector.shape_cast %61 : vector<1x8x1xf32> to vector<8x1xf32>
      %c1_47 = arith.constant 1 : index
      %c0_48 = arith.constant 0 : index
      %c0_49 = arith.constant 0 : index
      %63 = vector.load %arg8[%c1_47, %c0_48, %c0_49] : memref<4x8x1xf32, #tpu.memory_space<vmem>>, vector<1x8x1xf32>
      %64 = vector.shape_cast %63 : vector<1x8x1xf32> to vector<8x1xf32>
      %cst_50 = arith.constant dense<0xFF800000> : vector<8xf32>
      %65 = vector.multi_reduction <maximumf>, %60, %cst_50 [1] : vector<8x8xf32> to vector<8xf32>
      %66 = vector.shape_cast %65 : vector<8xf32> to vector<8x1xf32>
      %67 = arith.maximumf %62, %66 : vector<8x1xf32>
      %68 = arith.subf %62, %67 : vector<8x1xf32>
      %69 = math.exp %68 : vector<8x1xf32>
      %70 = vector.broadcast %67 : vector<8x1xf32> to vector<8x8xf32>
      %71 = arith.subf %60, %70 : vector<8x8xf32>
      %72 = math.exp %71 : vector<8x8xf32>
      %73 = arith.mulf %69, %64 : vector<8x1xf32>
      %cst_51 = arith.constant dense<0.000000e+00> : vector<8xf32>
      %74 = vector.multi_reduction <add>, %72, %cst_51 [1] : vector<8x8xf32> to vector<8xf32>
      %75 = vector.shape_cast %74 : vector<8xf32> to vector<8x1xf32>
      %76 = arith.addf %73, %75 : vector<8x1xf32>
      %c1_52 = arith.constant 1 : index
      %c0_53 = arith.constant 0 : index
      %c0_54 = arith.constant 0 : index
      %77 = vector.load %arg8[%c1_52, %c0_53, %c0_54] : memref<4x8x1xf32, #tpu.memory_space<vmem>>, vector<1x8x1xf32>
      %78 = vector.shape_cast %77 : vector<1x8x1xf32> to vector<8x1xf32>
      %79 = vector.shape_cast %76 : vector<8x1xf32> to vector<1x8x1xf32>
      tpu.vector_store %arg8[%c1_52, %c0_53, %c0_54], %79 {strides = array<i32>} : memref<4x8x1xf32, #tpu.memory_space<vmem>>, vector<1x8x1xf32>,
      %c1_55 = arith.constant 1 : index
      %c0_56 = arith.constant 0 : index
      %c0_57 = arith.constant 0 : index
      %80 = vector.load %arg9[%c1_55, %c0_56, %c0_57] : memref<4x8x8xf32, #tpu.memory_space<vmem>>, vector<1x8x8xf32>
      %81 = vector.shape_cast %80 : vector<1x8x8xf32> to vector<8x8xf32>
      %82 = vector.broadcast %69 : vector<8x1xf32> to vector<8x8xf32>
      %83 = arith.mulf %82, %81 : vector<8x8xf32>
      %84 = arith.truncf %72 : vector<8x8xf32> to vector<8x8xbf16>
      %cst_58 = arith.constant dense<0.000000e+00> : vector<8x8xf32>
      %85 = tpu.matmul %84, %22, %cst_58 {dimension_numbers = #tpu.dot_dimension_numbers<[1], [0], [0], [1], [0, 0, 1, 1], [], []>} : vector<8x8xbf16>, vector<8x8xbf16>, vector<8x8xf32> -> vector<8x8xf32>
      %86 = arith.addf %83, %85 : vector<8x8xf32>
      %c1_59 = arith.constant 1 : index
      %c0_60 = arith.constant 0 : index
      %c0_61 = arith.constant 0 : index
      %87 = vector.load %arg9[%c1_59, %c0_60, %c0_61] : memref<4x8x8xf32, #tpu.memory_space<vmem>>, vector<1x8x8xf32>
      %88 = vector.shape_cast %87 : vector<1x8x8xf32> to vector<8x8xf32>
      %89 = vector.shape_cast %86 : vector<8x8xf32> to vector<1x8x8xf32>
      tpu.vector_store %arg9[%c1_59, %c0_60, %c0_61], %89 {strides = array<i32>} : memref<4x8x8xf32, #tpu.memory_space<vmem>>, vector<1x8x8xf32>,
      %c1_62 = arith.constant 1 : index
      %c0_63 = arith.constant 0 : index
      %c0_64 = arith.constant 0 : index
      %90 = vector.load %arg7[%c1_62, %c0_63, %c0_64] : memref<4x8x1xf32, #tpu.memory_space<vmem>>, vector<1x8x1xf32>
      %91 = vector.shape_cast %90 : vector<1x8x1xf32> to vector<8x1xf32>
      %92 = vector.shape_cast %67 : vector<8x1xf32> to vector<1x8x1xf32>
      tpu.vector_store %arg7[%c1_62, %c0_63, %c0_64], %92 {strides = array<i32>} : memref<4x8x1xf32, #tpu.memory_space<vmem>>, vector<1x8x1xf32>,
      %c0_65 = arith.constant 0 : index
      %c0_66 = arith.constant 0 : index
      %c1_67 = arith.constant 1 : index
      %c0_68 = arith.constant 0 : index
      %93 = vector.load %arg4[%c0_65, %c0_66, %c1_67, %c0_68] : memref<1x8x2x8xbf16, #tpu.memory_space<vmem>>, vector<1x8x1x8xbf16>
      %94 = vector.shape_cast %93 : vector<1x8x1x8xbf16> to vector<8x8xbf16>
      %c0_69 = arith.constant 0 : index
      %c0_70 = arith.constant 0 : index
      %c1_71 = arith.constant 1 : index
      %c0_72 = arith.constant 0 : index
      %95 = vector.load %arg5[%c0_69, %c0_70, %c1_71, %c0_72] : memref<1x8x2x8xbf16, #tpu.memory_space<vmem>>, vector<1x8x1x8xbf16>
      %96 = vector.shape_cast %95 : vector<1x8x1x8xbf16> to vector<8x8xbf16>
      %c0_73 = arith.constant 0 : index
      %c0_74 = arith.constant 0 : index
      %c2 = arith.constant 2 : index
      %c0_75 = arith.constant 0 : index
      %97 = vector.load %arg3[%c0_73, %c0_74, %c2, %c0_75] : memref<1x8x4x8xbf16, #tpu.memory_space<vmem>>, vector<1x8x1x8xbf16>
      %98 = vector.shape_cast %97 : vector<1x8x1x8xbf16> to vector<8x8xbf16>
      %cst_76 = arith.constant dense<0.000000e+00> : vector<8x8xf32>
      %99 = tpu.matmul %98, %94, %cst_76 {dimension_numbers = #tpu.dot_dimension_numbers<[1], [1], [0], [0], [0, 0, 1, 0], [], []>} : vector<8x8xbf16>, vector<8x8xbf16>, vector<8x8xf32> -> vector<8x8xf32>
      %c2_77 = arith.constant 2 : index
      %c0_78 = arith.constant 0 : index
      %c0_79 = arith.constant 0 : index
      %100 = vector.load %arg7[%c2_77, %c0_78, %c0_79] : memref<4x8x1xf32, #tpu.memory_space<vmem>>, vector<1x8x1xf32>
      %101 = vector.shape_cast %100 : vector<1x8x1xf32> to vector<8x1xf32>
      %c2_80 = arith.constant 2 : index
      %c0_81 = arith.constant 0 : index
      %c0_82 = arith.constant 0 : index
      %102 = vector.load %arg8[%c2_80, %c0_81, %c0_82] : memref<4x8x1xf32, #tpu.memory_space<vmem>>, vector<1x8x1xf32>
      %103 = vector.shape_cast %102 : vector<1x8x1xf32> to vector<8x1xf32>
      %cst_83 = arith.constant dense<0xFF800000> : vector<8xf32>
      %104 = vector.multi_reduction <maximumf>, %99, %cst_83 [1] : vector<8x8xf32> to vector<8xf32>
      %105 = vector.shape_cast %104 : vector<8xf32> to vector<8x1xf32>
      %106 = arith.maximumf %101, %105 : vector<8x1xf32>
      %107 = arith.subf %101, %106 : vector<8x1xf32>
      %108 = math.exp %107 : vector<8x1xf32>
      %109 = vector.broadcast %106 : vector<8x1xf32> to vector<8x8xf32>
      %110 = arith.subf %99, %109 : vector<8x8xf32>
      %111 = math.exp %110 : vector<8x8xf32>
      %112 = arith.mulf %108, %103 : vector<8x1xf32>
      %cst_84 = arith.constant dense<0.000000e+00> : vector<8xf32>
      %113 = vector.multi_reduction <add>, %111, %cst_84 [1] : vector<8x8xf32> to vector<8xf32>
      %114 = vector.shape_cast %113 : vector<8xf32> to vector<8x1xf32>
      %115 = arith.addf %112, %114 : vector<8x1xf32>
      %c2_85 = arith.constant 2 : index
      %c0_86 = arith.constant 0 : index
      %c0_87 = arith.constant 0 : index
      %116 = vector.load %arg8[%c2_85, %c0_86, %c0_87] : memref<4x8x1xf32, #tpu.memory_space<vmem>>, vector<1x8x1xf32>
      %117 = vector.shape_cast %116 : vector<1x8x1xf32> to vector<8x1xf32>
      %118 = vector.shape_cast %115 : vector<8x1xf32> to vector<1x8x1xf32>
      tpu.vector_store %arg8[%c2_85, %c0_86, %c0_87], %118 {strides = array<i32>} : memref<4x8x1xf32, #tpu.memory_space<vmem>>, vector<1x8x1xf32>,
      %c2_88 = arith.constant 2 : index
      %c0_89 = arith.constant 0 : index
      %c0_90 = arith.constant 0 : index
      %119 = vector.load %arg9[%c2_88, %c0_89, %c0_90] : memref<4x8x8xf32, #tpu.memory_space<vmem>>, vector<1x8x8xf32>
      %120 = vector.shape_cast %119 : vector<1x8x8xf32> to vector<8x8xf32>
      %121 = vector.broadcast %108 : vector<8x1xf32> to vector<8x8xf32>
      %122 = arith.mulf %121, %120 : vector<8x8xf32>
      %123 = arith.truncf %111 : vector<8x8xf32> to vector<8x8xbf16>
      %cst_91 = arith.constant dense<0.000000e+00> : vector<8x8xf32>
      %124 = tpu.matmul %123, %96, %cst_91 {dimension_numbers = #tpu.dot_dimension_numbers<[1], [0], [0], [1], [0, 0, 1, 1], [], []>} : vector<8x8xbf16>, vector<8x8xbf16>, vector<8x8xf32> -> vector<8x8xf32>
      %125 = arith.addf %122, %124 : vector<8x8xf32>
      %c2_92 = arith.constant 2 : index
      %c0_93 = arith.constant 0 : index
      %c0_94 = arith.constant 0 : index
      %126 = vector.load %arg9[%c2_92, %c0_93, %c0_94] : memref<4x8x8xf32, #tpu.memory_space<vmem>>, vector<1x8x8xf32>
      %127 = vector.shape_cast %126 : vector<1x8x8xf32> to vector<8x8xf32>
      %128 = vector.shape_cast %125 : vector<8x8xf32> to vector<1x8x8xf32>
      tpu.vector_store %arg9[%c2_92, %c0_93, %c0_94], %128 {strides = array<i32>} : memref<4x8x8xf32, #tpu.memory_space<vmem>>, vector<1x8x8xf32>,
      %c2_95 = arith.constant 2 : index
      %c0_96 = arith.constant 0 : index
      %c0_97 = arith.constant 0 : index
      %129 = vector.load %arg7[%c2_95, %c0_96, %c0_97] : memref<4x8x1xf32, #tpu.memory_space<vmem>>, vector<1x8x1xf32>
      %130 = vector.shape_cast %129 : vector<1x8x1xf32> to vector<8x1xf32>
      %131 = vector.shape_cast %106 : vector<8x1xf32> to vector<1x8x1xf32>
      tpu.vector_store %arg7[%c2_95, %c0_96, %c0_97], %131 {strides = array<i32>} : memref<4x8x1xf32, #tpu.memory_space<vmem>>, vector<1x8x1xf32>,
      %c0_98 = arith.constant 0 : index
      %c0_99 = arith.constant 0 : index
      %c3 = arith.constant 3 : index
      %c0_100 = arith.constant 0 : index
      %132 = vector.load %arg3[%c0_98, %c0_99, %c3, %c0_100] : memref<1x8x4x8xbf16, #tpu.memory_space<vmem>>, vector<1x8x1x8xbf16>
      %133 = vector.shape_cast %132 : vector<1x8x1x8xbf16> to vector<8x8xbf16>
      %cst_101 = arith.constant dense<0.000000e+00> : vector<8x8xf32>
      %134 = tpu.matmul %133, %94, %cst_101 {dimension_numbers = #tpu.dot_dimension_numbers<[1], [1], [0], [0], [0, 0, 1, 0], [], []>} : vector<8x8xbf16>, vector<8x8xbf16>, vector<8x8xf32> -> vector<8x8xf32>
      %c3_102 = arith.constant 3 : index
      %c0_103 = arith.constant 0 : index
      %c0_104 = arith.constant 0 : index
      %135 = vector.load %arg7[%c3_102, %c0_103, %c0_104] : memref<4x8x1xf32, #tpu.memory_space<vmem>>, vector<1x8x1xf32>
      %136 = vector.shape_cast %135 : vector<1x8x1xf32> to vector<8x1xf32>
      %c3_105 = arith.constant 3 : index
      %c0_106 = arith.constant 0 : index
      %c0_107 = arith.constant 0 : index
      %137 = vector.load %arg8[%c3_105, %c0_106, %c0_107] : memref<4x8x1xf32, #tpu.memory_space<vmem>>, vector<1x8x1xf32>
      %138 = vector.shape_cast %137 : vector<1x8x1xf32> to vector<8x1xf32>
      %cst_108 = arith.constant dense<0xFF800000> : vector<8xf32>
      %139 = vector.multi_reduction <maximumf>, %134, %cst_108 [1] : vector<8x8xf32> to vector<8xf32>
      %140 = vector.shape_cast %139 : vector<8xf32> to vector<8x1xf32>
      %141 = arith.maximumf %136, %140 : vector<8x1xf32>
      %142 = arith.subf %136, %141 : vector<8x1xf32>
      %143 = math.exp %142 : vector<8x1xf32>
      %144 = vector.broadcast %141 : vector<8x1xf32> to vector<8x8xf32>
      %145 = arith.subf %134, %144 : vector<8x8xf32>
      %146 = math.exp %145 : vector<8x8xf32>
      %147 = arith.mulf %143, %138 : vector<8x1xf32>
      %cst_109 = arith.constant dense<0.000000e+00> : vector<8xf32>
      %148 = vector.multi_reduction <add>, %146, %cst_109 [1] : vector<8x8xf32> to vector<8xf32>
      %149 = vector.shape_cast %148 : vector<8xf32> to vector<8x1xf32>
      %150 = arith.addf %147, %149 : vector<8x1xf32>
      %c3_110 = arith.constant 3 : index
      %c0_111 = arith.constant 0 : index
      %c0_112 = arith.constant 0 : index
      %151 = vector.load %arg8[%c3_110, %c0_111, %c0_112] : memref<4x8x1xf32, #tpu.memory_space<vmem>>, vector<1x8x1xf32>
      %152 = vector.shape_cast %151 : vector<1x8x1xf32> to vector<8x1xf32>
      %153 = vector.shape_cast %150 : vector<8x1xf32> to vector<1x8x1xf32>
      tpu.vector_store %arg8[%c3_110, %c0_111, %c0_112], %153 {strides = array<i32>} : memref<4x8x1xf32, #tpu.memory_space<vmem>>, vector<1x8x1xf32>,
      %c3_113 = arith.constant 3 : index
      %c0_114 = arith.constant 0 : index
      %c0_115 = arith.constant 0 : index
      %154 = vector.load %arg9[%c3_113, %c0_114, %c0_115] : memref<4x8x8xf32, #tpu.memory_space<vmem>>, vector<1x8x8xf32>
      %155 = vector.shape_cast %154 : vector<1x8x8xf32> to vector<8x8xf32>
      %156 = vector.broadcast %143 : vector<8x1xf32> to vector<8x8xf32>
      %157 = arith.mulf %156, %155 : vector<8x8xf32>
      %158 = arith.truncf %146 : vector<8x8xf32> to vector<8x8xbf16>
      %cst_116 = arith.constant dense<0.000000e+00> : vector<8x8xf32>
      %159 = tpu.matmul %158, %96, %cst_116 {dimension_numbers = #tpu.dot_dimension_numbers<[1], [0], [0], [1], [0, 0, 1, 1], [], []>} : vector<8x8xbf16>, vector<8x8xbf16>, vector<8x8xf32> -> vector<8x8xf32>
      %160 = arith.addf %157, %159 : vector<8x8xf32>
      %c3_117 = arith.constant 3 : index
      %c0_118 = arith.constant 0 : index
      %c0_119 = arith.constant 0 : index
      %161 = vector.load %arg9[%c3_117, %c0_118, %c0_119] : memref<4x8x8xf32, #tpu.memory_space<vmem>>, vector<1x8x8xf32>
      %162 = vector.shape_cast %161 : vector<1x8x8xf32> to vector<8x8xf32>
      %163 = vector.shape_cast %160 : vector<8x8xf32> to vector<1x8x8xf32>
      tpu.vector_store %arg9[%c3_117, %c0_118, %c0_119], %163 {strides = array<i32>} : memref<4x8x8xf32, #tpu.memory_space<vmem>>, vector<1x8x8xf32>,
      %c3_120 = arith.constant 3 : index
      %c0_121 = arith.constant 0 : index
      %c0_122 = arith.constant 0 : index
      %164 = vector.load %arg7[%c3_120, %c0_121, %c0_122] : memref<4x8x1xf32, #tpu.memory_space<vmem>>, vector<1x8x1xf32>
      %165 = vector.shape_cast %164 : vector<1x8x1xf32> to vector<8x1xf32>
      %166 = vector.shape_cast %141 : vector<8x1xf32> to vector<1x8x1xf32>
      tpu.vector_store %arg7[%c3_120, %c0_121, %c0_122], %166 {strides = array<i32>} : memref<4x8x1xf32, #tpu.memory_space<vmem>>, vector<1x8x1xf32>,
    } else {
    }
    %c7_i32_3 = arith.constant 7 : i32
    %9 = arith.addi %3, %c7_i32_3 : i32
    %10 = arith.cmpi sle, %4, %9 : i32
    %c7_i32_4 = arith.constant 7 : i32
    %11 = arith.addi %4, %c7_i32_4 : i32
    %12 = arith.cmpi sgt, %11, %3 : i32
    %13 = arith.andi %10, %12 : i1
    %14 = arith.extui %13 : i1 to i32
    %c0_i32_5 = arith.constant 0 : i32
    %15 = arith.cmpi ne, %14, %c0_i32_5 : i32
    scf.if %15 {
      %19 = tpu.iota {dimensions = array<i32: 0>} : vector<8x8xi32>
      %20 = vector.broadcast %3 : i32 to vector<8x8xi32>
      %21 = arith.addi %20, %19 : vector<8x8xi32>
      %22 = tpu.iota {dimensions = array<i32: 1>} : vector<8x8xi32>
      %23 = vector.broadcast %4 : i32 to vector<8x8xi32>
      %24 = arith.addi %23, %22 : vector<8x8xi32>
      %25 = arith.cmpi sle, %24, %21 : vector<8x8xi32>
      %c0 = arith.constant 0 : index
      %c0_8 = arith.constant 0 : index
      %c0_9 = arith.constant 0 : index
      %c0_10 = arith.constant 0 : index
      %26 = vector.load %arg4[%c0, %c0_8, %c0_9, %c0_10] : memref<1x8x2x8xbf16, #tpu.memory_space<vmem>>, vector<1x8x1x8xbf16>
      %27 = vector.shape_cast %26 : vector<1x8x1x8xbf16> to vector<8x8xbf16>
      %c0_11 = arith.constant 0 : index
      %c0_12 = arith.constant 0 : index
      %c0_13 = arith.constant 0 : index
      %c0_14 = arith.constant 0 : index
      %28 = vector.load %arg5[%c0_11, %c0_12, %c0_13, %c0_14] : memref<1x8x2x8xbf16, #tpu.memory_space<vmem>>, vector<1x8x1x8xbf16>
      %29 = vector.shape_cast %28 : vector<1x8x1x8xbf16> to vector<8x8xbf16>
      %c0_15 = arith.constant 0 : index
      %c0_16 = arith.constant 0 : index
      %c0_17 = arith.constant 0 : index
      %c0_18 = arith.constant 0 : index
      %30 = vector.load %arg3[%c0_15, %c0_16, %c0_17, %c0_18] : memref<1x8x4x8xbf16, #tpu.memory_space<vmem>>, vector<1x8x1x8xbf16>
      %31 = vector.shape_cast %30 : vector<1x8x1x8xbf16> to vector<8x8xbf16>
      %cst = arith.constant dense<0.000000e+00> : vector<8x8xf32>
      %32 = tpu.matmul %31, %27, %cst {dimension_numbers = #tpu.dot_dimension_numbers<[1], [1], [0], [0], [0, 0, 1, 0], [], []>} : vector<8x8xbf16>, vector<8x8xbf16>, vector<8x8xf32> -> vector<8x8xf32>
      %cst_19 = arith.constant -1.000000e+30 : f32
      %33 = vector.broadcast %cst_19 : f32 to vector<8x8xf32>
      %34 = arith.select %25, %32, %33 : vector<8x8xi1>, vector<8x8xf32>
      %c0_20 = arith.constant 0 : index
      %c0_21 = arith.constant 0 : index
      %c0_22 = arith.constant 0 : index
      %35 = vector.load %arg7[%c0_20, %c0_21, %c0_22] : memref<4x8x1xf32, #tpu.memory_space<vmem>>, vector<1x8x1xf32>
      %36 = vector.shape_cast %35 : vector<1x8x1xf32> to vector<8x1xf32>
      %c0_23 = arith.constant 0 : index
      %c0_24 = arith.constant 0 : index
      %c0_25 = arith.constant 0 : index
      %37 = vector.load %arg8[%c0_23, %c0_24, %c0_25] : memref<4x8x1xf32, #tpu.memory_space<vmem>>, vector<1x8x1xf32>
      %38 = vector.shape_cast %37 : vector<1x8x1xf32> to vector<8x1xf32>
      %cst_26 = arith.constant dense<0xFF800000> : vector<8xf32>
      %39 = vector.multi_reduction <maximumf>, %34, %cst_26 [1] : vector<8x8xf32> to vector<8xf32>
      %40 = vector.shape_cast %39 : vector<8xf32> to vector<8x1xf32>
      %41 = arith.maximumf %36, %40 : vector<8x1xf32>
      %42 = arith.subf %36, %41 : vector<8x1xf32>
      %43 = math.exp %42 : vector<8x1xf32>
      %44 = vector.broadcast %41 : vector<8x1xf32> to vector<8x8xf32>
      %45 = arith.subf %34, %44 : vector<8x8xf32>
      %46 = math.exp %45 : vector<8x8xf32>
      %47 = arith.mulf %43, %38 : vector<8x1xf32>
      %cst_27 = arith.constant dense<0.000000e+00> : vector<8xf32>
      %48 = vector.multi_reduction <add>, %46, %cst_27 [1] : vector<8x8xf32> to vector<8xf32>
      %49 = vector.shape_cast %48 : vector<8xf32> to vector<8x1xf32>
      %50 = arith.addf %47, %49 : vector<8x1xf32>
      %c0_28 = arith.constant 0 : index
      %c0_29 = arith.constant 0 : index
      %c0_30 = arith.constant 0 : index
      %51 = vector.load %arg8[%c0_28, %c0_29, %c0_30] : memref<4x8x1xf32, #tpu.memory_space<vmem>>, vector<1x8x1xf32>
      %52 = vector.shape_cast %51 : vector<1x8x1xf32> to vector<8x1xf32>
      %53 = vector.shape_cast %50 : vector<8x1xf32> to vector<1x8x1xf32>
      tpu.vector_store %arg8[%c0_28, %c0_29, %c0_30], %53 {strides = array<i32>} : memref<4x8x1xf32, #tpu.memory_space<vmem>>, vector<1x8x1xf32>,
      %c0_31 = arith.constant 0 : index
      %c0_32 = arith.constant 0 : index
      %c0_33 = arith.constant 0 : index
      %54 = vector.load %arg9[%c0_31, %c0_32, %c0_33] : memref<4x8x8xf32, #tpu.memory_space<vmem>>, vector<1x8x8xf32>
      %55 = vector.shape_cast %54 : vector<1x8x8xf32> to vector<8x8xf32>
      %56 = vector.broadcast %43 : vector<8x1xf32> to vector<8x8xf32>
      %57 = arith.mulf %56, %55 : vector<8x8xf32>
      %58 = arith.truncf %46 : vector<8x8xf32> to vector<8x8xbf16>
      %cst_34 = arith.constant dense<0.000000e+00> : vector<8x8xf32>
      %59 = tpu.matmul %58, %29, %cst_34 {dimension_numbers = #tpu.dot_dimension_numbers<[1], [0], [0], [1], [0, 0, 1, 1], [], []>} : vector<8x8xbf16>, vector<8x8xbf16>, vector<8x8xf32> -> vector<8x8xf32>
      %60 = arith.addf %57, %59 : vector<8x8xf32>
      %c0_35 = arith.constant 0 : index
      %c0_36 = arith.constant 0 : index
      %c0_37 = arith.constant 0 : index
      %61 = vector.load %arg9[%c0_35, %c0_36, %c0_37] : memref<4x8x8xf32, #tpu.memory_space<vmem>>, vector<1x8x8xf32>
      %62 = vector.shape_cast %61 : vector<1x8x8xf32> to vector<8x8xf32>
      %63 = vector.shape_cast %60 : vector<8x8xf32> to vector<1x8x8xf32>
      tpu.vector_store %arg9[%c0_35, %c0_36, %c0_37], %63 {strides = array<i32>} : memref<4x8x8xf32, #tpu.memory_space<vmem>>, vector<1x8x8xf32>,
      %c0_38 = arith.constant 0 : index
      %c0_39 = arith.constant 0 : index
      %c0_40 = arith.constant 0 : index
      %64 = vector.load %arg7[%c0_38, %c0_39, %c0_40] : memref<4x8x1xf32, #tpu.memory_space<vmem>>, vector<1x8x1xf32>
      %65 = vector.shape_cast %64 : vector<1x8x1xf32> to vector<8x1xf32>
      %66 = vector.shape_cast %41 : vector<8x1xf32> to vector<1x8x1xf32>
      tpu.vector_store %arg7[%c0_38, %c0_39, %c0_40], %66 {strides = array<i32>} : memref<4x8x1xf32, #tpu.memory_space<vmem>>, vector<1x8x1xf32>,
      %c0_41 = arith.constant 0 : index
      %c0_42 = arith.constant 0 : index
      %c1 = arith.constant 1 : index
      %c0_43 = arith.constant 0 : index
      %67 = vector.load %arg3[%c0_41, %c0_42, %c1, %c0_43] : memref<1x8x4x8xbf16, #tpu.memory_space<vmem>>, vector<1x8x1x8xbf16>
      %68 = vector.shape_cast %67 : vector<1x8x1x8xbf16> to vector<8x8xbf16>
      %cst_44 = arith.constant dense<0.000000e+00> : vector<8x8xf32>
      %69 = tpu.matmul %68, %27, %cst_44 {dimension_numbers = #tpu.dot_dimension_numbers<[1], [1], [0], [0], [0, 0, 1, 0], [], []>} : vector<8x8xbf16>, vector<8x8xbf16>, vector<8x8xf32> -> vector<8x8xf32>
      %cst_45 = arith.constant -1.000000e+30 : f32
      %70 = vector.broadcast %cst_45 : f32 to vector<8x8xf32>
      %71 = arith.select %25, %69, %70 : vector<8x8xi1>, vector<8x8xf32>
      %c1_46 = arith.constant 1 : index
      %c0_47 = arith.constant 0 : index
      %c0_48 = arith.constant 0 : index
      %72 = vector.load %arg7[%c1_46, %c0_47, %c0_48] : memref<4x8x1xf32, #tpu.memory_space<vmem>>, vector<1x8x1xf32>
      %73 = vector.shape_cast %72 : vector<1x8x1xf32> to vector<8x1xf32>
      %c1_49 = arith.constant 1 : index
      %c0_50 = arith.constant 0 : index
      %c0_51 = arith.constant 0 : index
      %74 = vector.load %arg8[%c1_49, %c0_50, %c0_51] : memref<4x8x1xf32, #tpu.memory_space<vmem>>, vector<1x8x1xf32>
      %75 = vector.shape_cast %74 : vector<1x8x1xf32> to vector<8x1xf32>
      %cst_52 = arith.constant dense<0xFF800000> : vector<8xf32>
      %76 = vector.multi_reduction <maximumf>, %71, %cst_52 [1] : vector<8x8xf32> to vector<8xf32>
      %77 = vector.shape_cast %76 : vector<8xf32> to vector<8x1xf32>
      %78 = arith.maximumf %73, %77 : vector<8x1xf32>
      %79 = arith.subf %73, %78 : vector<8x1xf32>
      %80 = math.exp %79 : vector<8x1xf32>
      %81 = vector.broadcast %78 : vector<8x1xf32> to vector<8x8xf32>
      %82 = arith.subf %71, %81 : vector<8x8xf32>
      %83 = math.exp %82 : vector<8x8xf32>
      %84 = arith.mulf %80, %75 : vector<8x1xf32>
      %cst_53 = arith.constant dense<0.000000e+00> : vector<8xf32>
      %85 = vector.multi_reduction <add>, %83, %cst_53 [1] : vector<8x8xf32> to vector<8xf32>
      %86 = vector.shape_cast %85 : vector<8xf32> to vector<8x1xf32>
      %87 = arith.addf %84, %86 : vector<8x1xf32>
      %c1_54 = arith.constant 1 : index
      %c0_55 = arith.constant 0 : index
      %c0_56 = arith.constant 0 : index
      %88 = vector.load %arg8[%c1_54, %c0_55, %c0_56] : memref<4x8x1xf32, #tpu.memory_space<vmem>>, vector<1x8x1xf32>
      %89 = vector.shape_cast %88 : vector<1x8x1xf32> to vector<8x1xf32>
      %90 = vector.shape_cast %87 : vector<8x1xf32> to vector<1x8x1xf32>
      tpu.vector_store %arg8[%c1_54, %c0_55, %c0_56], %90 {strides = array<i32>} : memref<4x8x1xf32, #tpu.memory_space<vmem>>, vector<1x8x1xf32>,
      %c1_57 = arith.constant 1 : index
      %c0_58 = arith.constant 0 : index
      %c0_59 = arith.constant 0 : index
      %91 = vector.load %arg9[%c1_57, %c0_58, %c0_59] : memref<4x8x8xf32, #tpu.memory_space<vmem>>, vector<1x8x8xf32>
      %92 = vector.shape_cast %91 : vector<1x8x8xf32> to vector<8x8xf32>
      %93 = vector.broadcast %80 : vector<8x1xf32> to vector<8x8xf32>
      %94 = arith.mulf %93, %92 : vector<8x8xf32>
      %95 = arith.truncf %83 : vector<8x8xf32> to vector<8x8xbf16>
      %cst_60 = arith.constant dense<0.000000e+00> : vector<8x8xf32>
      %96 = tpu.matmul %95, %29, %cst_60 {dimension_numbers = #tpu.dot_dimension_numbers<[1], [0], [0], [1], [0, 0, 1, 1], [], []>} : vector<8x8xbf16>, vector<8x8xbf16>, vector<8x8xf32> -> vector<8x8xf32>
      %97 = arith.addf %94, %96 : vector<8x8xf32>
      %c1_61 = arith.constant 1 : index
      %c0_62 = arith.constant 0 : index
      %c0_63 = arith.constant 0 : index
      %98 = vector.load %arg9[%c1_61, %c0_62, %c0_63] : memref<4x8x8xf32, #tpu.memory_space<vmem>>, vector<1x8x8xf32>
      %99 = vector.shape_cast %98 : vector<1x8x8xf32> to vector<8x8xf32>
      %100 = vector.shape_cast %97 : vector<8x8xf32> to vector<1x8x8xf32>
      tpu.vector_store %arg9[%c1_61, %c0_62, %c0_63], %100 {strides = array<i32>} : memref<4x8x8xf32, #tpu.memory_space<vmem>>, vector<1x8x8xf32>,
      %c1_64 = arith.constant 1 : index
      %c0_65 = arith.constant 0 : index
      %c0_66 = arith.constant 0 : index
      %101 = vector.load %arg7[%c1_64, %c0_65, %c0_66] : memref<4x8x1xf32, #tpu.memory_space<vmem>>, vector<1x8x1xf32>
      %102 = vector.shape_cast %101 : vector<1x8x1xf32> to vector<8x1xf32>
      %103 = vector.shape_cast %78 : vector<8x1xf32> to vector<1x8x1xf32>
      tpu.vector_store %arg7[%c1_64, %c0_65, %c0_66], %103 {strides = array<i32>} : memref<4x8x1xf32, #tpu.memory_space<vmem>>, vector<1x8x1xf32>,
      %c0_67 = arith.constant 0 : index
      %c0_68 = arith.constant 0 : index
      %c1_69 = arith.constant 1 : index
      %c0_70 = arith.constant 0 : index
      %104 = vector.load %arg4[%c0_67, %c0_68, %c1_69, %c0_70] : memref<1x8x2x8xbf16, #tpu.memory_space<vmem>>, vector<1x8x1x8xbf16>
      %105 = vector.shape_cast %104 : vector<1x8x1x8xbf16> to vector<8x8xbf16>
      %c0_71 = arith.constant 0 : index
      %c0_72 = arith.constant 0 : index
      %c1_73 = arith.constant 1 : index
      %c0_74 = arith.constant 0 : index
      %106 = vector.load %arg5[%c0_71, %c0_72, %c1_73, %c0_74] : memref<1x8x2x8xbf16, #tpu.memory_space<vmem>>, vector<1x8x1x8xbf16>
      %107 = vector.shape_cast %106 : vector<1x8x1x8xbf16> to vector<8x8xbf16>
      %c0_75 = arith.constant 0 : index
      %c0_76 = arith.constant 0 : index
      %c2 = arith.constant 2 : index
      %c0_77 = arith.constant 0 : index
      %108 = vector.load %arg3[%c0_75, %c0_76, %c2, %c0_77] : memref<1x8x4x8xbf16, #tpu.memory_space<vmem>>, vector<1x8x1x8xbf16>
      %109 = vector.shape_cast %108 : vector<1x8x1x8xbf16> to vector<8x8xbf16>
      %cst_78 = arith.constant dense<0.000000e+00> : vector<8x8xf32>
      %110 = tpu.matmul %109, %105, %cst_78 {dimension_numbers = #tpu.dot_dimension_numbers<[1], [1], [0], [0], [0, 0, 1, 0], [], []>} : vector<8x8xbf16>, vector<8x8xbf16>, vector<8x8xf32> -> vector<8x8xf32>
      %cst_79 = arith.constant -1.000000e+30 : f32
      %111 = vector.broadcast %cst_79 : f32 to vector<8x8xf32>
      %112 = arith.select %25, %110, %111 : vector<8x8xi1>, vector<8x8xf32>
      %c2_80 = arith.constant 2 : index
      %c0_81 = arith.constant 0 : index
      %c0_82 = arith.constant 0 : index
      %113 = vector.load %arg7[%c2_80, %c0_81, %c0_82] : memref<4x8x1xf32, #tpu.memory_space<vmem>>, vector<1x8x1xf32>
      %114 = vector.shape_cast %113 : vector<1x8x1xf32> to vector<8x1xf32>
      %c2_83 = arith.constant 2 : index
      %c0_84 = arith.constant 0 : index
      %c0_85 = arith.constant 0 : index
      %115 = vector.load %arg8[%c2_83, %c0_84, %c0_85] : memref<4x8x1xf32, #tpu.memory_space<vmem>>, vector<1x8x1xf32>
      %116 = vector.shape_cast %115 : vector<1x8x1xf32> to vector<8x1xf32>
      %cst_86 = arith.constant dense<0xFF800000> : vector<8xf32>
      %117 = vector.multi_reduction <maximumf>, %112, %cst_86 [1] : vector<8x8xf32> to vector<8xf32>
      %118 = vector.shape_cast %117 : vector<8xf32> to vector<8x1xf32>
      %119 = arith.maximumf %114, %118 : vector<8x1xf32>
      %120 = arith.subf %114, %119 : vector<8x1xf32>
      %121 = math.exp %120 : vector<8x1xf32>
      %122 = vector.broadcast %119 : vector<8x1xf32> to vector<8x8xf32>
      %123 = arith.subf %112, %122 : vector<8x8xf32>
      %124 = math.exp %123 : vector<8x8xf32>
      %125 = arith.mulf %121, %116 : vector<8x1xf32>
      %cst_87 = arith.constant dense<0.000000e+00> : vector<8xf32>
      %126 = vector.multi_reduction <add>, %124, %cst_87 [1] : vector<8x8xf32> to vector<8xf32>
      %127 = vector.shape_cast %126 : vector<8xf32> to vector<8x1xf32>
      %128 = arith.addf %125, %127 : vector<8x1xf32>
      %c2_88 = arith.constant 2 : index
      %c0_89 = arith.constant 0 : index
      %c0_90 = arith.constant 0 : index
      %129 = vector.load %arg8[%c2_88, %c0_89, %c0_90] : memref<4x8x1xf32, #tpu.memory_space<vmem>>, vector<1x8x1xf32>
      %130 = vector.shape_cast %129 : vector<1x8x1xf32> to vector<8x1xf32>
      %131 = vector.shape_cast %128 : vector<8x1xf32> to vector<1x8x1xf32>
      tpu.vector_store %arg8[%c2_88, %c0_89, %c0_90], %131 {strides = array<i32>} : memref<4x8x1xf32, #tpu.memory_space<vmem>>, vector<1x8x1xf32>,
      %c2_91 = arith.constant 2 : index
      %c0_92 = arith.constant 0 : index
      %c0_93 = arith.constant 0 : index
      %132 = vector.load %arg9[%c2_91, %c0_92, %c0_93] : memref<4x8x8xf32, #tpu.memory_space<vmem>>, vector<1x8x8xf32>
      %133 = vector.shape_cast %132 : vector<1x8x8xf32> to vector<8x8xf32>
      %134 = vector.broadcast %121 : vector<8x1xf32> to vector<8x8xf32>
      %135 = arith.mulf %134, %133 : vector<8x8xf32>
      %136 = arith.truncf %124 : vector<8x8xf32> to vector<8x8xbf16>
      %cst_94 = arith.constant dense<0.000000e+00> : vector<8x8xf32>
      %137 = tpu.matmul %136, %107, %cst_94 {dimension_numbers = #tpu.dot_dimension_numbers<[1], [0], [0], [1], [0, 0, 1, 1], [], []>} : vector<8x8xbf16>, vector<8x8xbf16>, vector<8x8xf32> -> vector<8x8xf32>
      %138 = arith.addf %135, %137 : vector<8x8xf32>
      %c2_95 = arith.constant 2 : index
      %c0_96 = arith.constant 0 : index
      %c0_97 = arith.constant 0 : index
      %139 = vector.load %arg9[%c2_95, %c0_96, %c0_97] : memref<4x8x8xf32, #tpu.memory_space<vmem>>, vector<1x8x8xf32>
      %140 = vector.shape_cast %139 : vector<1x8x8xf32> to vector<8x8xf32>
      %141 = vector.shape_cast %138 : vector<8x8xf32> to vector<1x8x8xf32>
      tpu.vector_store %arg9[%c2_95, %c0_96, %c0_97], %141 {strides = array<i32>} : memref<4x8x8xf32, #tpu.memory_space<vmem>>, vector<1x8x8xf32>,
      %c2_98 = arith.constant 2 : index
      %c0_99 = arith.constant 0 : index
      %c0_100 = arith.constant 0 : index
      %142 = vector.load %arg7[%c2_98, %c0_99, %c0_100] : memref<4x8x1xf32, #tpu.memory_space<vmem>>, vector<1x8x1xf32>
      %143 = vector.shape_cast %142 : vector<1x8x1xf32> to vector<8x1xf32>
      %144 = vector.shape_cast %119 : vector<8x1xf32> to vector<1x8x1xf32>
      tpu.vector_store %arg7[%c2_98, %c0_99, %c0_100], %144 {strides = array<i32>} : memref<4x8x1xf32, #tpu.memory_space<vmem>>, vector<1x8x1xf32>,
      %c0_101 = arith.constant 0 : index
      %c0_102 = arith.constant 0 : index
      %c3 = arith.constant 3 : index
      %c0_103 = arith.constant 0 : index
      %145 = vector.load %arg3[%c0_101, %c0_102, %c3, %c0_103] : memref<1x8x4x8xbf16, #tpu.memory_space<vmem>>, vector<1x8x1x8xbf16>
      %146 = vector.shape_cast %145 : vector<1x8x1x8xbf16> to vector<8x8xbf16>
      %cst_104 = arith.constant dense<0.000000e+00> : vector<8x8xf32>
      %147 = tpu.matmul %146, %105, %cst_104 {dimension_numbers = #tpu.dot_dimension_numbers<[1], [1], [0], [0], [0, 0, 1, 0], [], []>} : vector<8x8xbf16>, vector<8x8xbf16>, vector<8x8xf32> -> vector<8x8xf32>
      %cst_105 = arith.constant -1.000000e+30 : f32
      %148 = vector.broadcast %cst_105 : f32 to vector<8x8xf32>
      %149 = arith.select %25, %147, %148 : vector<8x8xi1>, vector<8x8xf32>
      %c3_106 = arith.constant 3 : index
      %c0_107 = arith.constant 0 : index
      %c0_108 = arith.constant 0 : index
      %150 = vector.load %arg7[%c3_106, %c0_107, %c0_108] : memref<4x8x1xf32, #tpu.memory_space<vmem>>, vector<1x8x1xf32>
      %151 = vector.shape_cast %150 : vector<1x8x1xf32> to vector<8x1xf32>
      %c3_109 = arith.constant 3 : index
      %c0_110 = arith.constant 0 : index
      %c0_111 = arith.constant 0 : index
      %152 = vector.load %arg8[%c3_109, %c0_110, %c0_111] : memref<4x8x1xf32, #tpu.memory_space<vmem>>, vector<1x8x1xf32>
      %153 = vector.shape_cast %152 : vector<1x8x1xf32> to vector<8x1xf32>
      %cst_112 = arith.constant dense<0xFF800000> : vector<8xf32>
      %154 = vector.multi_reduction <maximumf>, %149, %cst_112 [1] : vector<8x8xf32> to vector<8xf32>
      %155 = vector.shape_cast %154 : vector<8xf32> to vector<8x1xf32>
      %156 = arith.maximumf %151, %155 : vector<8x1xf32>
      %157 = arith.subf %151, %156 : vector<8x1xf32>
      %158 = math.exp %157 : vector<8x1xf32>
      %159 = vector.broadcast %156 : vector<8x1xf32> to vector<8x8xf32>
      %160 = arith.subf %149, %159 : vector<8x8xf32>
      %161 = math.exp %160 : vector<8x8xf32>
      %162 = arith.mulf %158, %153 : vector<8x1xf32>
      %cst_113 = arith.constant dense<0.000000e+00> : vector<8xf32>
      %163 = vector.multi_reduction <add>, %161, %cst_113 [1] : vector<8x8xf32> to vector<8xf32>
      %164 = vector.shape_cast %163 : vector<8xf32> to vector<8x1xf32>
      %165 = arith.addf %162, %164 : vector<8x1xf32>
      %c3_114 = arith.constant 3 : index
      %c0_115 = arith.constant 0 : index
      %c0_116 = arith.constant 0 : index
      %166 = vector.load %arg8[%c3_114, %c0_115, %c0_116] : memref<4x8x1xf32, #tpu.memory_space<vmem>>, vector<1x8x1xf32>
      %167 = vector.shape_cast %166 : vector<1x8x1xf32> to vector<8x1xf32>
      %168 = vector.shape_cast %165 : vector<8x1xf32> to vector<1x8x1xf32>
      tpu.vector_store %arg8[%c3_114, %c0_115, %c0_116], %168 {strides = array<i32>} : memref<4x8x1xf32, #tpu.memory_space<vmem>>, vector<1x8x1xf32>,
      %c3_117 = arith.constant 3 : index
      %c0_118 = arith.constant 0 : index
      %c0_119 = arith.constant 0 : index
      %169 = vector.load %arg9[%c3_117, %c0_118, %c0_119] : memref<4x8x8xf32, #tpu.memory_space<vmem>>, vector<1x8x8xf32>
      %170 = vector.shape_cast %169 : vector<1x8x8xf32> to vector<8x8xf32>
      %171 = vector.broadcast %158 : vector<8x1xf32> to vector<8x8xf32>
      %172 = arith.mulf %171, %170 : vector<8x8xf32>
      %173 = arith.truncf %161 : vector<8x8xf32> to vector<8x8xbf16>
      %cst_120 = arith.constant dense<0.000000e+00> : vector<8x8xf32>
      %174 = tpu.matmul %173, %107, %cst_120 {dimension_numbers = #tpu.dot_dimension_numbers<[1], [0], [0], [1], [0, 0, 1, 1], [], []>} : vector<8x8xbf16>, vector<8x8xbf16>, vector<8x8xf32> -> vector<8x8xf32>
      %175 = arith.addf %172, %174 : vector<8x8xf32>
      %c3_121 = arith.constant 3 : index
      %c0_122 = arith.constant 0 : index
      %c0_123 = arith.constant 0 : index
      %176 = vector.load %arg9[%c3_121, %c0_122, %c0_123] : memref<4x8x8xf32, #tpu.memory_space<vmem>>, vector<1x8x8xf32>
      %177 = vector.shape_cast %176 : vector<1x8x8xf32> to vector<8x8xf32>
      %178 = vector.shape_cast %175 : vector<8x8xf32> to vector<1x8x8xf32>
      tpu.vector_store %arg9[%c3_121, %c0_122, %c0_123], %178 {strides = array<i32>} : memref<4x8x8xf32, #tpu.memory_space<vmem>>, vector<1x8x8xf32>,
      %c3_124 = arith.constant 3 : index
      %c0_125 = arith.constant 0 : index
      %c0_126 = arith.constant 0 : index
      %179 = vector.load %arg7[%c3_124, %c0_125, %c0_126] : memref<4x8x1xf32, #tpu.memory_space<vmem>>, vector<1x8x1xf32>
      %180 = vector.shape_cast %179 : vector<1x8x1xf32> to vector<8x1xf32>
      %181 = vector.shape_cast %156 : vector<8x1xf32> to vector<1x8x1xf32>
      tpu.vector_store %arg7[%c3_124, %c0_125, %c0_126], %181 {strides = array<i32>} : memref<4x8x1xf32, #tpu.memory_space<vmem>>, vector<1x8x1xf32>,
    } else {
    }
    %c0_i32_6 = arith.constant 0 : i32
    %16 = arith.cmpi eq, %arg2, %c0_i32_6 : i32
    %17 = arith.extui %16 : i1 to i32
    %c0_i32_7 = arith.constant 0 : i32
    %18 = arith.cmpi ne, %17, %c0_i32_7 : i32
    scf.if %18 {
      %c0 = arith.constant 0 : index
      %c0_8 = arith.constant 0 : index
      %c0_9 = arith.constant 0 : index
      %19 = vector.load %arg8[%c0, %c0_8, %c0_9] : memref<4x8x1xf32, #tpu.memory_space<vmem>>, vector<1x8x1xf32>
      %20 = vector.shape_cast %19 : vector<1x8x1xf32> to vector<8x1xf32>
      %21 = tpu.reciprocal %20 {approx = true} : vector<8x1xf32> -> vector<8x1xf32>
      %c0_10 = arith.constant 0 : index
      %c0_11 = arith.constant 0 : index
      %c0_12 = arith.constant 0 : index
      %22 = vector.load %arg9[%c0_10, %c0_11, %c0_12] : memref<4x8x8xf32, #tpu.memory_space<vmem>>, vector<1x8x8xf32>
      %23 = vector.shape_cast %22 : vector<1x8x8xf32> to vector<8x8xf32>
      %24 = vector.broadcast %21 : vector<8x1xf32> to vector<8x8xf32>
      %25 = arith.mulf %23, %24 : vector<8x8xf32>
      %26 = arith.truncf %25 : vector<8x8xf32> to vector<8x8xbf16>
      %c0_13 = arith.constant 0 : index
      %c0_14 = arith.constant 0 : index
      %c0_15 = arith.constant 0 : index
      %c0_16 = arith.constant 0 : index
      %27 = vector.load %arg6[%c0_13, %c0_14, %c0_15, %c0_16] : memref<1x8x4x8xbf16, #tpu.memory_space<vmem>>, vector<1x8x1x8xbf16>
      %28 = vector.shape_cast %27 : vector<1x8x1x8xbf16> to vector<8x8xbf16>
      %29 = vector.shape_cast %26 : vector<8x8xbf16> to vector<1x8x1x8xbf16>
      tpu.vector_store %arg6[%c0_13, %c0_14, %c0_15, %c0_16], %29 {strides = array<i32>} : memref<1x8x4x8xbf16, #tpu.memory_space<vmem>>, vector<1x8x1x8xbf16>,
      %c1 = arith.constant 1 : index
      %c0_17 = arith.constant 0 : index
      %c0_18 = arith.constant 0 : index
      %30 = vector.load %arg8[%c1, %c0_17, %c0_18] : memref<4x8x1xf32, #tpu.memory_space<vmem>>, vector<1x8x1xf32>
      %31 = vector.shape_cast %30 : vector<1x8x1xf32> to vector<8x1xf32>
      %32 = tpu.reciprocal %31 {approx = true} : vector<8x1xf32> -> vector<8x1xf32>
      %c1_19 = arith.constant 1 : index
      %c0_20 = arith.constant 0 : index
      %c0_21 = arith.constant 0 : index
      %33 = vector.load %arg9[%c1_19, %c0_20, %c0_21] : memref<4x8x8xf32, #tpu.memory_space<vmem>>, vector<1x8x8xf32>
      %34 = vector.shape_cast %33 : vector<1x8x8xf32> to vector<8x8xf32>
      %35 = vector.broadcast %32 : vector<8x1xf32> to vector<8x8xf32>
      %36 = arith.mulf %34, %35 : vector<8x8xf32>
      %37 = arith.truncf %36 : vector<8x8xf32> to vector<8x8xbf16>
      %c0_22 = arith.constant 0 : index
      %c0_23 = arith.constant 0 : index
      %c1_24 = arith.constant 1 : index
      %c0_25 = arith.constant 0 : index
      %38 = vector.load %arg6[%c0_22, %c0_23, %c1_24, %c0_25] : memref<1x8x4x8xbf16, #tpu.memory_space<vmem>>, vector<1x8x1x8xbf16>
      %39 = vector.shape_cast %38 : vector<1x8x1x8xbf16> to vector<8x8xbf16>
      %40 = vector.shape_cast %37 : vector<8x8xbf16> to vector<1x8x1x8xbf16>
      tpu.vector_store %arg6[%c0_22, %c0_23, %c1_24, %c0_25], %40 {strides = array<i32>} : memref<1x8x4x8xbf16, #tpu.memory_space<vmem>>, vector<1x8x1x8xbf16>,
      %c2 = arith.constant 2 : index
      %c0_26 = arith.constant 0 : index
      %c0_27 = arith.constant 0 : index
      %41 = vector.load %arg8[%c2, %c0_26, %c0_27] : memref<4x8x1xf32, #tpu.memory_space<vmem>>, vector<1x8x1xf32>
      %42 = vector.shape_cast %41 : vector<1x8x1xf32> to vector<8x1xf32>
      %43 = tpu.reciprocal %42 {approx = true} : vector<8x1xf32> -> vector<8x1xf32>
      %c2_28 = arith.constant 2 : index
      %c0_29 = arith.constant 0 : index
      %c0_30 = arith.constant 0 : index
      %44 = vector.load %arg9[%c2_28, %c0_29, %c0_30] : memref<4x8x8xf32, #tpu.memory_space<vmem>>, vector<1x8x8xf32>
      %45 = vector.shape_cast %44 : vector<1x8x8xf32> to vector<8x8xf32>
      %46 = vector.broadcast %43 : vector<8x1xf32> to vector<8x8xf32>
      %47 = arith.mulf %45, %46 : vector<8x8xf32>
      %48 = arith.truncf %47 : vector<8x8xf32> to vector<8x8xbf16>
      %c0_31 = arith.constant 0 : index
      %c0_32 = arith.constant 0 : index
      %c2_33 = arith.constant 2 : index
      %c0_34 = arith.constant 0 : index
      %49 = vector.load %arg6[%c0_31, %c0_32, %c2_33, %c0_34] : memref<1x8x4x8xbf16, #tpu.memory_space<vmem>>, vector<1x8x1x8xbf16>
      %50 = vector.shape_cast %49 : vector<1x8x1x8xbf16> to vector<8x8xbf16>
      %51 = vector.shape_cast %48 : vector<8x8xbf16> to vector<1x8x1x8xbf16>
      tpu.vector_store %arg6[%c0_31, %c0_32, %c2_33, %c0_34], %51 {strides = array<i32>} : memref<1x8x4x8xbf16, #tpu.memory_space<vmem>>, vector<1x8x1x8xbf16>,
      %c3 = arith.constant 3 : index
      %c0_35 = arith.constant 0 : index
      %c0_36 = arith.constant 0 : index
      %52 = vector.load %arg8[%c3, %c0_35, %c0_36] : memref<4x8x1xf32, #tpu.memory_space<vmem>>, vector<1x8x1xf32>
      %53 = vector.shape_cast %52 : vector<1x8x1xf32> to vector<8x1xf32>
      %54 = tpu.reciprocal %53 {approx = true} : vector<8x1xf32> -> vector<8x1xf32>
      %c3_37 = arith.constant 3 : index
      %c0_38 = arith.constant 0 : index
      %c0_39 = arith.constant 0 : index
      %55 = vector.load %arg9[%c3_37, %c0_38, %c0_39] : memref<4x8x8xf32, #tpu.memory_space<vmem>>, vector<1x8x8xf32>
      %56 = vector.shape_cast %55 : vector<1x8x8xf32> to vector<8x8xf32>
      %57 = vector.broadcast %54 : vector<8x1xf32> to vector<8x8xf32>
      %58 = arith.mulf %56, %57 : vector<8x8xf32>
      %59 = arith.truncf %58 : vector<8x8xf32> to vector<8x8xbf16>
      %c0_40 = arith.constant 0 : index
      %c0_41 = arith.constant 0 : index
      %c3_42 = arith.constant 3 : index
      %c0_43 = arith.constant 0 : index
      %60 = vector.load %arg6[%c0_40, %c0_41, %c3_42, %c0_43] : memref<1x8x4x8xbf16, #tpu.memory_space<vmem>>, vector<1x8x1x8xbf16>
      %61 = vector.shape_cast %60 : vector<1x8x1x8xbf16> to vector<8x8xbf16>
      %62 = vector.shape_cast %59 : vector<8x8xbf16> to vector<1x8x1x8xbf16>
      tpu.vector_store %arg6[%c0_40, %c0_41, %c3_42, %c0_43], %62 {strides = array<i32>} : memref<1x8x4x8xbf16, #tpu.memory_space<vmem>>, vector<1x8x1x8xbf16>,
    } else {
    }
    return
  }
  func.func @transform_0(%arg0: i32, %arg1: i32, %arg2: i32) -> (i32, i32, i32, i32) {
    %c0_i32 = arith.constant 0 : i32
    %c0_i32_0 = arith.constant 0 : i32
    %c0_i32_1 = arith.constant 0 : i32
    return %arg0, %arg1, %c0_i32, %c0_i32_0 : i32, i32, i32, i32
  }
  func.func @transform_1(%arg0: i32, %arg1: i32, %arg2: i32) -> (i32, i32, i32, i32) {
    %0 = arith.minsi %arg2, %arg1 : i32
    %c0_i32 = arith.constant 0 : i32
    %c0_i32_0 = arith.constant 0 : i32
    %c0_i32_1 = arith.constant 0 : i32
    return %arg0, %0, %c0_i32, %c0_i32_0 : i32, i32, i32, i32
  }
  func.func @transform_2(%arg0: i32, %arg1: i32, %arg2: i32) -> (i32, i32, i32, i32) {
    %0 = arith.minsi %arg2, %arg1 : i32
    %c0_i32 = arith.constant 0 : i32
    %c0_i32_0 = arith.constant 0 : i32
    %c0_i32_1 = arith.constant 0 : i32
    return %arg0, %0, %c0_i32, %c0_i32_0 : i32, i32, i32, i32
  }
  func.func @transform_3(%arg0: i32, %arg1: i32, %arg2: i32) -> (i32, i32, i32, i32) {
    %c0_i32 = arith.constant 0 : i32
    %c0_i32_0 = arith.constant 0 : i32
    %c0_i32_1 = arith.constant 0 : i32
    return %arg0, %arg1, %c0_i32, %c0_i32_0 : i32, i32, i32, i32
  }
}

module attributes {stable_mosaic.version = 11 : i64} {
  func.func @_matmul_kernel(%arg0: i32, %arg1: i32, %arg2: i32, %arg3: memref<16x32xbf16, #tpu.memory_space<vmem>>, %arg4: memref<32x32xbf16, #tpu.memory_space<vmem>>, %arg5: memref<16x32xbf16, #tpu.memory_space<vmem>>, %arg6: memref<16x32xf32, #tpu.memory_space<vmem>>) attributes {dimension_semantics = [#tpu.dimension_semantics<parallel>, #tpu.dimension_semantics<parallel>, #tpu.dimension_semantics<arbitrary>], iteration_bounds = array<i64: 1, 1, 1>, scalar_prefetch = 0 : i64, scratch_operands = 1 : i64, tpu.core_type = #tpu.core_type<tc>, window_params = [{transform_indices = @transform_0, window_bounds = array<i64: 16, 32>}, {transform_indices = @transform_1, window_bounds = array<i64: 32, 32>}, {transform_indices = @transform_2, window_bounds = array<i64: 16, 32>}]} {
    %c0_i32 = arith.constant 0 : i32
    %0 = arith.cmpi eq, %arg2, %c0_i32 : i32
    %1 = arith.extui %0 : i1 to i32
    %c0_i32_0 = arith.constant 0 : i32
    %2 = arith.cmpi ne, %1, %c0_i32_0 : i32
    scf.if %2 {
      %cst_10 = arith.constant 0.000000e+00 : f32
      %12 = vector.broadcast %cst_10 : f32 to vector<16x32xf32>
      %c0_11 = arith.constant 0 : index
      %c0_12 = arith.constant 0 : index
      %13 = vector.load %arg6[%c0_11, %c0_12] : memref<16x32xf32, #tpu.memory_space<vmem>>, vector<16x32xf32>
      tpu.vector_store %arg6[%c0_11, %c0_12], %12 {strides = array<i32>} : memref<16x32xf32, #tpu.memory_space<vmem>>, vector<16x32xf32>,
    } else {
    }
    %c0 = arith.constant 0 : index
    %c0_1 = arith.constant 0 : index
    %3 = vector.load %arg6[%c0, %c0_1] : memref<16x32xf32, #tpu.memory_space<vmem>>, vector<16x32xf32>
    %c0_2 = arith.constant 0 : index
    %c0_3 = arith.constant 0 : index
    %4 = vector.load %arg3[%c0_2, %c0_3] : memref<16x32xbf16, #tpu.memory_space<vmem>>, vector<16x32xbf16>
    %c0_4 = arith.constant 0 : index
    %c0_5 = arith.constant 0 : index
    %5 = vector.load %arg4[%c0_4, %c0_5] : memref<32x32xbf16, #tpu.memory_space<vmem>>, vector<32x32xbf16>
    %cst = arith.constant dense<0.000000e+00> : vector<16x32xf32>
    %6 = tpu.matmul %4, %5, %cst {dimension_numbers = #tpu.dot_dimension_numbers<[1], [0], [0], [1], [0, 0, 1, 1], [], []>} : vector<16x32xbf16>, vector<32x32xbf16>, vector<16x32xf32> -> vector<16x32xf32>
    %7 = arith.addf %3, %6 : vector<16x32xf32>
    %c0_6 = arith.constant 0 : index
    %c0_7 = arith.constant 0 : index
    %8 = vector.load %arg6[%c0_6, %c0_7] : memref<16x32xf32, #tpu.memory_space<vmem>>, vector<16x32xf32>
    tpu.vector_store %arg6[%c0_6, %c0_7], %7 {strides = array<i32>} : memref<16x32xf32, #tpu.memory_space<vmem>>, vector<16x32xf32>,
    %c0_i32_8 = arith.constant 0 : i32
    %9 = arith.cmpi eq, %arg2, %c0_i32_8 : i32
    %10 = arith.extui %9 : i1 to i32
    %c0_i32_9 = arith.constant 0 : i32
    %11 = arith.cmpi ne, %10, %c0_i32_9 : i32
    scf.if %11 {
      %c0_10 = arith.constant 0 : index
      %c0_11 = arith.constant 0 : index
      %12 = vector.load %arg6[%c0_10, %c0_11] : memref<16x32xf32, #tpu.memory_space<vmem>>, vector<16x32xf32>
      %cst_12 = arith.constant 0.989949464 : f32
      %13 = vector.broadcast %cst_12 : f32 to vector<16x32xf32>
      %14 = arith.mulf %12, %13 : vector<16x32xf32>
      %15 = arith.truncf %14 : vector<16x32xf32> to vector<16x32xbf16>
      %c0_13 = arith.constant 0 : index
      %c0_14 = arith.constant 0 : index
      %16 = vector.load %arg5[%c0_13, %c0_14] : memref<16x32xbf16, #tpu.memory_space<vmem>>, vector<16x32xbf16>
      tpu.vector_store %arg5[%c0_13, %c0_14], %15 {strides = array<i32>} : memref<16x32xbf16, #tpu.memory_space<vmem>>, vector<16x32xbf16>,
    } else {
    }
    return
  }
  func.func @transform_0(%arg0: i32, %arg1: i32, %arg2: i32) -> (i32, i32) {
    %c0_i32 = arith.constant 0 : i32
    return %arg0, %arg2 : i32, i32
  }
  func.func @transform_1(%arg0: i32, %arg1: i32, %arg2: i32) -> (i32, i32) {
    %c0_i32 = arith.constant 0 : i32
    return %arg2, %arg1 : i32, i32
  }
  func.func @transform_2(%arg0: i32, %arg1: i32, %arg2: i32) -> (i32, i32) {
    %c0_i32 = arith.constant 0 : i32
    return %arg0, %arg1 : i32, i32
  }
}

module attributes {stable_mosaic.version = 11 : i64} {
  func.func @_add_rmsnorm_kernel(%arg0: i32, %arg1: memref<16x32xbf16, #tpu.memory_space<vmem>>, %arg2: memref<16x32xbf16, #tpu.memory_space<vmem>>, %arg3: memref<1x32xbf16, #tpu.memory_space<vmem>>, %arg4: memref<16x32xbf16, #tpu.memory_space<vmem>>, %arg5: memref<16x32xbf16, #tpu.memory_space<vmem>>) attributes {dimension_semantics = [#tpu.dimension_semantics<parallel>], iteration_bounds = array<i64: 1>, scalar_prefetch = 0 : i64, scratch_operands = 0 : i64, tpu.core_type = #tpu.core_type<tc>, window_params = [{transform_indices = @transform_0, window_bounds = array<i64: 16, 32>}, {transform_indices = @transform_1, window_bounds = array<i64: 16, 32>}, {pipeline_mode = #tpu.pipeline_mode<synchronous>, transform_indices = @transform_2, window_bounds = array<i64: 1, 32>}, {transform_indices = @transform_3, window_bounds = array<i64: 16, 32>}, {transform_indices = @transform_4, window_bounds = array<i64: 16, 32>}]} {
    %c0 = arith.constant 0 : index
    %c0_0 = arith.constant 0 : index
    %0 = vector.load %arg1[%c0, %c0_0] : memref<16x32xbf16, #tpu.memory_space<vmem>>, vector<16x32xbf16>
    %c0_1 = arith.constant 0 : index
    %c0_2 = arith.constant 0 : index
    %1 = vector.load %arg2[%c0_1, %c0_2] : memref<16x32xbf16, #tpu.memory_space<vmem>>, vector<16x32xbf16>
    %2 = arith.addf %0, %1 : vector<16x32xbf16>
    %c0_3 = arith.constant 0 : index
    %c0_4 = arith.constant 0 : index
    %3 = vector.load %arg5[%c0_3, %c0_4] : memref<16x32xbf16, #tpu.memory_space<vmem>>, vector<16x32xbf16>
    tpu.vector_store %arg5[%c0_3, %c0_4], %2 {strides = array<i32>} : memref<16x32xbf16, #tpu.memory_space<vmem>>, vector<16x32xbf16>,
    %4 = arith.extf %2 : vector<16x32xbf16> to vector<16x32xf32>
    %5 = arith.mulf %4, %4 : vector<16x32xf32>
    %cst = arith.constant dense<0.000000e+00> : vector<16xf32>
    %6 = vector.multi_reduction <add>, %5, %cst [1] : vector<16x32xf32> to vector<16xf32>
    %7 = vector.shape_cast %6 : vector<16xf32> to vector<16x1xf32>
    %cst_5 = arith.constant 3.200000e+01 : f32
    %8 = vector.broadcast %cst_5 : f32 to vector<16x1xf32>
    %9 = arith.divf %7, %8 : vector<16x1xf32>
    %cst_6 = arith.constant 9.99999997E-7 : f32
    %10 = vector.broadcast %cst_6 : f32 to vector<16x1xf32>
    %11 = arith.addf %9, %10 : vector<16x1xf32>
    %12 = math.rsqrt %11 : vector<16x1xf32>
    %13 = vector.broadcast %12 : vector<16x1xf32> to vector<16x32xf32>
    %14 = arith.mulf %4, %13 : vector<16x32xf32>
    %15 = arith.truncf %14 : vector<16x32xf32> to vector<16x32xbf16>
    %c0_7 = arith.constant 0 : index
    %c0_8 = arith.constant 0 : index
    %16 = vector.load %arg3[%c0_7, %c0_8] : memref<1x32xbf16, #tpu.memory_space<vmem>>, vector<1x32xbf16>
    %17 = vector.broadcast %16 : vector<1x32xbf16> to vector<16x32xbf16>
    %18 = arith.mulf %15, %17 : vector<16x32xbf16>
    %c0_9 = arith.constant 0 : index
    %c0_10 = arith.constant 0 : index
    %19 = vector.load %arg4[%c0_9, %c0_10] : memref<16x32xbf16, #tpu.memory_space<vmem>>, vector<16x32xbf16>
    tpu.vector_store %arg4[%c0_9, %c0_10], %18 {strides = array<i32>} : memref<16x32xbf16, #tpu.memory_space<vmem>>, vector<16x32xbf16>,
    return
  }
  func.func @transform_0(%arg0: i32) -> (i32, i32) {
    %c0_i32 = arith.constant 0 : i32
    %c0_i32_0 = arith.constant 0 : i32
    return %arg0, %c0_i32 : i32, i32
  }
  func.func @transform_1(%arg0: i32) -> (i32, i32) {
    %c0_i32 = arith.constant 0 : i32
    %c0_i32_0 = arith.constant 0 : i32
    return %arg0, %c0_i32 : i32, i32
  }
  func.func @transform_2(%arg0: i32) -> (i32, i32) {
    %c0_i32 = arith.constant 0 : i32
    %c0_i32_0 = arith.constant 0 : i32
    %c0_i32_1 = arith.constant 0 : i32
    return %c0_i32, %c0_i32_0 : i32, i32
  }
  func.func @transform_3(%arg0: i32) -> (i32, i32) {
    %c0_i32 = arith.constant 0 : i32
    %c0_i32_0 = arith.constant 0 : i32
    return %arg0, %c0_i32 : i32, i32
  }
  func.func @transform_4(%arg0: i32) -> (i32, i32) {
    %c0_i32 = arith.constant 0 : i32
    %c0_i32_0 = arith.constant 0 : i32
    return %arg0, %c0_i32 : i32, i32
  }
}

module attributes {stable_mosaic.version = 11 : i64} {
  func.func @_matmul_kernel(%arg0: i32, %arg1: i32, %arg2: i32, %arg3: memref<16x32xbf16, #tpu.memory_space<vmem>>, %arg4: memref<32x128xbf16, #tpu.memory_space<vmem>>, %arg5: memref<16x128xbf16, #tpu.memory_space<vmem>>, %arg6: memref<16x128xf32, #tpu.memory_space<vmem>>) attributes {dimension_semantics = [#tpu.dimension_semantics<parallel>, #tpu.dimension_semantics<parallel>, #tpu.dimension_semantics<arbitrary>], iteration_bounds = array<i64: 1, 1, 1>, scalar_prefetch = 0 : i64, scratch_operands = 1 : i64, tpu.core_type = #tpu.core_type<tc>, window_params = [{transform_indices = @transform_0, window_bounds = array<i64: 16, 32>}, {transform_indices = @transform_1, window_bounds = array<i64: 32, 128>}, {transform_indices = @transform_2, window_bounds = array<i64: 16, 128>}]} {
    %c0_i32 = arith.constant 0 : i32
    %0 = arith.cmpi eq, %arg2, %c0_i32 : i32
    %1 = arith.extui %0 : i1 to i32
    %c0_i32_0 = arith.constant 0 : i32
    %2 = arith.cmpi ne, %1, %c0_i32_0 : i32
    scf.if %2 {
      %cst_10 = arith.constant 0.000000e+00 : f32
      %12 = vector.broadcast %cst_10 : f32 to vector<16x128xf32>
      %c0_11 = arith.constant 0 : index
      %c0_12 = arith.constant 0 : index
      %13 = vector.load %arg6[%c0_11, %c0_12] : memref<16x128xf32, #tpu.memory_space<vmem>>, vector<16x128xf32>
      tpu.vector_store %arg6[%c0_11, %c0_12], %12 {strides = array<i32>} : memref<16x128xf32, #tpu.memory_space<vmem>>, vector<16x128xf32>,
    } else {
    }
    %c0 = arith.constant 0 : index
    %c0_1 = arith.constant 0 : index
    %3 = vector.load %arg6[%c0, %c0_1] : memref<16x128xf32, #tpu.memory_space<vmem>>, vector<16x128xf32>
    %c0_2 = arith.constant 0 : index
    %c0_3 = arith.constant 0 : index
    %4 = vector.load %arg3[%c0_2, %c0_3] : memref<16x32xbf16, #tpu.memory_space<vmem>>, vector<16x32xbf16>
    %c0_4 = arith.constant 0 : index
    %c0_5 = arith.constant 0 : index
    %5 = vector.load %arg4[%c0_4, %c0_5] : memref<32x128xbf16, #tpu.memory_space<vmem>>, vector<32x128xbf16>
    %cst = arith.constant dense<0.000000e+00> : vector<16x128xf32>
    %6 = tpu.matmul %4, %5, %cst {dimension_numbers = #tpu.dot_dimension_numbers<[1], [0], [0], [1], [0, 0, 1, 1], [], []>} : vector<16x32xbf16>, vector<32x128xbf16>, vector<16x128xf32> -> vector<16x128xf32>
    %7 = arith.addf %3, %6 : vector<16x128xf32>
    %c0_6 = arith.constant 0 : index
    %c0_7 = arith.constant 0 : index
    %8 = vector.load %arg6[%c0_6, %c0_7] : memref<16x128xf32, #tpu.memory_space<vmem>>, vector<16x128xf32>
    tpu.vector_store %arg6[%c0_6, %c0_7], %7 {strides = array<i32>} : memref<16x128xf32, #tpu.memory_space<vmem>>, vector<16x128xf32>,
    %c0_i32_8 = arith.constant 0 : i32
    %9 = arith.cmpi eq, %arg2, %c0_i32_8 : i32
    %10 = arith.extui %9 : i1 to i32
    %c0_i32_9 = arith.constant 0 : i32
    %11 = arith.cmpi ne, %10, %c0_i32_9 : i32
    scf.if %11 {
      %c0_10 = arith.constant 0 : index
      %c0_11 = arith.constant 0 : index
      %12 = vector.load %arg6[%c0_10, %c0_11] : memref<16x128xf32, #tpu.memory_space<vmem>>, vector<16x128xf32>
      %13 = arith.truncf %12 : vector<16x128xf32> to vector<16x128xbf16>
      %c0_12 = arith.constant 0 : index
      %c0_13 = arith.constant 0 : index
      %14 = vector.load %arg5[%c0_12, %c0_13] : memref<16x128xbf16, #tpu.memory_space<vmem>>, vector<16x128xbf16>
      tpu.vector_store %arg5[%c0_12, %c0_13], %13 {strides = array<i32>} : memref<16x128xbf16, #tpu.memory_space<vmem>>, vector<16x128xbf16>,
    } else {
    }
    return
  }
  func.func @transform_0(%arg0: i32, %arg1: i32, %arg2: i32) -> (i32, i32) {
    %c0_i32 = arith.constant 0 : i32
    return %arg0, %arg2 : i32, i32
  }
  func.func @transform_1(%arg0: i32, %arg1: i32, %arg2: i32) -> (i32, i32) {
    %c0_i32 = arith.constant 0 : i32
    return %arg2, %arg1 : i32, i32
  }
  func.func @transform_2(%arg0: i32, %arg1: i32, %arg2: i32) -> (i32, i32) {
    %c0_i32 = arith.constant 0 : i32
    return %arg0, %arg1 : i32, i32
  }
}

module attributes {stable_mosaic.version = 11 : i64} {
  func.func @_silu_mul_matmul_kernel(%arg0: i32, %arg1: i32, %arg2: i32, %arg3: memref<16x2x64xbf16, #tpu.memory_space<vmem>>, %arg4: memref<64x32xbf16, #tpu.memory_space<vmem>>, %arg5: memref<16x32xbf16, #tpu.memory_space<vmem>>, %arg6: memref<16x32xf32, #tpu.memory_space<vmem>>) attributes {dimension_semantics = [#tpu.dimension_semantics<parallel>, #tpu.dimension_semantics<parallel>, #tpu.dimension_semantics<arbitrary>], iteration_bounds = array<i64: 1, 1, 1>, scalar_prefetch = 0 : i64, scratch_operands = 1 : i64, tpu.core_type = #tpu.core_type<tc>, window_params = [{transform_indices = @transform_0, window_bounds = array<i64: 16, 2, 64>}, {transform_indices = @transform_1, window_bounds = array<i64: 64, 32>}, {transform_indices = @transform_2, window_bounds = array<i64: 16, 32>}]} {
    %c0_i32 = arith.constant 0 : i32
    %0 = arith.cmpi eq, %arg2, %c0_i32 : i32
    %1 = arith.extui %0 : i1 to i32
    %c0_i32_0 = arith.constant 0 : i32
    %2 = arith.cmpi ne, %1, %c0_i32_0 : i32
    scf.if %2 {
      %cst_14 = arith.constant 0.000000e+00 : f32
      %25 = vector.broadcast %cst_14 : f32 to vector<16x32xf32>
      %c0_15 = arith.constant 0 : index
      %c0_16 = arith.constant 0 : index
      %26 = vector.load %arg6[%c0_15, %c0_16] : memref<16x32xf32, #tpu.memory_space<vmem>>, vector<16x32xf32>
      tpu.vector_store %arg6[%c0_15, %c0_16], %25 {strides = array<i32>} : memref<16x32xf32, #tpu.memory_space<vmem>>, vector<16x32xf32>,
    } else {
    }
    %c0 = arith.constant 0 : index
    %c0_1 = arith.constant 0 : index
    %c0_2 = arith.constant 0 : index
    %3 = vector.load %arg3[%c0, %c0_1, %c0_2] : memref<16x2x64xbf16, #tpu.memory_space<vmem>>, vector<16x1x64xbf16>
    %4 = vector.shape_cast %3 : vector<16x1x64xbf16> to vector<16x64xbf16>
    %5 = arith.extf %4 : vector<16x64xbf16> to vector<16x64xf32>
    %c0_3 = arith.constant 0 : index
    %c1 = arith.constant 1 : index
    %c0_4 = arith.constant 0 : index
    %6 = vector.load %arg3[%c0_3, %c1, %c0_4] : memref<16x2x64xbf16, #tpu.memory_space<vmem>>, vector<16x1x64xbf16>
    %7 = vector.shape_cast %6 : vector<16x1x64xbf16> to vector<16x64xbf16>
    %8 = arith.extf %7 : vector<16x64xbf16> to vector<16x64xf32>
    %9 = arith.negf %5 : vector<16x64xf32>
    %10 = math.exp %9 : vector<16x64xf32>
    %cst = arith.constant 1.000000e+00 : f32
    %11 = vector.broadcast %cst : f32 to vector<16x64xf32>
    %12 = arith.addf %11, %10 : vector<16x64xf32>
    %13 = arith.divf %11, %12 : vector<16x64xf32>
    %14 = arith.mulf %5, %13 : vector<16x64xf32>
    %15 = arith.mulf %14, %8 : vector<16x64xf32>
    %16 = arith.truncf %15 : vector<16x64xf32> to vector<16x64xbf16>
    %c0_5 = arith.constant 0 : index
    %c0_6 = arith.constant 0 : index
    %17 = vector.load %arg6[%c0_5, %c0_6] : memref<16x32xf32, #tpu.memory_space<vmem>>, vector<16x32xf32>
    %c0_7 = arith.constant 0 : index
    %c0_8 = arith.constant 0 : index
    %18 = vector.load %arg4[%c0_7, %c0_8] : memref<64x32xbf16, #tpu.memory_space<vmem>>, vector<64x32xbf16>
    %cst_9 = arith.constant dense<0.000000e+00> : vector<16x32xf32>
    %19 = tpu.matmul %16, %18, %cst_9 {dimension_numbers = #tpu.dot_dimension_numbers<[1], [0], [0], [1], [0, 0, 1, 1], [], []>} : vector<16x64xbf16>, vector<64x32xbf16>, vector<16x32xf32> -> vector<16x32xf32>
    %20 = arith.addf %17, %19 : vector<16x32xf32>
    %c0_10 = arith.constant 0 : index
    %c0_11 = arith.constant 0 : index
    %21 = vector.load %arg6[%c0_10, %c0_11] : memref<16x32xf32, #tpu.memory_space<vmem>>, vector<16x32xf32>
    tpu.vector_store %arg6[%c0_10, %c0_11], %20 {strides = array<i32>} : memref<16x32xf32, #tpu.memory_space<vmem>>, vector<16x32xf32>,
    %c0_i32_12 = arith.constant 0 : i32
    %22 = arith.cmpi eq, %arg2, %c0_i32_12 : i32
    %23 = arith.extui %22 : i1 to i32
    %c0_i32_13 = arith.constant 0 : i32
    %24 = arith.cmpi ne, %23, %c0_i32_13 : i32
    scf.if %24 {
      %c0_14 = arith.constant 0 : index
      %c0_15 = arith.constant 0 : index
      %25 = vector.load %arg6[%c0_14, %c0_15] : memref<16x32xf32, #tpu.memory_space<vmem>>, vector<16x32xf32>
      %cst_16 = arith.constant 0.989949464 : f32
      %26 = vector.broadcast %cst_16 : f32 to vector<16x32xf32>
      %27 = arith.mulf %25, %26 : vector<16x32xf32>
      %28 = arith.truncf %27 : vector<16x32xf32> to vector<16x32xbf16>
      %c0_17 = arith.constant 0 : index
      %c0_18 = arith.constant 0 : index
      %29 = vector.load %arg5[%c0_17, %c0_18] : memref<16x32xbf16, #tpu.memory_space<vmem>>, vector<16x32xbf16>
      tpu.vector_store %arg5[%c0_17, %c0_18], %28 {strides = array<i32>} : memref<16x32xbf16, #tpu.memory_space<vmem>>, vector<16x32xbf16>,
    } else {
    }
    return
  }
  func.func @transform_0(%arg0: i32, %arg1: i32, %arg2: i32) -> (i32, i32, i32) {
    %c0_i32 = arith.constant 0 : i32
    %c0_i32_0 = arith.constant 0 : i32
    return %arg0, %c0_i32, %arg2 : i32, i32, i32
  }
  func.func @transform_1(%arg0: i32, %arg1: i32, %arg2: i32) -> (i32, i32) {
    %c0_i32 = arith.constant 0 : i32
    return %arg2, %arg1 : i32, i32
  }
  func.func @transform_2(%arg0: i32, %arg1: i32, %arg2: i32) -> (i32, i32) {
    %c0_i32 = arith.constant 0 : i32
    return %arg0, %arg1 : i32, i32
  }
}

</mosaic_0001>

<bundles_post_ra>
// kernel: llama_decoder_layer.8
= control target key start
LH: loop header
LB: loop body
LE: loop exit
PB: predicated region body
PF: predicated region fallthrough
CT: control target
= control target key end

     0   :  { %vm17_vm0 = vcmask 261120   ;;  %v38_v13 = vlaneseq  ;;  %vm50_vm1 = vcmask 257024   ;;  %s94_s0 = inlined_call_operand.vmem [shape: bf16[16,32], index: 0, kind: input, shape index: {}]   ;;  %s95_s1 = inlined_call_operand.vmem [shape: bf16[1,32], index: 1, kind: input, shape index: {}]   ;;  %s96_s2 = inlined_call_operand.vmem [shape: bf16[16,32], index: 2, kind: output, shape index: {}]  }
   0x1   :  { %v60_v0 = vld [vmem:[%s94_s0] sm:$0xff]  }
   0x2   :  { %v61_v1 = vunpack.c.l.bf16 %v60_v0  ;;  %v62_v2 = vunpack.c.h.bf16 %v60_v0  ;;  %v39_v14 = vshrl.u32 %v38_v13, 7  ;;  %v34_v15 = vld [vmem:[%s95_s1] sm:$0x1] }
   0x3   :  { %v36_v16 = vpack.i.b16 %v34_v15, %v34_v15 }
   0x4   :  { %v15_v3 = vmul.f32 %v61_v1, %v61_v1  ;;  %v16_v4 = vmul.f32 %v62_v2, %v62_v2  ;;  %v40_v17 = vsub.s32 0, %v39_v14 }
   0x6   :  { %v18_v5 = vsel %vm17_vm0, %v15_v3, 0.0  ;;  %v21_v6 = vsel %vm17_vm0, %v16_v4, 0.0  ;;  %v41_v21 = vrot.slane %v36_v16, %v40_v17 }
   0x7   :  { %19 = vadd.xlane.f32.xlu0 %v18_v5 }
   0xb   :  { %22 = vadd.xlane.f32.xlu0 %v21_v6 }
  0x94   :  { %v20_v7 = vpop.xlane.xlu0 %19 }
  0x95   :  { %v25_v8 = vmul.f32 0.03125, %v20_v7 }
  0x97   :  { %v27_v9 = vadd.f32 1e-06, %v25_v8 }
  0x98   :  { %v23_v10 = vpop.xlane.xlu0 %22 }
  0x99   :  { %v26_v11 = vmul.f32 0.03125, %v23_v10  ;;  %63 = vrsqrt.f32 %v27_v9 }
  0x9b   :  { %v28_v12 = vadd.f32 1e-06, %v26_v11 }
  0x9d   :  { %65 = vrsqrt.f32 %v28_v12 }
  0xa3   :  { %v64_v18 = vpop.eup %63 }
  0xa4   :  { %v31_v20 = vmul.f32 %v64_v18, %v61_v1 }
  0xa7   :  { %v66_v19 = vpop.eup %65 }
  0xa8   :  { %v32_v22 = vmul.f32 %v66_v19, %v62_v2 }
  0xaa   :  { %v33_v23 = vpack.c.bf16 %v32_v22, %v31_v20 }
  0xac   :  { %v42_v24 = vmul.bf16 %v41_v21, %v33_v23 }
  0xae   :  { %v57_v25 = vcombine.low %v42_v24, %v42_v24  ;;  %v58_v26 = vcombine.high %v42_v24, %v42_v24 }
  0xb0   :  { %51 = vst.msk [vmem:[%s96_s2] sm:$0xf] %vm50_vm1, %v57_v25  ;;  %52 = vst.msk [vmem:[%s96_s2 + $0x4] sm:$0xf] %vm50_vm1, %v58_v26 }

// kernel: llama_decoder_layer.9
= control target key start
LH: loop header
LB: loop body
LE: loop exit
PB: predicated region body
PF: predicated region fallthrough
CT: control target
= control target key end

     0   :  { %vm16_vm0 = vcmask 523264   ;;  %v138_v0 = vmov 0.0   ;;  %vm139_vm1 = vmmov 0   ;;  %vm44_vm2 = vcmask 261120   ;;  %s174_s1 = inlined_call_operand.vmem [shape: bf16[32,64], index: 1, kind: input, shape index: {}]   ;;  %s175_s0 = inlined_call_operand.vmem [shape: bf16[16,32], index: 0, kind: input, shape index: {}]   ;;  %s176_s2 = inlined_call_operand.vmem [shape: bf16[16,64], index: 2, kind: output, shape index: {}]  }
   0x1   :  { %125 = vmatprep.subr.bf16.mxu0 %v138_v0  ;;  %v135_v1 = vld [vmem:[%s174_s1] sm:$0xff]   ;;  %129 = vmatprep.mubr.msk.bf16.mxu0 %vm139_vm1, %v138_v0  ;;  %17 = vst.msk [vmem:[#allocation2] sm:$0xff] %vm16_vm0, %v138_v0  ;;  %18 = vst.msk [vmem:[#allocation2 + $0x8] sm:$0xff] %vm16_vm0, %v138_v0  ;;  %v136_v2 = vld [vmem:[%s174_s1 + $0x8] sm:$0xff]   ;;  %vm107_vm3 = vcmask 519168  }
   0x2   :  { %126 = vmatpush3.bf16.msra.mxu0 %v135_v1  ;;  %v137_v3 = vld [vmem:[%s175_s0] sm:$0xff]  }
   0x3   :  { %127 = vmatprep.subr.bf16.mxu0 %v138_v0 }
   0x6   :  { %128 = vmatpush3.bf16.msra.mxu0 %v136_v2 }
   0x8   :  { %v19_v4 = vld [vmem:[#allocation2] sm:$0xff]  ;;  %v20_v6 = vld [vmem:[#allocation2 + $0x8] sm:$0xff] }
   0x9   :  { %130 = vmatmul.mubr.msk.bf16.vlgmr.msra.gmra.mrb[0].mxu0 %vm44_vm2, %v137_v3 }
  0xdc   :  { %v82_v5 = vpop.f32.mrb[0].mxu0 }
  0xdd   :  { %v89_v7 = vadd.f32 %v82_v5, %v19_v4  ;;  %v131_v8 = vpop.f32.mrb[1].mxu0 }
  0xde   :  { %v85_v9 = vpop.f32.mrb[2].mxu0 }
  0xdf   :  { %92 = vst.msk [vmem:[#allocation2] sm:$0xff] %vm16_vm0, %v89_v7  ;;  %v90_v10 = vadd.f32 %v85_v9, %v20_v6  ;;  %v132_v11 = vpop.f32.mrb[3].mxu0 }
  0xe1   :  { %93 = vst.msk [vmem:[#allocation2 + $0x8] sm:$0xff] %vm16_vm0, %v90_v10 }
  0xe6   :  { %v97_v12 = vld [vmem:[#allocation2] sm:$0xff] }
  0xe7   :  { %v120_v13 = vpack.c.bf16 %v97_v12, %v97_v12 }
  0xe8   :  { %v98_v14 = vld [vmem:[#allocation2 + $0x8] sm:$0xff] }
  0xe9   :  { %108 = vst.msk [vmem:[%s176_s2] sm:$0xf] %vm107_vm3, %v120_v13  ;;  %v121_v15 = vpack.c.bf16 %v98_v14, %v98_v14 }
  0xeb   :  { %109 = vst.msk [vmem:[%s176_s2 + $0x4] sm:$0xf] %vm107_vm3, %v121_v15 }

// kernel: llama_decoder_layer.12
= control target key start
LH: loop header
LB: loop body
LE: loop exit
PB: predicated region body
PF: predicated region fallthrough
CT: control target
= control target key end

     0   :  { %vm16_vm0 = vcmask 261120   ;;  %v139_v0 = vmov 0.0   ;;  %vm140_vm1 = vmmov 0   ;;  %vm108_vm2 = vcmask 257024   ;;  %s176_s1 = inlined_call_operand.vmem [shape: bf16[32,32], index: 1, kind: input, shape index: {}]   ;;  %s177_s0 = inlined_call_operand.vmem [shape: bf16[16,32], index: 0, kind: input, shape index: {}]   ;;  %s178_s2 = inlined_call_operand.vmem [shape: bf16[16,32], index: 2, kind: output, shape index: {}]  }
   0x1   :  { %126 = vmatprep.subr.bf16.mxu0 %v139_v0  ;;  %v136_v1 = vld [vmem:[%s176_s1] sm:$0xff]   ;;  %130 = vmatprep.mubr.msk.bf16.mxu0 %vm140_vm1, %v139_v0  ;;  %17 = vst.msk [vmem:[#allocation2] sm:$0xff] %vm16_vm0, %v139_v0  ;;  %18 = vst.msk [vmem:[#allocation2 + $0x8] sm:$0xff] %vm16_vm0, %v139_v0  ;;  %v137_v2 = vld [vmem:[%s176_s1 + $0x8] sm:$0xff]  }
   0x2   :  { %127 = vmatpush3.bf16.msra.mxu0 %v136_v1  ;;  %v138_v3 = vld [vmem:[%s177_s0] sm:$0xff]  }
   0x3   :  { %128 = vmatprep.subr.bf16.mxu0 %v139_v0 }
   0x6   :  { %129 = vmatpush3.bf16.msra.mxu0 %v137_v2 }
   0x8   :  { %v19_v4 = vld [vmem:[#allocation2] sm:$0xff]  ;;  %v20_v6 = vld [vmem:[#allocation2 + $0x8] sm:$0xff] }
   0x9   :  { %131 = vmatmul.mubr.msk.bf16.vlgmr.msra.gmra.mrb[0].mxu0 %vm16_vm0, %v138_v3 }
  0xdc   :  { %v82_v5 = vpop.f32.mrb[0].mxu0 }
  0xdd   :  { %v89_v7 = vadd.f32 %v82_v5, %v19_v4  ;;  %v132_v8 = vpop.f32.mrb[1].mxu0 }
  0xde   :  { %v85_v9 = vpop.f32.mrb[2].mxu0 }
  0xdf   :  { %91 = vst.msk [vmem:[#allocation2] sm:$0xff] %vm16_vm0, %v89_v7  ;;  %v90_v10 = vadd.f32 %v85_v9, %v20_v6  ;;  %v133_v11 = vpop.f32.mrb[3].mxu0 }
  0xe1   :  { %92 = vst.msk [vmem:[#allocation2 + $0x8] sm:$0xff] %vm16_vm0, %v90_v10 }
  0xe6   :  { %v96_v12 = vld [vmem:[#allocation2] sm:$0xff] }
  0xe7   :  { %v98_v13 = vmul.f32 0.98994946, %v96_v12 }
  0xe8   :  { %v97_v14 = vld [vmem:[#allocation2 + $0x8] sm:$0xff] }
  0xe9   :  { %v121_v15 = vpack.c.bf16 %v98_v13, %v98_v13  ;;  %v99_v16 = vmul.f32 0.98994946, %v97_v14 }
  0xeb   :  { %109 = vst.msk [vmem:[%s178_s2] sm:$0xf] %vm108_vm2, %v121_v15  ;;  %v122_v17 = vpack.c.bf16 %v99_v16, %v99_v16 }
  0xed   :  { %110 = vst.msk [vmem:[%s178_s2 + $0x4] sm:$0xf] %vm108_vm2, %v122_v17 }

// kernel: llama_decoder_layer.10
= control target key start
LH: loop header
LB: loop body
LE: loop exit
PB: predicated region body
PF: predicated region fallthrough
CT: control target
= control target key end

     0   :  { %s1734_s24 = smov 0   ;;  %s1736_s25 = smov 0   ;;  %s2334_s0 = inlined_call_operand.vmem [shape: bf16[2,8,8,8], index: 0, kind: input, shape index: {}]   ;;  %s2335_s1 = inlined_call_operand.vmem [shape: f32[2,8,4], index: 1, kind: input, shape index: {}]   ;;  %s2336_s2 = inlined_call_operand.vmem [shape: f32[2,8,4], index: 2, kind: input, shape index: {}]   ;;  %s2337_s3 = inlined_call_operand.vmem [shape: bf16[1,8], index: 3, kind: input, shape index: {}]   ;;  %s2338_s4 = inlined_call_operand.vmem [shape: bf16[1,8], index: 4, kind: input, shape index: {}]   ;;  %s2339_s5 = inlined_call_operand.vmem [shape: bf16[2,8,4,8], index: 5, kind: output, shape index: {0}]   ;;  %s2340_s6 = inlined_call_operand.vmem [shape: bf16[2,8,2,8], index: 6, kind: output, shape index: {1}]   ;;  %s2341_s7 = inlined_call_operand.vmem [shape: bf16[2,8,2,8], index: 7, kind: output, shape index: {2}]  }
   0x1   :  { %s1738_s26 = smov 0  }
   0x2 LB: > { %s30_s27 = sadd.s32 1, %s1685_s25  ;;  %p1594_p0 = scmp.ge.s32.totalorder %s1689_s26, 1  ;;  %s1689_s26 = sphi %s1738_s26, %s18_s26   ;;  %s1685_s25 = sphi %s1736_s25, %s2343_s25   ;;  %s1681_s24 = sphi %s1734_s24, %s2342_s24  }
   0x3   : > { %p32_p1 = scmp.ge.s32.totalorder %s30_s27, 2  ;;  %p295_p2 = scmp.lt.s32.totalorder %s1689_s26, 3 }
   0x5   : > { %s2345_s27 = smov (%p32_p1, %s30_s27), 0  ;;  %p296_p3 = pnand %p1594_p0, %p295_p2 }
   0x6   : > { %p366_p4 = scmp.lt.s32.totalorder (!%p296_p3), %s1681_s24, 1  ;;  %v501_v0 = vlaneseq (!%p296_p3)  ;;  %v1691_v1 = vmov (!%p296_p3), 1966171168   ;;  %vm513_vm0 = vcmask (!%p296_p3), 62468   ;;  %vm1224_vm1 = vcmask (!%p296_p3), 57344   ;;  %s1692_s19 = smov (!%p296_p3), 4  }
   0x7   : > { %299 = sbr.rel (%p296_p3) target bundleno = 387 (0x183), region = 40  ;;  %v588_v2 = vunpack.c.l.s4 (!%p296_p3), %v1691_v1  ;;  %vm441_vm2 = vcmask (!%p296_p3), 60416   ;;  %vm926_vm3 = vcmask (!%p296_p3), 31744   ;;  %vm1071_vm4 = vcmask (!%p296_p3), 58368  }
   0x8   : > { %v1754_v3 = vshrl.u32 (!%p296_p3), %v501_v0, 7 }
   0x9   : > { %v589_v4 = vunpack.c.0.s8 (!%p296_p3), %v588_v2 }
   0xb   : > { %v1763_v5 = vsub.s32 (!%p296_p3), %v589_v4, %v1754_v3 }
   0xe   : > { %s2347_s24 = smov (!%p366_p4, %s1681_s24), 1 }
   0xf   : > { %s1605_s28 = sshll.u32 %s2347_s24, 5  ;;  %s1806_s9 = sshll.u32 %s2347_s24, 3 }
  0x10   : > { %s1760_s8 = scalar_lea.vmem %s2334_s0, %s1605_s28  ;;  %s1819_s12 = scalar_lea.vmem %s2341_s7, %s1806_s9 }
  0x11   : > { %v419_v6 = vld [vmem:[%s1760_s8 + $0x8] sm:$0xf]  ;;  %v417_v7 = vld [vmem:[%s1760_s8] sm:$0xf]  ;;  %v420_v8 = vld [vmem:[%s1760_s8 + $0xc] sm:$0xf]  ;;  %s388_s15 = scalar_lea.vmem %s2336_s2, %s1806_s9  ;;  %s381_s18 = scalar_lea.vmem %s2335_s1, %s1806_s9 }
  0x12   : > { %v1768_v9 = vunpack.c.l.bf16 %v419_v6  ;;  %v1279_v10 = vrot.slane %v419_v6, %v1763_v5  ;;  %v1771_v11 = vunpack.c.l.bf16 %v417_v7  ;;  %v1247_v12 = vrot.slane %v417_v7, %v1763_v5  ;;  %v418_v13 = vld [vmem:[%s1760_s8 + $0x4] sm:$0xf]  ;;  %v422_v26 = vld [vmem:[%s1760_s8 + $0x14] sm:$0xf]  ;;  %v421_v31 = vld [vmem:[%s1760_s8 + $0x10] sm:$0xf] }
  0x13   : > { %v1775_v14 = vunpack.c.l.bf16 %v420_v8  ;;  %v1295_v15 = vrot.slane %v420_v8, %v1763_v5  ;;  %v1778_v16 = vunpack.c.l.bf16 %v418_v13  ;;  %v1263_v17 = vrot.slane %v418_v13, %v1763_v5  ;;  %v424_v36 = vld [vmem:[%s1760_s8 + $0x1c] sm:$0xf]  ;;  %v423_v41 = vld [vmem:[%s1760_s8 + $0x18] sm:$0xf]  ;;  %s1693_s28 = smov 124   ;;  %s2199_s8 = scalar_lea.vmem %s2340_s6, %s1806_s9 }
  0x14   : > { %v1783_v18 = vmul.f32 %v1768_v9, %v1768_v9  ;;  %v1280_v19 = vcombine.high %v1279_v10, %v1279_v10  ;;  %v1787_v20 = vmul.f32 %v1771_v11, %v1771_v11  ;;  %v1248_v21 = vcombine.high %v1247_v12, %v1247_v12  ;;  %s1606_s9 = sshll.u32 %s2347_s24, 4 }
  0x15   : > { %v1791_v22 = vmul.f32 %v1775_v14, %v1775_v14  ;;  %v1296_v23 = vcombine.high %v1295_v15, %v1295_v15  ;;  %v1795_v24 = vmul.f32 %v1778_v16, %v1778_v16  ;;  %v1264_v25 = vcombine.high %v1263_v17, %v1263_v17  ;;  %s2281_s11 = scalar_lea.vmem %s2339_s5, %s1606_s9 }
  0x16   : > { %v520_v27 = vsel %vm513_vm0, %v1783_v18, 0.0  ;;  %v1287_v28 = vrot.slane %v1280_v19, %v1763_v5  ;;  %v514_v29 = vsel %vm513_vm0, %v1787_v20, 0.0  ;;  %v1255_v30 = vrot.slane %v1248_v21, %v1763_v5  ;;  %v635_v21 = vld [vmem:[%s388_s15] sm:$0xff] }
  0x17   : > { %521 = vadd.xlane.f32.xlu1 %v520_v27  ;;  %515 = vadd.xlane.f32.xlu0 %v514_v29  ;;  %v523_v32 = vsel %vm513_vm0, %v1791_v22, 0.0  ;;  %v1303_v33 = vrot.slane %v1296_v23, %v1763_v5  ;;  %v517_v34 = vsel %vm513_vm0, %v1795_v24, 0.0  ;;  %v1271_v35 = vrot.slane %v1264_v25, %v1763_v5 }
  0x18   : > { %v1288_v37 = vcombine.high %v1287_v28, %v1287_v28  ;;  %v1256_v38 = vcombine.high %v1255_v30, %v1255_v30  ;;  %v1821_v39 = vunpack.c.l.bf16 %v422_v26  ;;  %v1327_v40 = vrot.slane %v422_v26, %v1763_v5  ;;  %v584_v30 = vld [vmem:[%s381_s18] sm:$0xff] }
  0x19   : > { %v1304_v42 = vcombine.high %v1303_v33, %v1303_v33  ;;  %v1272_v43 = vcombine.high %v1271_v35, %v1271_v35  ;;  %v1825_v44 = vunpack.c.l.bf16 %v421_v31  ;;  %v1311_v45 = vrot.slane %v421_v31, %v1763_v5 }
  0x1a   : > { %v438_v46 = vmul.f32 %v1821_v39, %v1821_v39  ;;  %v1328_v47 = vcombine.high %v1327_v40, %v1327_v40  ;;  %v1830_v48 = vunpack.c.l.bf16 %v424_v36  ;;  %v1359_v49 = vrot.slane %v424_v36, %v1763_v5  ;;  %1379 = vst.msk [vmem:[%s1819_s12 + $0x2] sm:$0x1] %vm1224_vm1, %v1288_v37  ;;  %1377 = vst.msk [vmem:[%s1819_s12] sm:$0x1] %vm1224_vm1, %v1256_v38 }
  0x1b   : > { %524 = vadd.xlane.f32.xlu1 %v523_v32  ;;  %518 = vadd.xlane.f32.xlu0 %v517_v34  ;;  %v437_v50 = vmul.f32 %v1825_v44, %v1825_v44  ;;  %v1312_v51 = vcombine.high %v1311_v45, %v1311_v45  ;;  %v1839_v52 = vunpack.c.l.bf16 %v423_v41  ;;  %v1343_v53 = vrot.slane %v423_v41, %v1763_v5 }
  0x1c   : > { %1378 = vst.msk [vmem:[%s1819_s12 + $0x1] sm:$0x1] %vm1224_vm1, %v1272_v43  ;;  %1380 = vst.msk [vmem:[%s1819_s12 + $0x3] sm:$0x1] %vm1224_vm1, %v1304_v42  ;;  %v529_v54 = vsel %vm513_vm0, %v438_v46, 0.0  ;;  %v1335_v55 = vrot.slane %v1328_v47, %v1763_v5  ;;  %v440_v56 = vmul.f32 %v1830_v48, %v1830_v48  ;;  %v1360_v57 = vcombine.high %v1359_v49, %v1359_v49 }
  0x1d   : > { %v526_v58 = vsel %vm513_vm0, %v437_v50, 0.0  ;;  %v1319_v59 = vrot.slane %v1312_v51, %v1763_v5  ;;  %v439_v60 = vmul.f32 %v1839_v52, %v1839_v52  ;;  %v1344_v61 = vcombine.high %v1343_v53, %v1343_v53 }
  0x1e   : > { %v1336_v62 = vcombine.high %v1335_v55, %v1335_v55  ;;  %v1367_v63 = vrot.slane %v1360_v57, %v1763_v5  ;;  %v535_v2 = vsel %vm513_vm0, %v440_v56, 0.0  ;;  %v445_v8 = vsel %vm441_vm2, %v1795_v24, 0.0 }
  0x1f   : > { %530 = vadd.xlane.f32.xlu1 %v529_v54  ;;  %v1320_v0 = vcombine.high %v1319_v59, %v1319_v59  ;;  %527 = vadd.xlane.f32.xlu0 %v526_v58  ;;  %v1351_v1 = vrot.slane %v1344_v61, %v1763_v5  ;;  %v532_v6 = vsel %vm513_vm0, %v439_v60, 0.0  ;;  %v442_v10 = vsel %vm441_vm2, %v1787_v20, 0.0 }
  0x20   : > { %v1368_v4 = vcombine.high %v1367_v63, %v1367_v63  ;;  %1382 = vst.msk [vmem:[%s1819_s12 + $0x5] sm:$0x1] %vm1224_vm1, %v1336_v62  ;;  %v451_v12 = vsel %vm441_vm2, %v1791_v22, 0.0  ;;  %v448_v13 = vsel %vm441_vm2, %v1783_v18, 0.0  ;;  %v457_v15 = vsel %vm441_vm2, %v438_v46, 0.0 }
  0x21   : > { %v1352_v7 = vcombine.high %v1351_v1, %v1351_v1  ;;  %1381 = vst.msk [vmem:[%s1819_s12 + $0x4] sm:$0x1] %vm1224_vm1, %v1320_v0  ;;  %v454_v17 = vsel %vm441_vm2, %v437_v50, 0.0  ;;  %v463_v19 = vsel %vm441_vm2, %v440_v56, 0.0  ;;  %v460_v20 = vsel %vm441_vm2, %v439_v60, 0.0 }
  0x22   : > { %1384 = vst.msk [vmem:[%s1819_s12 + $0x7] sm:$0x1] %vm1224_vm1, %v1368_v4  ;;  %v644_v18 = vrot.slane %v635_v21, %v1763_v5  ;;  %v1884_v23 = vsub.s32 0, %v1754_v3  ;;  %v637_v25 = vcombine.high %v635_v21, %v635_v21  ;;  %v593_v35 = vrot.slane %v584_v30, %v1763_v5 }
  0x23   : > { %536 = vadd.xlane.f32.xlu1 %v535_v2  ;;  %533 = vadd.xlane.f32.xlu0 %v532_v6  ;;  %1383 = vst.msk [vmem:[%s1819_s12 + $0x6] sm:$0x1] %vm1224_vm1, %v1352_v7  ;;  %v586_v42 = vcombine.high %v584_v30, %v584_v30 }
  0x24   : > { %v652_v22 = vcombine.high %v644_v18, %v644_v18  ;;  %v660_v26 = vrot.slane %v644_v18, %v1763_v5  ;;  %v651_v29 = vrot.slane %v637_v25, %v1763_v5  ;;  %v601_v41 = vcombine.high %v593_v35, %v593_v35 }
  0x25   : > { %v600_v49 = vrot.slane %v586_v42, %v1763_v5  ;;  %v609_v51 = vrot.slane %v593_v35, %v1763_v5 }
  0x26   : > { %v674_v24 = vrot.slane %v652_v22, %v1763_v5  ;;  %v682_v28 = vcombine.high %v660_v26, %v660_v26  ;;  %v653_v32 = vcombine.high %v651_v29, %v651_v29  ;;  %v1902_v33 = vrot.slane %v660_v26, %v1884_v23 }
  0x27   : > { %446 = vadd.xlane.f32.xlu1 %v445_v8  ;;  %443 = vadd.xlane.f32.xlu0 %v442_v10  ;;  %v667_v34 = vrot.slane %v651_v29, %v1763_v5  ;;  %v623_v47 = vrot.slane %v601_v41, %v1763_v5  ;;  %v602_v55 = vcombine.high %v600_v49, %v600_v49 }
  0x28   : > { %v1893_v27 = vrot.slane %v674_v24, %v1884_v23  ;;  %v1899_v3 = vrot.slane %v682_v28, %v1884_v23  ;;  %v684_v31 = vcombine.high %v674_v24, %v674_v24  ;;  %v681_v37 = vrot.slane %v653_v32, %v1763_v5 }
  0x29   : > { %v1915_v38 = vrot.slane %v667_v34, %v1884_v23  ;;  %v683_v40 = vcombine.high %v667_v34, %v667_v34  ;;  %v1938_v53 = vrot.slane %v623_v47, %v1884_v23  ;;  %v633_v54 = vcombine.high %v623_v47, %v623_v47 }
  0x2a   : > { %v1909_v36 = vrot.slane %v684_v31, %v1884_v23  ;;  %v1920_v43 = vrot.slane %v681_v37, %v1884_v23  ;;  %v685_v45 = vcombine.high %v681_v37, %v681_v37  ;;  %v1943_v56 = vrot.slane %v609_v51, %v1884_v23 }
  0x2b   : > { %452 = vadd.xlane.f32.xlu1 %v451_v12  ;;  %449 = vadd.xlane.f32.xlu0 %v448_v13  ;;  %v1925_v46 = vrot.slane %v683_v40, %v1884_v23  ;;  %v631_v57 = vcombine.high %v609_v51, %v609_v51  ;;  %v1948_v58 = vrot.slane %v633_v54, %v1884_v23  ;;  %v499_v40 = vld [vmem:[%s2337_s3] sm:$0x1] }
  0x2c   : > { %v1932_v50 = vrot.slane %v685_v45, %v1884_v23  ;;  %v630_v59 = vrot.slane %v602_v55, %v1763_v5  ;;  %v616_v61 = vrot.slane %v600_v49, %v1763_v5  ;;  %v500_v55 = vunpack.c.l.bf16 %v499_v40 }
  0x2d   : > { %v1954_v60 = vrot.slane %v631_v57, %v1884_v23 }
  0x2e   : > { %v1960_v62 = vrot.slane %v630_v59, %v1884_v23  ;;  %v634_v63 = vcombine.high %v630_v59, %v630_v59  ;;  %v1965_v0 = vrot.slane %v616_v61, %v1884_v23  ;;  %v632_v1 = vcombine.high %v616_v61, %v616_v61 }
  0x2f   : > { %458 = vadd.xlane.f32.xlu1 %v457_v15  ;;  %455 = vadd.xlane.f32.xlu0 %v454_v17 }
  0x30   : > { %v1970_v2 = vrot.slane %v634_v63, %v1884_v23  ;;  %v1975_v4 = vrot.slane %v632_v1, %v1884_v23 }
  0x33   : > { %464 = vadd.xlane.f32.xlu1 %v463_v19  ;;  %461 = vadd.xlane.f32.xlu0 %v460_v20 }
  0x44   : > { %776 = vrot.lane.b32.xlu1 %v1893_v27, %s1692_s19 }
  0x48   : > { %778 = vrot.lane.b32.xlu1 %v1899_v3, %s1692_s19 }
  0x49   : > { %774 = vrot.lane.b32.xlu0 %v1902_v33, %s1692_s19 }
  0x4c   : > { %780 = vrot.lane.b32.xlu1 %v1909_v36, %s1692_s19 }
  0x4d   : > { %782 = vrot.lane.b32.xlu0 %v1915_v38, %s1692_s19 }
  0x50   : > { %784 = vrot.lane.b32.xlu1 %v1920_v43, %s1692_s19 }
  0x51   : > { %786 = vrot.lane.b32.xlu0 %v1925_v46, %s1692_s19 }
  0x54   : > { %788 = vrot.lane.b32.xlu1 %v1932_v50, %s1692_s19 }
  0x55   : > { %848 = vrot.lane.b32.xlu0 %v1938_v53, %s1692_s19 }
  0x58   : > { %846 = vrot.lane.b32.xlu1 %v1943_v56, %s1692_s19 }
  0x59   : > { %852 = vrot.lane.b32.xlu0 %v1948_v58, %s1692_s19 }
  0x5c   : > { %850 = vrot.lane.b32.xlu1 %v1954_v60, %s1692_s19 }
  0x5d   : > { %856 = vrot.lane.b32.xlu0 %v1960_v62, %s1692_s19 }
  0x60   : > { %854 = vrot.lane.b32.xlu1 %v1965_v0, %s1692_s19 }
  0x61   : > { %860 = vrot.lane.b32.xlu0 %v1970_v2, %s1692_s19 }
  0x64   : > { %858 = vrot.lane.b32.xlu1 %v1975_v4, %s1692_s19 }
  0xa4   : > { %v522_v6 = vpop.xlane.xlu1 %521  ;;  %v516_v7 = vpop.xlane.xlu0 %515 }
  0xa5   : > { %v538_v19 = vmul.f32 0.125, %v516_v7  ;;  %v540_v26 = vmul.f32 0.125, %v522_v6 }
  0xa7   : > { %v546_v28 = vadd.f32 1e-06, %v538_v19  ;;  %v548_v41 = vadd.f32 1e-06, %v540_v26 }
  0xa8   : > { %v525_v8 = vpop.xlane.xlu1 %524  ;;  %v519_v10 = vpop.xlane.xlu0 %518 }
  0xa9   : > { %v539_v31 = vmul.f32 0.125, %v519_v10  ;;  %v541_v47 = vmul.f32 0.125, %v525_v8  ;;  %v1991_v8 = vrot.slane %v500_v55, %v1884_v23 }
  0xab   : > { %v547_v49 = vadd.f32 1e-06, %v539_v31  ;;  %v549_v61 = vadd.f32 1e-06, %v541_v47 }
  0xac   : > { %v531_v12 = vpop.xlane.xlu1 %530  ;;  %v528_v13 = vpop.xlane.xlu0 %527 }
  0xad   : > { %v542_v54 = vmul.f32 0.125, %v528_v13  ;;  %v543_v63 = vmul.f32 0.125, %v531_v12 }
  0xaf   : > { %v550_v1 = vadd.f32 1e-06, %v542_v54 }
  0xb0   : > { %v537_v15 = vpop.xlane.xlu1 %536  ;;  %v534_v17 = vpop.xlane.xlu0 %533 }
  0xb1   : > { %v544_v6 = vmul.f32 0.125, %v534_v17 }
  0xb4   : > { %v447_v20 = vpop.xlane.xlu1 %446  ;;  %v444_v21 = vpop.xlane.xlu0 %443 }
  0xb5   : > { %v468_v18 = vmul.f32 0.125, %v447_v20  ;;  %v467_v22 = vmul.f32 0.125, %v444_v21  ;;  %v570_v20 = vld [vmem:[%s2338_s4] sm:$0x1] }
  0xb7   : > { %v476_v24 = vadd.f32 1e-06, %v468_v18  ;;  %v475_v25 = vadd.f32 1e-06, %v467_v22  ;;  %v551_v18 = vadd.f32 1e-06, %v543_v63 }
  0xb8   : > { %v453_v29 = vpop.xlane.xlu1 %452  ;;  %v450_v30 = vpop.xlane.xlu0 %449  ;;  %v545_v22 = vmul.f32 0.125, %v537_v15 }
  0xb9   : > { %1635 = vrsqrt.f32 %v476_v24  ;;  %v470_v32 = vmul.f32 0.125, %v453_v29  ;;  %v469_v34 = vmul.f32 0.125, %v450_v30  ;;  %v552_v24 = vadd.f32 1e-06, %v544_v6 }
  0xba   : > { %1637 = vrsqrt.f32 %v475_v25 }
  0xbb   : > { %v478_v35 = vadd.f32 1e-06, %v470_v32  ;;  %v477_v37 = vadd.f32 1e-06, %v469_v34  ;;  %1639 = vrsqrt.f32 %v546_v28  ;;  %v571_v28 = vunpack.c.l.bf16 %v570_v20 }
  0xbc   : > { %v1984_v42 = vpop.xlane.xlu1 %458  ;;  %v456_v45 = vpop.xlane.xlu0 %455 }
  0xbd   : > { %1641 = vrsqrt.f32 %v478_v35  ;;  %v471_v51 = vmul.f32 0.125, %v456_v45 }
  0xbe   : > { %1643 = vrsqrt.f32 %v477_v37 }
  0xbf   : > { %v479_v57 = vadd.f32 1e-06, %v471_v51  ;;  %1645 = vrsqrt.f32 %v548_v41  ;;  %v553_v41 = vadd.f32 1e-06, %v545_v22 }
  0xc0   : > { %v1986_v59 = vpop.xlane.xlu1 %464  ;;  %1647 = vrsqrt.f32 %v547_v49  ;;  %v1988_v7 = vpop.xlane.xlu0 %461  ;;  %v575_v49 = vrot.slane %v571_v28, %v1884_v23  ;;  %v472_v28 = vmul.f32 0.125, %v1984_v42 }
  0xc1   : > { %1649 = vrsqrt.f32 %v479_v57 }
  0xc2   : > { %1651 = vrsqrt.f32 %v549_v61  ;;  %v480_v42 = vadd.f32 1e-06, %v472_v28 }
  0xc3   : > { %v1636_v10 = vpop.eup %1635  ;;  %1653 = vrsqrt.f32 %v550_v1 }
  0xc4   : > { %v1638_v19 = vpop.eup %1637  ;;  %v492_v13 = vmul.f32 %v1636_v10, %v1778_v16  ;;  %v777_v21 = vpop.permute.xlu1 %776  ;;  %1655 = vrsqrt.f32 %v551_v18 }
  0xc5   : > { %v491_v12 = vmul.f32 %v1638_v19, %v1771_v11  ;;  %v1640_v17 = vpop.eup %1639  ;;  %v775_v32 = vpop.permute.xlu0 %774  ;;  %1657 = vrsqrt.f32 %v552_v24 }
  0xc6   : > { %v1999_v25 = vmul.f32 %v1991_v8, %v492_v13  ;;  %v562_v51 = vmul.f32 %v1640_v17, %v1771_v11  ;;  %1659 = vrsqrt.f32 %v553_v41 }
  0xc7   : > { %v1642_v26 = vpop.eup %1641  ;;  %v2002_v29 = vmul.f32 %v1991_v8, %v491_v12  ;;  %1661 = vrsqrt.f32 %v480_v42 }
  0xc8   : > { %v1644_v30 = vpop.eup %1643  ;;  %v799_v31 = vmul.f32 %v777_v21, %v1999_v25  ;;  %v779_v34 = vpop.permute.xlu1 %778  ;;  %v494_v35 = vmul.f32 %v1642_v26, %v1775_v14  ;;  %v2023_v11 = vmul.f32 %v575_v49, %v562_v51 }
  0xc9   : > { %v798_v37 = vmul.f32 %v775_v32, %v2002_v29  ;;  %v493_v15 = vmul.f32 %v1644_v30, %v1768_v9  ;;  %v1646_v40 = vpop.eup %1645  ;;  %v783_v20 = vpop.permute.xlu0 %782  ;;  %v878_v42 = vmul.f32 %v1902_v33, %v2002_v29 }
  0xca   : > { %816 = vrot.lane.b32.xlu1 %v799_v31, %s1693_s28  ;;  %v2010_v45 = vmul.f32 %v1991_v8, %v494_v35  ;;  %v1648_v47 = vpop.eup %1647  ;;  %v564_v6 = vmul.f32 %v1646_v40, %v1768_v9  ;;  %v951_v18 = vmul.f32 %v775_v32, %v2023_v11 }
  0xcb   : > { %v2015_v54 = vmul.f32 %v1991_v8, %v493_v15  ;;  %814 = vrot.lane.b32.xlu0 %v798_v37, %s1693_s28  ;;  %v1650_v55 = vpop.eup %1649  ;;  %v563_v23 = vmul.f32 %v1648_v47, %v1778_v16 }
  0xcc   : > { %v781_v57 = vpop.permute.xlu1 %780  ;;  %v495_v63 = vmul.f32 %v1650_v55, %v1825_v44  ;;  %v1652_v10 = vpop.eup %1651  ;;  %v2035_v16 = vmul.f32 %v575_v49, %v564_v6 }
  0xcd   : > { %v800_v61 = vmul.f32 %v779_v34, %v2015_v54  ;;  %v801_v1 = vmul.f32 %v781_v57, %v2010_v45  ;;  %v1654_v13 = vpop.eup %1653  ;;  %v565_v9 = vmul.f32 %v1652_v10, %v1775_v14  ;;  %v2033_v22 = vmul.f32 %v575_v49, %v563_v23 }
  0xce   : > { %v2026_v19 = vmul.f32 %v1991_v8, %v495_v63  ;;  %v1656_v17 = vpop.eup %1655  ;;  %v566_v24 = vmul.f32 %v1654_v13, %v1825_v44  ;;  %v953_v31 = vmul.f32 %v779_v34, %v2035_v16  ;;  %v474_v14 = vmul.f32 0.125, %v1986_v59  ;;  %v787_v59 = vpop.permute.xlu0 %786 }
  0xcf   : > { %818 = vrot.lane.b32.xlu0 %v800_v61, %s1693_s28  ;;  %820 = vrot.lane.b32.xlu1 %v801_v1, %s1693_s28  ;;  %v1658_v26 = vpop.eup %1657  ;;  %v952_v30 = vmul.f32 %v777_v21, %v2033_v22  ;;  %v2043_v32 = vmul.f32 %v575_v49, %v565_v9  ;;  %v567_v44 = vmul.f32 %v1656_v17, %v1821_v39  ;;  %v473_v21 = vmul.f32 0.125, %v1988_v7 }
  0xd0   : > { %v802_v12 = vmul.f32 %v783_v20, %v2026_v19  ;;  %v2046_v35 = vmul.f32 %v575_v49, %v566_v24  ;;  %v568_v37 = vmul.f32 %v1658_v26, %v1839_v52  ;;  %v1660_v15 = vpop.eup %1659  ;;  %v785_v40 = vpop.permute.xlu1 %784  ;;  %v482_v47 = vadd.f32 1e-06, %v474_v14 }
  0xd1   : > { %v954_v41 = vmul.f32 %v781_v57, %v2043_v32  ;;  %v2057_v55 = vmul.f32 %v575_v49, %v567_v44  ;;  %v569_v61 = vmul.f32 %v1660_v15, %v1830_v48  ;;  %v481_v63 = vadd.f32 1e-06, %v473_v21 }
  0xd2   : > { %v955_v34 = vmul.f32 %v783_v20, %v2046_v35  ;;  %v2055_v51 = vmul.f32 %v575_v49, %v568_v37  ;;  %1663 = vrsqrt.f32 %v482_v47  ;;  %v1007_v23 = vmul.f32 %v1902_v33, %v2023_v11  ;;  %v1662_v20 = vpop.eup %1661 }
  0xd3   : > { %822 = vrot.lane.b32.xlu0 %v802_v12, %s1693_s28  ;;  %967 = vrot.lane.b32.xlu1 %v951_v18, %s1693_s28  ;;  %v956_v1 = vmul.f32 %v785_v40, %v2057_v55  ;;  %v2064_v57 = vmul.f32 %v575_v49, %v569_v61  ;;  %1665 = vrsqrt.f32 %v481_v63  ;;  %v1008_v13 = vmul.f32 %v1893_v27, %v2033_v22 }
  0xd4   : > { %v957_v7 = vmul.f32 %v787_v59, %v2055_v51  ;;  %v789_v6 = vpop.permute.xlu1 %788  ;;  %v1009_v49 = vmul.f32 %v1899_v3, %v2035_v16  ;;  %v496_v12 = vmul.f32 %v1662_v20, %v1821_v39  ;;  %v1010_v9 = vmul.f32 %v1909_v36, %v2043_v32 }
  0xd5   : > { %v958_v10 = vmul.f32 %v789_v6, %v2064_v57  ;;  %v1011_v17 = vmul.f32 %v1915_v38, %v2046_v35  ;;  %v1012_v26 = vmul.f32 %v1920_v43, %v2057_v55  ;;  %v880_v21 = vmul.f32 %v1899_v3, %v2015_v54 }
  0xd6   : > { %v882_v33 = vmul.f32 %v1915_v38, %v2026_v19  ;;  %v2138_v38 = vpop.permute.xlu0 %848 }
  0xd7   : > { %969 = vrot.lane.b32.xlu0 %v952_v30, %s1693_s28  ;;  %971 = vrot.lane.b32.xlu1 %v953_v31, %s1693_s28  ;;  %v2090_v30 = vmul.f32 %v1991_v8, %v496_v12  ;;  %v1013_v31 = vmul.f32 %v1925_v46, %v2055_v51 }
  0xd9   : > { %v803_v37 = vmul.f32 %v785_v40, %v2090_v30  ;;  %v881_v40 = vmul.f32 %v1909_v36, %v2010_v45 }
  0xdb   : > { %973 = vrot.lane.b32.xlu0 %v954_v41, %s1693_s28  ;;  %975 = vrot.lane.b32.xlu1 %v955_v34, %s1693_s28  ;;  %v2136_v34 = vpop.permute.xlu1 %846 }
  0xdc   : > { %v1664_v18 = vpop.eup %1663 }
  0xdd   : > { %v1666_v24 = vpop.eup %1665  ;;  %v498_v39 = vmul.f32 %v1664_v18, %v1830_v48 }
  0xde   : > { %v497_v28 = vmul.f32 %v1666_v24, %v1839_v52  ;;  %v1014_v52 = vmul.f32 %v1932_v50, %v2064_v57 }
  0xdf   : > { %977 = vrot.lane.b32.xlu0 %v956_v1, %s1693_s28  ;;  %979 = vrot.lane.b32.xlu1 %v957_v7, %s1693_s28  ;;  %v2102_v44 = vmul.f32 %v1991_v8, %v498_v39  ;;  %v2140_v41 = vpop.permute.xlu1 %850 }
  0xe0   : > { %v2098_v14 = vmul.f32 %v1991_v8, %v497_v28  ;;  %v879_v8 = vmul.f32 %v1893_v27, %v1999_v25  ;;  %v883_v27 = vmul.f32 %v1920_v43, %v2090_v30  ;;  %v2142_v43 = vpop.permute.xlu0 %852 }
  0xe1   : > { %v805_v15 = vmul.f32 %v789_v6, %v2102_v44  ;;  %v885_v36 = vmul.f32 %v1932_v50, %v2102_v44 }
  0xe2   : > { %v804_v48 = vmul.f32 %v787_v59, %v2098_v14  ;;  %v884_v3 = vmul.f32 %v1925_v46, %v2098_v14 }
  0xe3   : > { %981 = vrot.lane.b32.xlu0 %v958_v10, %s1693_s28  ;;  %1023 = vrot.lane.b32.xlu1 %v1007_v23, %s1692_s19  ;;  %v2144_v59 = vpop.permute.xlu1 %854 }
  0xe4   : > { %v2146_v47 = vpop.permute.xlu0 %856 }
  0xe7   : > { %1025 = vrot.lane.b32.xlu0 %v1008_v13, %s1692_s19  ;;  %1027 = vrot.lane.b32.xlu1 %v1009_v49, %s1692_s19  ;;  %v2148_v46 = vpop.permute.xlu1 %858 }
  0xe8   : > { %v2150_v61 = vpop.permute.xlu0 %860 }
  0xeb   : > { %1029 = vrot.lane.b32.xlu0 %v1010_v9, %s1692_s19  ;;  %1031 = vrot.lane.b32.xlu1 %v1011_v17, %s1692_s19  ;;  %v999_v9 = vmul.f32 %v2136_v34, %v2023_v11  ;;  %v943_v17 = vmul.f32 %v1943_v56, %v2023_v11 }
  0xef   : > { %1033 = vrot.lane.b32.xlu0 %v1012_v26, %s1692_s19  ;;  %1035 = vrot.lane.b32.xlu1 %v1013_v31, %s1692_s19  ;;  %v945_v31 = vmul.f32 %v1954_v60, %v2035_v16 }
  0xf3   : > { %1037 = vrot.lane.b32.xlu0 %v1014_v52, %s1692_s19  ;;  %824 = vrot.lane.b32.xlu1 %v803_v37, %s1693_s28  ;;  %v1000_v37 = vmul.f32 %v2138_v38, %v2033_v22  ;;  %v1001_v52 = vmul.f32 %v2140_v41, %v2035_v16 }
  0xf7   : > { %826 = vrot.lane.b32.xlu0 %v804_v48, %s1693_s28  ;;  %828 = vrot.lane.b32.xlu1 %v805_v15, %s1693_s28  ;;  %v944_v48 = vmul.f32 %v1938_v53, %v2033_v22  ;;  %v1002_v22 = vmul.f32 %v2142_v43, %v2043_v32 }
  0xfb   : > { %894 = vrot.lane.b32.xlu0 %v878_v42, %s1692_s19  ;;  %896 = vrot.lane.b32.xlu1 %v879_v8, %s1692_s19 }
  0xff   : > { %898 = vrot.lane.b32.xlu0 %v880_v21, %s1692_s19  ;;  %900 = vrot.lane.b32.xlu1 %v881_v40, %s1692_s19 }
 0x103   : > { %902 = vrot.lane.b32.xlu0 %v882_v33, %s1692_s19  ;;  %904 = vrot.lane.b32.xlu1 %v883_v27, %s1692_s19 }
 0x107   : > { %906 = vrot.lane.b32.xlu0 %v884_v3, %s1692_s19  ;;  %908 = vrot.lane.b32.xlu1 %v885_v36, %s1692_s19  ;;  %v946_v3 = vmul.f32 %v1948_v58, %v2043_v32  ;;  %v947_v36 = vmul.f32 %v1965_v0, %v2046_v35 }
 0x13c   : > { %v2152_v50 = vpop.permute.xlu1 %816 }
 0x13d   : > { %v2154_v63 = vpop.permute.xlu0 %814 }
 0x141   : > { %v2156_v7 = vpop.permute.xlu0 %818  ;;  %v2158_v1 = vpop.permute.xlu1 %820 }
 0x145   : > { %v2160_v6 = vpop.permute.xlu0 %822  ;;  %v968_v10 = vpop.permute.xlu1 %967 }
 0x146   : > { %v991_v28 = vsub.f32 %v943_v17, %v968_v10  ;;  %v1003_v10 = vmul.f32 %v2144_v59, %v2046_v35 }
 0x149   : > { %v970_v23 = vpop.permute.xlu0 %969  ;;  %v972_v13 = vpop.permute.xlu1 %971 }
 0x14a   : > { %v992_v21 = vsub.f32 %v944_v48, %v970_v23  ;;  %v993_v40 = vsub.f32 %v945_v31, %v972_v13  ;;  %v949_v48 = vmul.f32 %v1975_v4, %v2055_v51 }
 0x14d   : > { %v974_v49 = vpop.permute.xlu0 %973  ;;  %v976_v20 = vpop.permute.xlu1 %975 }
 0x14e   : > { %v994_v32 = vsub.f32 %v946_v3, %v974_v49  ;;  %v995_v35 = vsub.f32 %v947_v36, %v976_v20 }
 0x151   : > { %v2162_v18 = vpop.permute.xlu0 %977  ;;  %v2164_v12 = vpop.permute.xlu1 %979 }
 0x155   : > { %v2170_v24 = vpop.permute.xlu0 %981  ;;  %v1024_v26 = vpop.permute.xlu1 %1023 }
 0x156   : > { %v1047_v39 = vadd.f32 %v1024_v26, %v999_v9  ;;  %v948_v9 = vmul.f32 %v1960_v62, %v2057_v55 }
 0x158   : > { %v1055_v11 = vsel %vm926_vm3, %v991_v28, %v1047_v39 }
 0x159   : > { %v1080_v15 = vpack.c.bf16 %v1055_v11, %v1055_v11  ;;  %v1026_v42 = vpop.permute.xlu0 %1025  ;;  %v1028_v8 = vpop.permute.xlu1 %1027 }
 0x15a   : > { %v1048_v33 = vadd.f32 %v1026_v42, %v1000_v37  ;;  %v1049_v27 = vadd.f32 %v1028_v8, %v1001_v52  ;;  %v1004_v8 = vmul.f32 %v2146_v47, %v2057_v55  ;;  %v996_v55 = vsub.f32 %v948_v9, %v2162_v18 }
 0x15b   : > { %v1102_v16 = vrot.slane %v1080_v15, %v1763_v5 }
 0x15c   : > { %v1056_v23 = vsel %vm926_vm3, %v992_v21, %v1048_v33  ;;  %v1057_v13 = vsel %vm926_vm3, %v993_v40, %v1049_v27  ;;  %v1005_v21 = vmul.f32 %v2148_v46, %v2055_v51  ;;  %v997_v51 = vsub.f32 %v949_v48, %v2164_v12 }
 0x15d   : > { %v1109_v17 = vrot.slane %v1102_v16, %v1763_v5  ;;  %v1081_v26 = vpack.c.bf16 %v1056_v23, %v1056_v23  ;;  %v1082_v28 = vpack.c.bf16 %v1057_v13, %v1057_v13  ;;  %v1030_v39 = vpop.permute.xlu0 %1029  ;;  %v1032_v31 = vpop.permute.xlu1 %1031 }
 0x15e   : > { %v1050_v37 = vadd.f32 %v1030_v39, %v1002_v22  ;;  %v1051_v52 = vadd.f32 %v1032_v31, %v1003_v10  ;;  %v950_v39 = vmul.f32 %v1970_v2, %v2064_v57 }
 0x15f   : > { %v1110_v11 = vcombine.high %v1109_v17, %v1109_v17  ;;  %v1117_v15 = vrot.slane %v1081_v26, %v1763_v5  ;;  %v1132_v42 = vrot.slane %v1082_v28, %v1763_v5  ;;  %v1006_v28 = vmul.f32 %v2150_v61, %v2064_v57 }
 0x160   : > { %v1058_v40 = vsel %vm926_vm3, %v994_v32, %v1050_v37  ;;  %v1059_v49 = vsel %vm926_vm3, %v995_v35, %v1051_v52  ;;  %v998_v57 = vsub.f32 %v950_v39, %v2170_v24 }
 0x161   : > { %1225 = vst.msk [vmem:[%s2199_s8] sm:$0x1] %vm1224_vm1, %v1110_v11  ;;  %v1124_v20 = vrot.slane %v1117_v15, %v1763_v5  ;;  %v1139_v33 = vrot.slane %v1132_v42, %v1763_v5  ;;  %v1083_v27 = vpack.c.bf16 %v1058_v40, %v1058_v40  ;;  %v1084_v3 = vpack.c.bf16 %v1059_v49, %v1059_v49  ;;  %v1034_v36 = vpop.permute.xlu0 %1033  ;;  %v1036_v16 = vpop.permute.xlu1 %1035 }
 0x162   : > { %v1052_v22 = vadd.f32 %v1034_v36, %v1004_v8  ;;  %v1053_v10 = vadd.f32 %v1036_v16, %v1005_v21  ;;  %v871_v16 = vmul.f32 %v2138_v38, %v1999_v25 }
 0x163   : > { %v1125_v23 = vcombine.high %v1124_v20, %v1124_v20  ;;  %v1140_v13 = vcombine.high %v1139_v33, %v1139_v33  ;;  %v1147_v17 = vrot.slane %v1083_v27, %v1763_v5  ;;  %v1162_v26 = vrot.slane %v1084_v3, %v1763_v5 }
 0x164   : > { %v1060_v31 = vsel %vm926_vm3, %v996_v55, %v1052_v22  ;;  %v1061_v18 = vsel %vm926_vm3, %v997_v51, %v1053_v10  ;;  %v870_v55 = vmul.f32 %v2136_v34, %v2002_v29  ;;  %v727_v51 = vmul.f32 %v1938_v53, %v1999_v25 }
 0x165   : > { %1226 = vst.msk [vmem:[%s2199_s8 + $0x1] sm:$0x1] %vm1224_vm1, %v1125_v23  ;;  %1227 = vst.msk [vmem:[%s2199_s8 + $0x2] sm:$0x1] %vm1224_vm1, %v1140_v13  ;;  %v1154_v12 = vrot.slane %v1147_v17, %v1763_v5  ;;  %v1169_v9 = vrot.slane %v1162_v26, %v1763_v5  ;;  %v1085_v32 = vpack.c.bf16 %v1060_v31, %v1060_v31  ;;  %v1038_v37 = vpop.permute.xlu0 %1037  ;;  %v2231_v52 = vpop.permute.xlu1 %824 }
 0x166   : > { %v1086_v35 = vpack.c.bf16 %v1061_v18, %v1061_v18  ;;  %v1054_v48 = vadd.f32 %v1038_v37, %v1006_v28  ;;  %v726_v22 = vmul.f32 %v1943_v56, %v2002_v29  ;;  %v839_v38 = vsub.f32 %v727_v51, %v2152_v50 }
 0x167   : > { %v1155_v11 = vcombine.high %v1154_v12, %v1154_v12  ;;  %v1170_v15 = vcombine.high %v1169_v9, %v1169_v9  ;;  %v1177_v42 = vrot.slane %v1085_v32, %v1763_v5  ;;  %v728_v53 = vmul.f32 %v1954_v60, %v2015_v54 }
 0x168   : > { %v1192_v8 = vrot.slane %v1086_v35, %v1763_v5  ;;  %v1062_v21 = vsel %vm926_vm3, %v998_v57, %v1054_v48  ;;  %v838_v17 = vsub.f32 %v726_v22, %v2154_v63  ;;  %v729_v56 = vmul.f32 %v1948_v58, %v2010_v45 }
 0x169   : > { %1228 = vst.msk [vmem:[%s2199_s8 + $0x3] sm:$0x1] %vm1224_vm1, %v1155_v11  ;;  %1229 = vst.msk [vmem:[%s2199_s8 + $0x4] sm:$0x1] %vm1224_vm1, %v1170_v15  ;;  %v1184_v40 = vrot.slane %v1177_v42, %v1763_v5  ;;  %v1087_v24 = vpack.c.bf16 %v1062_v21, %v1062_v21  ;;  %v2243_v20 = vpop.permute.xlu0 %826  ;;  %v2245_v33 = vpop.permute.xlu1 %828  ;;  %v873_v29 = vmul.f32 %v2142_v43, %v2010_v45 }
 0x16a   : > { %v1199_v49 = vrot.slane %v1192_v8, %v1763_v5  ;;  %v840_v58 = vsub.f32 %v728_v53, %v2156_v7  ;;  %v841_v18 = vsub.f32 %v729_v56, %v2158_v1  ;;  %v731_v43 = vmul.f32 %v1960_v62, %v2090_v30 }
 0x16b   : > { %v1185_v27 = vcombine.high %v1184_v40, %v1184_v40  ;;  %v1207_v36 = vrot.slane %v1087_v24, %v1763_v5  ;;  %v875_v7 = vmul.f32 %v2146_v47, %v2090_v30  ;;  %v874_v1 = vmul.f32 %v2144_v59, %v2026_v19 }
 0x16c   : > { %v1200_v3 = vcombine.high %v1199_v49, %v1199_v49  ;;  %v843_v30 = vsub.f32 %v731_v43, %v2231_v52  ;;  %v732_v59 = vmul.f32 %v1975_v4, %v2098_v14  ;;  %v733_v11 = vmul.f32 %v1970_v2, %v2102_v44 }
 0x16d   : > { %1230 = vst.msk [vmem:[%s2199_s8 + $0x5] sm:$0x1] %vm1224_vm1, %v1185_v27  ;;  %v1214_v10 = vrot.slane %v1207_v36, %v1763_v5  ;;  %v895_v23 = vpop.permute.xlu0 %894  ;;  %v897_v13 = vpop.permute.xlu1 %896  ;;  %v872_v5 = vmul.f32 %v2140_v41, %v2015_v54  ;;  %v730_v41 = vmul.f32 %v1965_v0, %v2026_v19  ;;  %v877_v8 = vmul.f32 %v2150_v61, %v2102_v44 }
 0x16e   : > { %1231 = vst.msk [vmem:[%s2199_s8 + $0x6] sm:$0x1] %vm1224_vm1, %v1200_v3  ;;  %v918_v34 = vadd.f32 %v895_v23, %v870_v55  ;;  %v919_v26 = vadd.f32 %v897_v13, %v871_v16  ;;  %v876_v21 = vmul.f32 %v2148_v46, %v2098_v14  ;;  %v844_v44 = vsub.f32 %v732_v59, %v2243_v20 }
 0x16f   : > { %v1215_v25 = vcombine.high %v1214_v10, %v1214_v10  ;;  %v842_v48 = vsub.f32 %v730_v41, %v2160_v6  ;;  %v845_v14 = vsub.f32 %v733_v11, %v2245_v33 }
 0x170   : > { %v927_v50 = vsel %vm926_vm3, %v838_v17, %v918_v34  ;;  %v928_v63 = vsel %vm926_vm3, %v839_v38, %v919_v26 }
 0x171   : > { %1232 = vst.msk [vmem:[%s2199_s8 + $0x7] sm:$0x1] %vm1224_vm1, %v1215_v25  ;;  %v935_v28 = vmul.f32 0.35355338, %v927_v50  ;;  %v936_v60 = vmul.f32 0.35355338, %v928_v63  ;;  %v899_v39 = vpop.permute.xlu0 %898  ;;  %v901_v31 = vpop.permute.xlu1 %900 }
 0x172   : > { %v920_v45 = vadd.f32 %v899_v39, %v872_v5  ;;  %v921_v54 = vadd.f32 %v901_v31, %v873_v29 }
 0x173   : > { %v1063_v12 = vpack.c.bf16 %v935_v28, %v935_v28  ;;  %v1064_v9 = vpack.c.bf16 %v936_v60, %v936_v60 }
 0x174   : > { %v929_v32 = vsel %vm926_vm3, %v840_v58, %v920_v45  ;;  %v930_v35 = vsel %vm926_vm3, %v841_v18, %v921_v54 }
 0x175   : > { %1072 = vst.msk [vmem:[%s2281_s11] sm:$0x3] %vm1071_vm4, %v1063_v12  ;;  %1073 = vst.msk [vmem:[%s2281_s11 + $0x2] sm:$0x3] %vm1071_vm4, %v1064_v9  ;;  %v937_v0 = vmul.f32 0.35355338, %v929_v32  ;;  %v903_v62 = vpop.permute.xlu0 %902  ;;  %v905_v57 = vpop.permute.xlu1 %904 }
 0x176   : > { %v938_v37 = vmul.f32 0.35355338, %v930_v35  ;;  %v922_v47 = vadd.f32 %v903_v62, %v874_v1  ;;  %v923_v19 = vadd.f32 %v905_v57, %v875_v7 }
 0x177   : > { %v1065_v15 = vpack.c.bf16 %v937_v0, %v937_v0 }
 0x178   : > { %v1066_v42 = vpack.c.bf16 %v938_v37, %v938_v37  ;;  %v931_v6 = vsel %vm926_vm3, %v842_v48, %v922_v47  ;;  %v932_v52 = vsel %vm926_vm3, %v843_v30, %v923_v19 }
 0x179   : > { %1074 = vst.msk [vmem:[%s2281_s11 + $0x4] sm:$0x3] %vm1071_vm4, %v1065_v15  ;;  %v939_v4 = vmul.f32 0.35355338, %v931_v6  ;;  %v940_v2 = vmul.f32 0.35355338, %v932_v52  ;;  %v907_v40 = vpop.permute.xlu0 %906  ;;  %v909_v49 = vpop.permute.xlu1 %908 }
 0x17a   : > { %1075 = vst.msk [vmem:[%s2281_s11 + $0x6] sm:$0x3] %vm1071_vm4, %v1066_v42  ;;  %v924_v46 = vadd.f32 %v907_v40, %v876_v21  ;;  %v925_v61 = vadd.f32 %v909_v49, %v877_v8 }
 0x17b   : > { %v1067_v24 = vpack.c.bf16 %v939_v4, %v939_v4  ;;  %v1068_v27 = vpack.c.bf16 %v940_v2, %v940_v2 }
 0x17c   : > { %v933_v3 = vsel %vm926_vm3, %v844_v44, %v924_v46  ;;  %v934_v36 = vsel %vm926_vm3, %v845_v14, %v925_v61 }
 0x17d   : > { %1076 = vst.msk [vmem:[%s2281_s11 + $0x8] sm:$0x3] %vm1071_vm4, %v1067_v24  ;;  %1077 = vst.msk [vmem:[%s2281_s11 + $0xa] sm:$0x3] %vm1071_vm4, %v1068_v27  ;;  %v941_v16 = vmul.f32 0.35355338, %v933_v3 }
 0x17e   : > { %v942_v55 = vmul.f32 0.35355338, %v934_v36 }
 0x17f   : > { %v1069_v51 = vpack.c.bf16 %v941_v16, %v941_v16 }
 0x180   : > { %v1070_v22 = vpack.c.bf16 %v942_v55, %v942_v55 }
 0x181   : > { %1078 = vst.msk [vmem:[%s2281_s11 + $0xc] sm:$0x3] %vm1071_vm4, %v1069_v51 }
 0x182   : > { %1079 = vst.msk [vmem:[%s2281_s11 + $0xe] sm:$0x3] %vm1071_vm4, %v1070_v22 }
 0x183 PF: > { %s18_s26 = sadd.s32 1, %s1689_s26   ;;  %s2342_s24 = smov %s1685_s25 }
 0x184   : > { %p15_p5 = scmp.ge.s32.totalorder %s18_s26, 4   ;;  %s2343_s25 = smov %s2345_s27 }
 0x186   :  { %17 = sbr.rel (!%p15_p5) target bundleno = 2 (0x2), region = 100 }

// kernel: llama_decoder_layer.13
= control target key start
LH: loop header
LB: loop body
LE: loop exit
PB: predicated region body
PF: predicated region fallthrough
CT: control target
= control target key end

     0   :  { %vm22_vm0 = vcmask 257024   ;;  %vm29_vm1 = vcmask 261120   ;;  %v50_v18 = vlaneseq  ;;  %s134_s0 = inlined_call_operand.vmem [shape: bf16[16,32], index: 0, kind: input, shape index: {}]   ;;  %s135_s1 = inlined_call_operand.vmem [shape: bf16[16,32], index: 1, kind: input, shape index: {}, may-alias: {1,4}]   ;;  %s136_s4 = inlined_call_operand.vmem [shape: bf16[16,32], index: 4, kind: output, shape index: {1}, may-alias: {1,4}]   ;;  %s137_s2 = inlined_call_operand.vmem [shape: bf16[1,32], index: 2, kind: input, shape index: {}]   ;;  %s138_s3 = inlined_call_operand.vmem [shape: bf16[16,32], index: 3, kind: output, shape index: {0}]  }
   0x1   :  { %v16_v0 = vld [vmem:[%s134_s0] sm:$0xf]  ;;  %v17_v2 = vld [vmem:[%s134_s0 + $0x4] sm:$0xf] }
   0x2   :  { %v18_v1 = vld [vmem:[%s135_s1] sm:$0xf]  ;;  %v19_v4 = vld [vmem:[%s135_s1 + $0x4] sm:$0xf]  ;;  %v51_v19 = vshrl.u32 %v50_v18, 7 }
   0x3   :  { %v20_v3 = vadd.bf16 %v18_v1, %v16_v0  ;;  %v21_v5 = vadd.bf16 %v19_v4, %v17_v2  ;;  %v46_v20 = vld [vmem:[%s137_s2] sm:$0x1] }
   0x4   :  { %v48_v21 = vpack.i.b16 %v46_v20, %v46_v20  ;;  %v52_v22 = vsub.s32 0, %v51_v19 }
   0x5   :  { %v25_v6 = vunpack.c.l.bf16 %v20_v3  ;;  %23 = vst.msk [vmem:[%s136_s4] sm:$0xf] %vm22_vm0, %v20_v3  ;;  %24 = vst.msk [vmem:[%s136_s4 + $0x4] sm:$0xf] %vm22_vm0, %v21_v5  ;;  %v26_v7 = vunpack.c.l.bf16 %v21_v5 }
   0x6   :  { %v53_v26 = vrot.slane %v48_v21, %v52_v22 }
   0x7   :  { %v27_v8 = vmul.f32 %v25_v6, %v25_v6  ;;  %v28_v9 = vmul.f32 %v26_v7, %v26_v7 }
   0x9   :  { %v30_v10 = vsel %vm29_vm1, %v27_v8, 0.0  ;;  %v33_v11 = vsel %vm29_vm1, %v28_v9, 0.0 }
   0xa   :  { %31 = vadd.xlane.f32.xlu0 %v30_v10 }
   0xe   :  { %34 = vadd.xlane.f32.xlu0 %v33_v11 }
  0x97   :  { %v32_v12 = vpop.xlane.xlu0 %31 }
  0x98   :  { %v37_v13 = vmul.f32 0.03125, %v32_v12 }
  0x9a   :  { %v39_v14 = vadd.f32 1e-06, %v37_v13 }
  0x9b   :  { %v35_v15 = vpop.xlane.xlu0 %34 }
  0x9c   :  { %v38_v16 = vmul.f32 0.03125, %v35_v15  ;;  %74 = vrsqrt.f32 %v39_v14 }
  0x9e   :  { %v40_v17 = vadd.f32 1e-06, %v38_v16 }
  0xa0   :  { %76 = vrsqrt.f32 %v40_v17 }
  0xa6   :  { %v75_v23 = vpop.eup %74 }
  0xa7   :  { %v43_v25 = vmul.f32 %v75_v23, %v25_v6 }
  0xaa   :  { %v77_v24 = vpop.eup %76 }
  0xab   :  { %v44_v27 = vmul.f32 %v77_v24, %v26_v7 }
  0xad   :  { %v45_v28 = vpack.c.bf16 %v44_v27, %v43_v25 }
  0xaf   :  { %v54_v29 = vmul.bf16 %v53_v26, %v45_v28 }
  0xb1   :  { %v72_v30 = vcombine.low %v54_v29, %v54_v29  ;;  %v73_v31 = vcombine.high %v54_v29, %v54_v29 }
  0xb3   :  { %62 = vst.msk [vmem:[%s138_s3] sm:$0xf] %vm22_vm0, %v72_v30  ;;  %63 = vst.msk [vmem:[%s138_s3 + $0x4] sm:$0xf] %vm22_vm0, %v73_v31 }

// kernel: llama_decoder_layer.14
= control target key start
LH: loop header
LB: loop body
LE: loop exit
PB: predicated region body
PF: predicated region fallthrough
CT: control target
= control target key end

     0   :  { %v140_v0 = vmov 0.0   ;;  %vm141_vm0 = vmmov 0   ;;  %vm43_vm1 = vcmask 261120   ;;  %s169_s1 = inlined_call_operand.vmem [shape: bf16[32,128], index: 1, kind: input, shape index: {}]   ;;  %s170_s0 = inlined_call_operand.vmem [shape: bf16[16,32], index: 0, kind: input, shape index: {}]   ;;  %s171_s2 = inlined_call_operand.vmem [shape: bf16[16,128], index: 2, kind: output, shape index: {}]  }
   0x1   :  { %127 = vmatprep.subr.bf16.mxu0 %v140_v0  ;;  %v137_v1 = vld [vmem:[%s169_s1] sm:$0xff]   ;;  %131 = vmatprep.mubr.msk.bf16.mxu0 %vm141_vm0, %v140_v0  ;;  %v138_v2 = vld [vmem:[%s169_s1 + $0x8] sm:$0xff]  }
   0x2   :  { %128 = vmatpush3.bf16.msra.mxu0 %v137_v1  ;;  %v139_v3 = vld [vmem:[%s170_s0] sm:$0xff]  }
   0x3   :  { %129 = vmatprep.subr.bf16.mxu0 %v140_v0 }
   0x6   :  { %130 = vmatpush3.bf16.msra.mxu0 %v138_v2 }
   0x9   :  { %132 = vmatmul.mubr.msk.bf16.vlgmr.msra.gmra.mrb[0].mxu0 %vm43_vm1, %v139_v3 }
  0xdc   :  { %v81_v4 = vpop.f32.mrb[0].mxu0 }
  0xdd   :  { %v133_v5 = vpop.f32.mrb[1].mxu0 }
  0xde   :  { %v84_v6 = vpop.f32.mrb[2].mxu0 }
  0xdf   :  { %v122_v7 = vpack.c.bf16 %v84_v6, %v81_v4  ;;  %v134_v8 = vpop.f32.mrb[3].mxu0 }
  0xe1   :  { %123 = vst [vmem:[%s171_s2] sm:$0xff] %v122_v7  }

// kernel: llama_decoder_layer.15
= control target key start
LH: loop header
LB: loop body
LE: loop exit
PB: predicated region body
PF: predicated region fallthrough
CT: control target
= control target key end

     0   :  { %v601_v1 = vmov 0.0   ;;  %vm602_vm0 = vmmov 0   ;;  %s806_s0 = inlined_call_operand.vmem [shape: bf16[16,2,64], index: 0, kind: input, shape index: {}]   ;;  %s807_s1 = inlined_call_operand.vmem [shape: bf16[64,32], index: 1, kind: input, shape index: {}]   ;;  %s808_s2 = inlined_call_operand.hbm [shape: bf16[16,32], index: 2, kind: output, shape index: {}]  }
   0x1   :  { %v509_v0 = vld [vmem:[%s807_s1] sm:$0xff]   ;;  %492 = vmatprep.subr.bf16.mxu0 %v601_v1  ;;  %v510_v2 = vld [vmem:[%s807_s1 + $0x8] sm:$0xff]   ;;  %500 = vmatprep.mubr.msk.bf16.mxu0 %vm602_vm0, %v601_v1  ;;  %v511_v10 = vld [vmem:[%s807_s1 + $0x10] sm:$0xff]  }
   0x2   :  { %493 = vmatpush3.bf16.msra.mxu0 %v509_v0  ;;  %v20_v3 = vld [vmem:[%s806_s0] sm:$0x1]  ;;  %v21_v4 = vld [vmem:[%s806_s0 + $0x1] sm:$0x1]  ;;  %v22_v5 = vld [vmem:[%s806_s0 + $0x2] sm:$0x1] }
   0x3   :  { %494 = vmatprep.subr.bf16.mxu0 %v601_v1  ;;  %v23_v6 = vld [vmem:[%s806_s0 + $0x3] sm:$0x1]  ;;  %v24_v7 = vld [vmem:[%s806_s0 + $0x4] sm:$0x1]  ;;  %v25_v8 = vld [vmem:[%s806_s0 + $0x5] sm:$0x1]  ;;  %v648_v9 = vunpack.c.l.bf16 %v20_v3  ;;  %v656_v12 = vunpack.c.l.bf16 %v21_v4  ;;  %v658_v13 = vunpack.c.l.bf16 %v22_v5 }
   0x4   :  { %v26_v11 = vld [vmem:[%s806_s0 + $0x6] sm:$0x1]  ;;  %v660_v14 = vunpack.c.l.bf16 %v23_v6  ;;  %v27_v15 = vld [vmem:[%s806_s0 + $0x7] sm:$0x1]  ;;  %v666_v16 = vunpack.c.l.bf16 %v24_v7  ;;  %v512_v17 = vld [vmem:[%s807_s1 + $0x18] sm:$0xff]   ;;  %v677_v20 = vunpack.c.l.bf16 %v25_v8 }
   0x5   :  { %v28_v18 = vld [vmem:[%s806_s0 + $0x8] sm:$0x1]  ;;  %v29_v19 = vld [vmem:[%s806_s0 + $0x9] sm:$0x1]  ;;  %v30_v21 = vld [vmem:[%s806_s0 + $0xa] sm:$0x1]  ;;  %v682_v22 = vunpack.c.l.bf16 %v26_v11 }
   0x6   :  { %495 = vmatpush3.bf16.msra.mxu0 %v510_v2  ;;  %v446_v23 = vmul.f32 -1.442695, %v648_v9 }
   0x7   :  { %496 = vmatprep.subr.bf16.mxu0 %v601_v1 }
   0x8   :  { %7 = vsyncpa [#allocation4], 0  ;;  %v685_v24 = vunpack.c.l.bf16 %v27_v15  ;;  %v447_v25 = vmul.f32 -1.442695, %v656_v12  ;;  %v448_v26 = vmul.f32 -1.442695, %v658_v13  ;;  %v694_v29 = vunpack.c.l.bf16 %v28_v18 }
   0x9   :  { %v449_v27 = vmul.f32 -1.442695, %v660_v14  ;;  %v31_v28 = vld [vmem:[%s806_s0 + $0xb] sm:$0x1]  ;;  %513 = vpow2.f32 %v446_v23  ;;  %v450_v30 = vmul.f32 -1.442695, %v666_v16  ;;  %v700_v32 = vunpack.c.l.bf16 %v29_v19 }
   0xa   :  { %497 = vmatpush3.bf16.msra.mxu0 %v511_v10  ;;  %v32_v31 = vld [vmem:[%s806_s0 + $0xc] sm:$0x1]  ;;  %515 = vpow2.f32 %v447_v25  ;;  %v451_v33 = vmul.f32 -1.442695, %v677_v20  ;;  %v33_v34 = vld [vmem:[%s806_s0 + $0xd] sm:$0x1]  ;;  %v706_v35 = vunpack.c.l.bf16 %v30_v21  ;;  %v712_v38 = vunpack.c.l.bf16 %v31_v28 }
   0xb   :  { %498 = vmatprep.subr.bf16.mxu0 %v601_v1  ;;  %517 = vpow2.f32 %v448_v26  ;;  %v452_v36 = vmul.f32 -1.442695, %v682_v22  ;;  %v34_v37 = vld [vmem:[%s806_s0 + $0xe] sm:$0x1]  ;;  %v453_v39 = vmul.f32 -1.442695, %v685_v24  ;;  %v718_v41 = vunpack.c.l.bf16 %v32_v31 }
   0xc   :  { %519 = vpow2.f32 %v449_v27  ;;  %v35_v40 = vld [vmem:[%s806_s0 + $0xf] sm:$0x1]  ;;  %v454_v42 = vmul.f32 -1.442695, %v694_v29  ;;  %v721_v43 = vunpack.c.l.bf16 %v33_v34  ;;  %v455_v44 = vmul.f32 -1.442695, %v700_v32 }
   0xd   :  { %521 = vpow2.f32 %v450_v30  ;;  %v724_v45 = vunpack.c.l.bf16 %v34_v37  ;;  %v456_v46 = vmul.f32 -1.442695, %v706_v35  ;;  %v727_v47 = vunpack.c.l.bf16 %v35_v40  ;;  %s603_s0 = smov [#allocation3]  }
   0xe   :  { %499 = vmatpush3.bf16.msra.mxu0 %v512_v17  ;;  %523 = vpow2.f32 %v451_v33  ;;  %v457_v48 = vmul.f32 -1.442695, %v712_v38  ;;  %v458_v49 = vmul.f32 -1.442695, %v718_v41  ;;  %v459_v50 = vmul.f32 -1.442695, %v721_v43 }
   0xf   :  { %525 = vpow2.f32 %v452_v36  ;;  %v460_v52 = vmul.f32 -1.442695, %v724_v45  ;;  %v461_v54 = vmul.f32 -1.442695, %v727_v47  ;;  %vm17_vm1 = vcmask 261120   ;;  %s435_s20 = sshll.u32 %s603_s0, 4  ;;  %s436_s20 = int_to_ptr.vmem [resolvable:$true] %s435_s20 }
  0x10   :  { %527 = vpow2.f32 %v453_v39  ;;  %18 = vst.msk [vmem:[#allocation2] sm:$0xff] %vm17_vm1, %v601_v1  ;;  %19 = vst.msk [vmem:[#allocation2 + $0x8] sm:$0xff] %vm17_vm1, %v601_v1  ;;  %v462_v18 = vrot.slane %v648_v9, 9  ;;  %v463_v19 = vrot.slane %v656_v12, 9  ;;  %v464_v25 = vrot.slane %v658_v13, 9  ;;  %s577_s21 = scalar_lea.vmem %s436_s20, 128  ;;  %p582_p1 = scmp.lt.s32.totalorder %s436_s20, %s436_s20 }
  0x11   :  { %529 = vpow2.f32 %v454_v42  ;;  %v465_v26 = vrot.slane %v660_v14, 9  ;;  %v466_v30 = vrot.slane %v666_v16, 9  ;;  %v467_v31 = vrot.slane %v677_v20, 9  ;;  %p578_p0 = scmp.ne.s32.totalorder %s436_s20, %s577_s21  ;;  %p583_p2 = scmp.lt.s32.totalorder %s577_s21, %s577_s21 }
  0x12   :  { %531 = vpow2.f32 %v455_v44  ;;  %v468_v36 = vrot.slane %v682_v22, 9  ;;  %v469_v37 = vrot.slane %v685_v24, 9  ;;  %v470_v42 = vrot.slane %v694_v29, 9 }
  0x13   :  { %v514_v51 = vpop.eup %513  ;;  %533 = vpow2.f32 %v456_v46  ;;  %v471_v44 = vrot.slane %v700_v32, 9  ;;  %vm303_vm2 = vcmask 1041409   ;;  %vm306_vm3 = vcmask 1042434   ;;  %p584_p3 = por %p583_p2, %p582_p1 }
  0x14   :  { %v516_v53 = vpop.eup %515  ;;  %535 = vpow2.f32 %v457_v48  ;;  %v100_v56 = vadd.f32 1.0, %v514_v51  ;;  %vm309_vm4 = vcmask 1043459   ;;  %vm312_vm5 = vcmask 1044484  }
  0x15   :  { %v518_v55 = vpop.eup %517  ;;  %537 = vpow2.f32 %v458_v49  ;;  %v101_v58 = vadd.f32 1.0, %v516_v53  ;;  %v473_v53 = vrot.slane %v712_v38, 9  ;;  %vm315_vm6 = vcmask 1045509   ;;  %p585_p4 = pnand %p584_p3, %p578_p0 }
  0x16   :  { %v520_v57 = vpop.eup %519  ;;  %539 = vpow2.f32 %v459_v50  ;;  %v102_v60 = vadd.f32 1.0, %v518_v55  ;;  %v472_v50 = vrot.slane %v706_v35, 9  ;;  %vm318_vm7 = vcmask 1046534  }
  0x17   :  { %v522_v59 = vpop.eup %521  ;;  %541 = vpow2.f32 %v460_v52  ;;  %v103_v62 = vadd.f32 1.0, %v520_v57  ;;  %v475_v57 = vrot.slane %v721_v43, 9  ;;  %vm321_vm8 = vcmask 1047559  }
  0x18   :  { %v524_v61 = vpop.eup %523  ;;  %543 = vpow2.f32 %v461_v54  ;;  %v104_v0 = vadd.f32 1.0, %v522_v59  ;;  %v474_v54 = vrot.slane %v718_v41, 9  ;;  %vm362_vm9 = vcmask 523264  }
  0x19   :  { %v526_v63 = vpop.eup %525  ;;  %545 = vrcp.f32 %v100_v56  ;;  %v105_v3 = vadd.f32 1.0, %v524_v61  ;;  %vm427_vm10 = vcmask 257024  }
  0x1a   :  { %v528_v2 = vpop.eup %527  ;;  %547 = vrcp.f32 %v101_v58  ;;  %v106_v5 = vadd.f32 1.0, %v526_v63 }
  0x1b   :  { %v530_v4 = vpop.eup %529  ;;  %549 = vrcp.f32 %v102_v60  ;;  %v107_v1 = vadd.f32 1.0, %v528_v2  ;;  %v476_v60 = vrot.slane %v724_v45, 9 }
  0x1c   :  { %v532_v6 = vpop.eup %531  ;;  %551 = vrcp.f32 %v103_v62  ;;  %v108_v8 = vadd.f32 1.0, %v530_v4 }
  0x1d   :  { %v534_v7 = vpop.eup %533  ;;  %553 = vrcp.f32 %v104_v0  ;;  %v109_v11 = vadd.f32 1.0, %v532_v6 }
  0x1e   :  { %v536_v10 = vpop.eup %535  ;;  %555 = vrcp.f32 %v105_v3  ;;  %v110_v17 = vadd.f32 1.0, %v534_v7 }
  0x1f   :  { %v538_v15 = vpop.eup %537  ;;  %557 = vrcp.f32 %v106_v5  ;;  %v111_v23 = vadd.f32 1.0, %v536_v10 }
  0x20   :  { %v540_v21 = vpop.eup %539  ;;  %559 = vrcp.f32 %v107_v1  ;;  %v112_v28 = vadd.f32 1.0, %v538_v15 }
  0x21   :  { %v542_v27 = vpop.eup %541  ;;  %561 = vrcp.f32 %v108_v8  ;;  %v113_v34 = vadd.f32 1.0, %v540_v21 }
  0x22   :  { %v544_v33 = vpop.eup %543  ;;  %563 = vrcp.f32 %v109_v11  ;;  %v114_v40 = vadd.f32 1.0, %v542_v27 }
  0x23   :  { %v546_v39 = vpop.eup %545  ;;  %565 = vrcp.f32 %v110_v17  ;;  %v115_v48 = vadd.f32 1.0, %v544_v33 }
  0x24   :  { %v548_v46 = vpop.eup %547  ;;  %567 = vrcp.f32 %v111_v23  ;;  %v148_v49 = vmul.f32 %v546_v39, %v648_v9 }
  0x25   :  { %v550_v51 = vpop.eup %549  ;;  %569 = vrcp.f32 %v112_v28  ;;  %v149_v52 = vmul.f32 %v548_v46, %v656_v12 }
  0x26   :  { %v552_v55 = vpop.eup %551  ;;  %571 = vrcp.f32 %v113_v34  ;;  %v150_v56 = vmul.f32 %v550_v51, %v658_v13  ;;  %v228_v58 = vmul.f32 %v462_v18, %v148_v49  ;;  %v477_v13 = vrot.slane %v727_v47, 9 }
  0x27   :  { %v554_v59 = vpop.eup %553  ;;  %573 = vrcp.f32 %v114_v40  ;;  %v151_v9 = vmul.f32 %v552_v55, %v660_v14  ;;  %v229_v61 = vmul.f32 %v463_v19, %v149_v52 }
  0x28   :  { %v556_v62 = vpop.eup %555  ;;  %575 = vrcp.f32 %v115_v48  ;;  %v152_v12 = vmul.f32 %v554_v59, %v666_v16  ;;  %v230_v63 = vmul.f32 %v464_v25, %v150_v56  ;;  %v244_v0 = vpack.c.bf16 %v228_v58, %v228_v58 }
  0x29   :  { %v558_v2 = vpop.eup %557  ;;  %v153_v3 = vmul.f32 %v556_v62, %v677_v20  ;;  %v231_v4 = vmul.f32 %v465_v26, %v151_v9  ;;  %v245_v5 = vpack.c.bf16 %v229_v61, %v229_v61 }
  0x2a   :  { %v560_v6 = vpop.eup %559  ;;  %v154_v1 = vmul.f32 %v558_v2, %v682_v22  ;;  %v232_v14 = vmul.f32 %v466_v30, %v152_v12  ;;  %v246_v7 = vpack.c.bf16 %v230_v63, %v230_v63  ;;  %v286_v8 = vunpack.c.l.b16 %v244_v0 }
  0x2b   :  { %v562_v10 = vpop.eup %561  ;;  %v155_v11 = vmul.f32 %v560_v6, %v685_v24  ;;  %v233_v15 = vmul.f32 %v467_v31, %v153_v3  ;;  %v247_v16 = vpack.c.bf16 %v231_v4, %v231_v4  ;;  %v287_v17 = vunpack.c.l.b16 %v245_v5 }
  0x2c   :  { %v564_v18 = vpop.eup %563  ;;  %v156_v20 = vmul.f32 %v562_v10, %v694_v29  ;;  %v234_v19 = vmul.f32 %v468_v36, %v154_v1  ;;  %v248_v21 = vpack.c.bf16 %v232_v14, %v232_v14  ;;  %v288_v23 = vunpack.c.l.b16 %v246_v7 }
  0x2d   :  { %v566_v25 = vpop.eup %565  ;;  %v157_v22 = vmul.f32 %v564_v18, %v700_v32  ;;  %v235_v26 = vmul.f32 %v469_v37, %v155_v11  ;;  %v249_v27 = vpack.c.bf16 %v233_v15, %v233_v15  ;;  %v289_v28 = vunpack.c.l.b16 %v247_v16 }
  0x2e   :  { %v568_v30 = vpop.eup %567  ;;  %v158_v24 = vmul.f32 %v566_v25, %v706_v35  ;;  %v236_v31 = vmul.f32 %v470_v42, %v156_v20  ;;  %v250_v33 = vpack.c.bf16 %v234_v19, %v234_v19  ;;  %v290_v34 = vunpack.c.l.b16 %v248_v21 }
  0x2f   :  { %v570_v39 = vpop.eup %569  ;;  %v159_v29 = vmul.f32 %v568_v30, %v712_v38  ;;  %v237_v36 = vmul.f32 %v471_v44, %v157_v22  ;;  %v251_v40 = vpack.c.bf16 %v235_v26, %v235_v26  ;;  %v291_v46 = vunpack.c.l.b16 %v249_v27 }
  0x30   :  { %v572_v48 = vpop.eup %571  ;;  %v160_v32 = vmul.f32 %v570_v39, %v718_v41  ;;  %v238_v37 = vmul.f32 %v472_v50, %v158_v24  ;;  %v252_v49 = vpack.c.bf16 %v236_v31, %v236_v31  ;;  %v292_v51 = vunpack.c.l.b16 %v250_v33 }
  0x31   :  { %v574_v52 = vpop.eup %573  ;;  %v161_v42 = vmul.f32 %v572_v48, %v721_v43  ;;  %v239_v55 = vmul.f32 %v473_v53, %v159_v29  ;;  %v253_v56 = vpack.c.bf16 %v237_v36, %v237_v36  ;;  %v293_v58 = vunpack.c.l.b16 %v251_v40  ;;  %v260_v29 = vld [vmem:[#allocation2] sm:$0xff]  ;;  %v261_v40 = vld [vmem:[#allocation2 + $0x8] sm:$0xff] }
  0x32   :  { %v576_v44 = vpop.eup %575  ;;  %v162_v59 = vmul.f32 %v574_v52, %v724_v45  ;;  %v240_v9 = vmul.f32 %v474_v54, %v160_v32  ;;  %v254_v61 = vpack.c.bf16 %v238_v37, %v238_v37  ;;  %v294_v62 = vunpack.c.l.b16 %v252_v49 }
  0x33   :  { %v163_v35 = vmul.f32 %v576_v44, %v727_v47  ;;  %v241_v50 = vmul.f32 %v475_v57, %v161_v42  ;;  %v255_v12 = vpack.c.bf16 %v239_v55, %v239_v55  ;;  %v295_v63 = vunpack.c.l.b16 %v253_v56 }
  0x34   :  { %v242_v38 = vmul.f32 %v476_v60, %v162_v59  ;;  %v256_v53 = vpack.c.bf16 %v240_v9, %v240_v9  ;;  %v296_v0 = vunpack.c.l.b16 %v254_v61  ;;  %v302_v2 = vrot.slane %v287_v17, 7 }
  0x35   :  { %v243_v3 = vmul.f32 %v477_v13, %v163_v35  ;;  %v257_v4 = vpack.c.bf16 %v241_v50, %v241_v50  ;;  %v297_v5 = vunpack.c.l.b16 %v255_v12  ;;  %v305_v41 = vrot.slane %v288_v23, 6 }
  0x36   :  { %v258_v54 = vpack.c.bf16 %v242_v38, %v242_v38  ;;  %v298_v6 = vunpack.c.l.b16 %v256_v53  ;;  %v304_v1 = vsel %vm303_vm2, %v302_v2, %v286_v8  ;;  %v308_v47 = vrot.slane %v289_v28, 5 }
  0x37   :  { %v259_v14 = vpack.c.bf16 %v243_v3, %v243_v3  ;;  %v299_v43 = vunpack.c.l.b16 %v257_v4  ;;  %v307_v57 = vsel %vm306_vm3, %v305_v41, %v304_v1  ;;  %v311_v7 = vrot.slane %v290_v34, 4 }
  0x38   :  { %v300_v10 = vunpack.c.l.b16 %v258_v54  ;;  %v310_v45 = vsel %vm309_vm4, %v308_v47, %v307_v57  ;;  %v314_v60 = vrot.slane %v291_v46, 3  ;;  %v317_v11 = vrot.slane %v292_v51, 2 }
  0x39   :  { %v301_v15 = vunpack.c.l.b16 %v259_v14  ;;  %v313_v13 = vsel %vm312_vm5, %v311_v7, %v310_v45  ;;  %v323_v16 = vrot.slane %v295_v63, 7  ;;  %v325_v18 = vrot.slane %v296_v0, 6 }
  0x3a   :  { %v316_v17 = vsel %vm315_vm6, %v314_v60, %v313_v13  ;;  %v327_v8 = vrot.slane %v297_v5, 5  ;;  %v329_v20 = vrot.slane %v298_v6, 4  ;;  %v320_v19 = vrot.slane %v293_v58, 1 }
  0x3b   :  { %v324_v21 = vsel %vm303_vm2, %v323_v16, %v294_v62  ;;  %v331_v23 = vrot.slane %v299_v43, 3  ;;  %v319_v25 = vsel %vm318_vm7, %v317_v11, %v316_v17  ;;  %v333_v26 = vrot.slane %v300_v10, 2 }
  0x3c   :  { %v326_v22 = vsel %vm306_vm3, %v325_v18, %v324_v21  ;;  %v335_v28 = vrot.slane %v301_v15, 1  ;;  %v322_v24 = vsel %vm321_vm8, %v320_v19, %v319_v25 }
  0x3d   :  { %v328_v27 = vsel %vm309_vm4, %v327_v8, %v326_v22 }
  0x3e   :  { %v330_v30 = vsel %vm312_vm5, %v329_v20, %v328_v27 }
  0x3f   :  { %v332_v31 = vsel %vm315_vm6, %v331_v23, %v330_v30 }
  0x40   :  { %v334_v33 = vsel %vm318_vm7, %v333_v26, %v332_v31 }
  0x41   :  { %v336_v34 = vsel %vm321_vm8, %v335_v28, %v334_v33 }
  0x42   :  { %v337_v39 = vpack.c.b16 %v336_v34, %v322_v24 }
  0x44   :  { %501 = vmatmul.mubr.msk.bf16.vlgmr.msra.gmra.mrb[0].mxu0 %vm362_vm9, %v337_v39 }
 0x117   :  { %v400_v36 = vpop.f32.mrb[0].mxu0 }
 0x118   :  { %v407_v46 = vadd.f32 %v400_v36, %v260_v29  ;;  %v502_v48 = vpop.f32.mrb[1].mxu0 }
 0x119   :  { %v403_v32 = vpop.f32.mrb[2].mxu0 }
 0x11a   :  { %410 = vst.msk [vmem:[#allocation2] sm:$0xff] %vm17_vm1, %v407_v46  ;;  %v408_v37 = vadd.f32 %v403_v32, %v261_v40  ;;  %v503_v49 = vpop.f32.mrb[3].mxu0 }
 0x11c   :  { %411 = vst.msk [vmem:[#allocation2 + $0x8] sm:$0xff] %vm17_vm1, %v408_v37 }
 0x121   :  { %v415_v51 = vld [vmem:[#allocation2] sm:$0xff] }
 0x122   :  { %v417_v52 = vmul.f32 0.98994946, %v415_v51 }
 0x123   :  { %v416_v42 = vld [vmem:[#allocation2 + $0x8] sm:$0xff] }
 0x124   :  { %v418_v55 = vmul.f32 0.98994946, %v416_v42  ;;  %v485_v56 = vpack.c.bf16 %v417_v52, %v417_v52 }
 0x126   :  { %v486_v58 = vpack.c.bf16 %v418_v55, %v418_v55  ;;  %428 = vst.msk [vmem:[#allocation3] sm:$0xf] %vm427_vm10, %v485_v56 }
 0x128   :  { %429 = vst.msk [vmem:[#allocation3 + $0x4] sm:$0xf] %vm427_vm10, %v486_v58 }
 0x129   :  { %588 = shalt.err (!%p585_p4)
}
 0x12a   :  { %s589_s24 = scalar_lea.hbm %s808_s2, 128 }
 0x12b   :  { %p590_p5 = scmp.ne.s32.totalorder %s808_s2, %s589_s24  ;;  %p593_p6 = scmp.lt.u32.totalorder %s589_s24, %s808_s2 }
 0x12d   :  { %p595_p7 = pnand %p593_p6, %p590_p5 }
 0x12f   :  { %598 = shalt.err (!%p595_p7)
}
 0x130   :  { %s604_s29 = smov 64   ;;  %s605_s30 = smov 4  }
 0x131   :  { %441 = dma.vmem_to_hbm [thread:$0]  %s436_s20, 128, %s808_s2, [#allocation4], %s604_s29, %s604_s29, %s605_s30  }
 0x132   :  { %599 = dma.done.wait [#allocation4], 128  }
 0x133   :  { %600 = vsyncadd [#allocation4], 4294967168 }
 0x134   :  { %445 = vsyncpa [#allocation4], 1 }

// kernel: llama_decoder_layer.11
= control target key start
LH: loop header
LB: loop body
LE: loop exit
PB: predicated region body
PF: predicated region fallthrough
CT: control target
= control target key end

     0   :  { %s4387_s12 = smov 0   ;;  %s4389_s13 = smov 0   ;;  %s4947_s0 = inlined_call_operand.vmem [shape: bf16[2,8,4,8], index: 0, kind: input, shape index: {}]   ;;  %s4948_s1 = inlined_call_operand.vmem [shape: bf16[2,8,2,8], index: 1, kind: input, shape index: {}]   ;;  %s4949_s2 = inlined_call_operand.vmem [shape: bf16[2,8,2,8], index: 2, kind: input, shape index: {}]   ;;  %s4950_s3 = inlined_call_operand.vmem [shape: bf16[2,8,4,8], index: 3, kind: output, shape index: {}]  }
   0x1   :  { %s4391_s14 = smov 0  }
   0x2 LB: > { %s32_s15 = sadd.s32 1, %s4355_s13  ;;  %p4046_p0 = scmp.ge.s32.totalorder %s4359_s14, 1  ;;  %s4359_s14 = sphi %s4391_s14, %s13_s14   ;;  %s4355_s13 = sphi %s4389_s13, %s4960_s13   ;;  %s4351_s12 = sphi %s4387_s12, %s4959_s12  }
   0x3   : > { %p34_p1 = scmp.ge.s32.totalorder %s32_s15, 2  ;;  %p213_p2 = scmp.lt.s32.totalorder %s4359_s14, 3 }
   0x5   : > { %s4962_s15 = smov (%p34_p1, %s32_s15), 0  ;;  %p214_p3 = pnand %p4046_p0, %p213_p2 }
   0x6   : > { %p266_p4 = scmp.lt.s32.totalorder (!%p214_p3), %s4351_s12, 1  ;;  %vm325_vm0 = vcmask (!%p214_p3), 64512   ;;  %v1839_v0 = vlaneseq (!%p214_p3)  ;;  %v4361_v1 = vmov (!%p214_p3), 0.0   ;;  %v4362_v3 = vmov (!%p214_p3), 1966171168  }
   0x7   : > { %217 = sbr.rel (%p214_p3) target bundleno = 1387 (0x56b), region = 32  ;;  %4233 = vmatprep.subr.bf16.mxu0 (!%p214_p3), %v4361_v1  ;;  %326 = vst.msk [vmem:[#allocation4] sm:$0xff] (!%p214_p3), %vm325_vm0, %v4361_v1  ;;  %327 = vst.msk [vmem:[#allocation4 + $0x8] sm:$0xff] (!%p214_p3), %vm325_vm0, %v4361_v1  ;;  %4239 = vmatprep.subr.bf16.mxu1 (!%p214_p3), %v4361_v1  ;;  %v1982_v4 = vunpack.c.l.s4 (!%p214_p3), %v4362_v3  ;;  %vm4363_vm1 = vmmov (!%p214_p3), 0   ;;  %vm1945_vm2 = vcmask (!%p214_p3), 1041409   ;;  %vm1948_vm3 = vcmask (!%p214_p3), 1042434  }
   0x8   : > { %328 = vst.msk [vmem:[#allocation4 + $0x10] sm:$0xff] (!%p214_p3), %vm325_vm0, %v4361_v1  ;;  %329 = vst.msk [vmem:[#allocation4 + $0x18] sm:$0xff] (!%p214_p3), %vm325_vm0, %v4361_v1  ;;  %v4418_v2 = vshrl.u32 (!%p214_p3), %v1839_v0, 7  ;;  %4235 = vmatprep.mubr.msk.bf16.mxu0 (!%p214_p3), %vm4363_vm1, %v4361_v1  ;;  %4241 = vmatprep.mubr.msk.bf16.mxu1 (!%p214_p3), %vm4363_vm1, %v4361_v1  ;;  %vm1951_vm4 = vcmask (!%p214_p3), 1043459   ;;  %vm1954_vm5 = vcmask (!%p214_p3), 1044484   ;;  %vm1957_vm6 = vcmask (!%p214_p3), 1045509  }
   0x9   : > { %v1983_v5 = vunpack.c.0.s8 (!%p214_p3), %v1982_v4  ;;  %vm1960_vm7 = vcmask (!%p214_p3), 1046534   ;;  %vm1963_vm8 = vcmask (!%p214_p3), 1047559   ;;  %vm316_vm9 = vcmask (!%p214_p3), 7168  }
   0xa   : > { %321 = vst.msk [vmem:[#allocation3] sm:$0xff] (!%p214_p3), %vm316_vm9, %v4361_v1  ;;  %322 = vst.msk [vmem:[#allocation3 + $0x8] sm:$0xff] (!%p214_p3), %vm316_vm9, %v4361_v1  ;;  %vm2335_vm11 = vcmask (!%p214_p3), 1043456   ;;  %vm3465_vm12 = vcmask (!%p214_p3), 57344   ;;  %vm3466_vm13 = vsmask.f32 (!%p214_p3), 256 }
   0xb   : > { %v4431_v8 = vsub.s32 (!%p214_p3), %v1983_v5, %v4418_v2  ;;  %323 = vst.msk [vmem:[#allocation3 + $0x10] sm:$0xff] (!%p214_p3), %vm316_vm9, %v4361_v1  ;;  %324 = vst.msk [vmem:[#allocation3 + $0x18] sm:$0xff] (!%p214_p3), %vm316_vm9, %v4361_v1  ;;  %vm3609_vm15 = vsmask.f32 (!%p214_p3), 7938 }
   0xc   : > { %vm4746_vm14 = vmand (!%p214_p3), %vm3465_vm12, %vm3466_vm13 }
   0xe   : > { %s4964_s12 = smov (!%p266_p4, %s4351_s12), 1 }
   0xf   : > { %s4049_s16 = sshll.u32 %s4964_s12, 3  ;;  %s4215_s20 = sshll.u32 %s4964_s12, 4 }
  0x10   : > { %s284_s19 = scalar_lea.vmem %s4948_s1, %s4049_s16  ;;  %s4450_s23 = scalar_lea.vmem %s4947_s0, %s4215_s20 }
  0x11   : > { %v4133_v6 = vld.sshfl [vmem:[%s284_s19] sm:$0x1 pattern:$0x75316420]  ;;  %s297_s26 = scalar_lea.vmem %s4949_s2, %s4049_s16  ;;  %s4739_s29 = scalar_lea.vmem %s4950_s3, %s4215_s20 }
  0x12   : > { %v4134_v7 = vld.sshfl [vmem:[%s284_s19 + $0x1] sm:$0x1 pattern:$0x75316420]  ;;  %v1987_v11 = vrot.slane %v4133_v6, %v4431_v8 }
  0x13   : > { %v4135_v9 = vld.sshfl [vmem:[%s284_s19 + $0x2] sm:$0x1 pattern:$0x75316420]  ;;  %v2001_v12 = vrot.slane %v4134_v7, %v4431_v8 }
  0x14   : > { %v4136_v10 = vld.sshfl [vmem:[%s284_s19 + $0x3] sm:$0x1 pattern:$0x75316420]  ;;  %v2015_v13 = vrot.slane %v4135_v9, %v4431_v8  ;;  %v4439_v18 = vunpack.c.l.b16 %v1987_v11 }
  0x15   : > { %v4137_v14 = vld.sshfl [vmem:[%s284_s19 + $0x4] sm:$0x1 pattern:$0x75316420]  ;;  %v2029_v15 = vrot.slane %v4136_v10, %v4431_v8  ;;  %v4441_v19 = vunpack.c.l.b16 %v2001_v12 }
  0x16   : > { %v4138_v16 = vld.sshfl [vmem:[%s284_s19 + $0x5] sm:$0x1 pattern:$0x75316420]  ;;  %v2043_v17 = vrot.slane %v4137_v14, %v4431_v8  ;;  %v4443_v20 = vunpack.c.l.b16 %v2015_v13 }
  0x17   : > { %v4139_v21 = vld.sshfl [vmem:[%s284_s19 + $0x6] sm:$0x1 pattern:$0x75316420]  ;;  %v2057_v22 = vrot.slane %v4138_v16, %v4431_v8  ;;  %v4453_v23 = vunpack.c.l.b16 %v2029_v15  ;;  %v2094_v27 = vrot.slane %v4441_v19, 7 }
  0x18   : > { %v4140_v24 = vld.sshfl [vmem:[%s284_s19 + $0x7] sm:$0x1 pattern:$0x75316420]  ;;  %v2071_v25 = vrot.slane %v4139_v21, %v4431_v8  ;;  %v4456_v26 = vunpack.c.l.b16 %v2043_v17  ;;  %v2096_v28 = vrot.slane %v4443_v20, 6  ;;  %v4364_v21 = vmov -inf  }
  0x19   : > { %v2085_v29 = vrot.slane %v4140_v24, %v4431_v8  ;;  %v4461_v30 = vunpack.c.l.b16 %v2057_v22  ;;  %v2098_v31 = vrot.slane %v4453_v23, 5  ;;  %v4465_v32 = vld.sshfl [vmem:[%s4450_s23] sm:$0x1 pattern:$0x76325410]  ;;  %v2095_v34 = vsel %vm1945_vm2, %v2094_v27, %v4439_v18  ;;  %317 = vst.msk [vmem:[#allocation2] sm:$0xff] %vm316_vm9, %v4364_v21 }
  0x1a   : > { %v4467_v33 = vunpack.c.l.b16 %v2071_v25  ;;  %v2100_v35 = vrot.slane %v4456_v26, 4  ;;  %v4473_v36 = vld.sshfl [vmem:[%s4450_s23 + $0x2] sm:$0x1 pattern:$0x76325410]  ;;  %v1936_v37 = vunpack.c.l.b16 %v4465_v32  ;;  %v2097_v39 = vsel %vm1948_vm3, %v2096_v28, %v2095_v34  ;;  %318 = vst.msk [vmem:[#allocation2 + $0x8] sm:$0xff] %vm316_vm9, %v4364_v21 }
  0x1b   : > { %v4476_v38 = vunpack.c.l.b16 %v2085_v29  ;;  %v2102_v40 = vrot.slane %v4461_v30, 3  ;;  %v4481_v41 = vld.sshfl [vmem:[%s4450_s23 + $0x4] sm:$0x1 pattern:$0x76325410]  ;;  %v1937_v42 = vunpack.c.l.b16 %v4473_v36  ;;  %v2099_v43 = vsel %vm1951_vm4, %v2098_v31, %v2097_v39  ;;  %319 = vst.msk [vmem:[#allocation2 + $0x10] sm:$0xff] %vm316_vm9, %v4364_v21 }
  0x1c   : > { %v2104_v44 = vrot.slane %v4467_v33, 2  ;;  %v4487_v45 = vld.sshfl [vmem:[%s4450_s23 + $0x6] sm:$0x1 pattern:$0x76325410]  ;;  %v1938_v46 = vunpack.c.l.b16 %v4481_v41  ;;  %v2101_v47 = vsel %vm1954_vm5, %v2100_v35, %v2099_v43  ;;  %320 = vst.msk [vmem:[#allocation2 + $0x18] sm:$0xff] %vm316_vm9, %v4364_v21 }
  0x1d   : > { %v2106_v48 = vrot.slane %v4476_v38, 1  ;;  %v4493_v49 = vld.sshfl [vmem:[%s4450_s23 + $0x8] sm:$0x1 pattern:$0x76325410]  ;;  %v1939_v50 = vunpack.c.l.b16 %v4487_v45  ;;  %v1944_v51 = vrot.slane %v1937_v42, 7  ;;  %v2103_v52 = vsel %vm1957_vm6, %v2102_v40, %v2101_v47 }
  0x1e   : > { %v4500_v53 = vld.sshfl [vmem:[%s4450_s23 + $0xa] sm:$0x1 pattern:$0x76325410]  ;;  %v1940_v54 = vunpack.c.l.b16 %v4493_v49  ;;  %v1947_v55 = vrot.slane %v1938_v46, 6  ;;  %v2105_v56 = vsel %vm1960_vm7, %v2104_v44, %v2103_v52  ;;  %v4556_v22 = vand.u32 127, %v1839_v0 }
  0x1f   : > { %v4507_v57 = vld.sshfl [vmem:[%s4450_s23 + $0xc] sm:$0x1 pattern:$0x76325410]  ;;  %v1941_v58 = vunpack.c.l.b16 %v4500_v53  ;;  %v1946_v59 = vsel %vm1945_vm2, %v1944_v51, %v1936_v37  ;;  %v1950_v60 = vrot.slane %v1939_v50, 5  ;;  %v2107_v61 = vsel %vm1963_vm8, %v2106_v48, %v2105_v56 }
  0x20   : > { %v4517_v62 = vld.sshfl [vmem:[%s4450_s23 + $0xe] sm:$0x1 pattern:$0x76325410]  ;;  %v1942_v63 = vunpack.c.l.b16 %v4507_v57  ;;  %v1949_v3 = vsel %vm1948_vm3, %v1947_v55, %v1946_v59  ;;  %v1953_v4 = vrot.slane %v1940_v54, 4  ;;  %v2108_v5 = vpack.c.b16 %v2107_v61, %v2107_v61 }
  0x21   : > { %v1943_v6 = vunpack.c.l.b16 %v4517_v62  ;;  %v1952_v7 = vsel %vm1951_vm4, %v1950_v60, %v1949_v3  ;;  %v1956_v9 = vrot.slane %v1941_v58, 3  ;;  %vm1847_vm10 = vcmp.le.s32.totalorder %v4556_v22, %v4418_v2  ;;  %v4143_v0 = vld.sshfl [vmem:[%s297_s26 + $0x1] sm:$0x1 pattern:$0x75316420]  ;;  %v4574_v44 = vld [vmem:[#allocation2] sm:$0xff] }
  0x22   : > { %v1955_v10 = vsel %vm1954_vm5, %v1953_v4, %v1952_v7  ;;  %v1959_v11 = vrot.slane %v1942_v63, 2  ;;  %v4531_v12 = vsel %vm325_vm0, %v2108_v5, 0  ;;  %v4365_v34 = vmov 0  }
  0x23   : > { %v1958_v13 = vsel %vm1957_vm6, %v1956_v9, %v1955_v10  ;;  %v1962_v14 = vrot.slane %v1943_v6, 1  ;;  %4234 = vmatpush3.bf16.xpose.msra.mxu0 %v4531_v12  ;;  %4311 = vset.pattern.permute.xlu0 %v4365_v34  ;;  %v4144_v35 = vld.sshfl [vmem:[%s297_s26 + $0x2] sm:$0x1 pattern:$0x75316420]  ;;  %v2224_v39 = vrot.slane %v4143_v0, %v4431_v8  ;;  %v2848_v45 = vrot.slane %v4461_v30, 4 }
  0x24   : > { %v1961_v15 = vsel %vm1960_vm7, %v1959_v11, %v1958_v13  ;;  %4251 = vmatprep.subr.bf16.mxu0 %v4361_v1  ;;  %4312 = vset.pattern.permute.xlu1 %v4365_v34  ;;  %v4142_v40 = vld.sshfl [vmem:[%s297_s26] sm:$0x1 pattern:$0x75316420]  ;;  %v2238_v43 = vrot.slane %v4144_v35, %v4431_v8  ;;  %v2850_v49 = vrot.slane %v4467_v33, 3  ;;  %v2474_v57 = vrot.slane %v1943_v6, 2 }
  0x25   : > { %v1964_v16 = vsel %vm1963_vm8, %v1962_v14, %v1961_v15  ;;  %v4145_v47 = vld.sshfl [vmem:[%s297_s26 + $0x3] sm:$0x1 pattern:$0x75316420]  ;;  %v2210_v48 = vrot.slane %v4142_v40, %v4431_v8  ;;  %v2310_v51 = vunpack.c.l.b16 %v2224_v39 }
  0x26   : > { %v1965_v17 = vpack.c.b16 %v1964_v16, %v1964_v16  ;;  %v4146_v52 = vld.sshfl [vmem:[%s297_s26 + $0x4] sm:$0x1 pattern:$0x75316420]  ;;  %v2252_v55 = vrot.slane %v4145_v47, %v4431_v8  ;;  %v2311_v56 = vunpack.c.l.b16 %v2238_v43 }
  0x27   : > { %v4147_v60 = vld.sshfl [vmem:[%s297_s26 + $0x5] sm:$0x1 pattern:$0x75316420]  ;;  %v2266_v61 = vrot.slane %v4146_v52, %v4431_v8  ;;  %v2309_v3 = vunpack.c.l.b16 %v2210_v48  ;;  %v2317_v4 = vrot.slane %v2310_v51, 7 }
  0x28   : > { %v4148_v7 = vld.sshfl [vmem:[%s297_s26 + $0x6] sm:$0x1 pattern:$0x75316420]  ;;  %v2280_v9 = vrot.slane %v4147_v60, %v4431_v8  ;;  %v2312_v10 = vunpack.c.l.b16 %v2252_v55  ;;  %v2319_v11 = vrot.slane %v2311_v56, 6  ;;  %v3066_v52 = vrot.slane %v2311_v56, 7 }
  0x29   : > { %v4149_v13 = vld.sshfl [vmem:[%s297_s26 + $0x7] sm:$0x1 pattern:$0x75316420]  ;;  %v2294_v14 = vrot.slane %v4148_v7, %v4431_v8  ;;  %v2313_v15 = vunpack.c.l.b16 %v2266_v61  ;;  %v2318_v16 = vsel %vm1945_vm2, %v2317_v4, %v2309_v3  ;;  %v3064_v48 = vrot.slane %v2309_v3, 1 }
  0x2a   : > { %4236 = vmatmul.mubr.msk.bf16.vlgmr.msra.gmra.mrb[0].mxu0 %vm325_vm0, %v1965_v17  ;;  %v2308_v21 = vrot.slane %v4149_v13, %v4431_v8  ;;  %v3068_v55 = vrot.slane %v2312_v10, 6  ;;  %v3268_v22 = vld [vmem:[#allocation2 + $0x18] sm:$0xff] }
  0x2b   : > { %4253 = vmatprep.mubr.msk.bf16.mxu0 %vm4363_vm1, %v4361_v1  ;;  %v3070_v60 = vrot.slane %v2313_v15, 5  ;;  %v3065_v4 = vsel %vm1945_vm2, %v2310_v51, %v3064_v48  ;;  %v4164_v48 = vld.sshfl [vmem:[%s4450_s23 + $0x6] sm:$0x2 pattern:$0x76325410] }
  0x2c   : > { %v2316_v34 = vunpack.c.l.b16 %v2308_v21 }
  0x2e   : > { %v2329_v43 = vrot.slane %v2316_v34, 1 }
  0xfd   : > { %v2150_v24 = vpop.f32.mrb[0].mxu0 }
  0xfe   : > { %v4563_v25 = vsel %vm1847_vm10, %v2150_v24, -1e+30  ;;  %v4237_v27 = vpop.f32.mrb[1].mxu0  ;;  %v2314_v24 = vunpack.c.l.b16 %v2280_v9 }
  0xff   : > { %v2153_v28 = vpop.f32.mrb[2].mxu0  ;;  %v2159_v29 = vsel %vm325_vm0, %v4563_v25, -inf  ;;  %v2320_v27 = vsel %vm1948_vm3, %v2319_v11, %v2318_v16  ;;  %v3067_v11 = vsel %vm1948_vm3, %v3066_v52, %v3065_v4  ;;  %v3076_v16 = vrot.slane %v2316_v34, 2 }
 0x100   : > { %2160 = vmax.xlane.f32.xlu0 %v2159_v29  ;;  %v4238_v31 = vpop.f32.mrb[3].mxu0  ;;  %v2315_v28 = vunpack.c.l.b16 %v2294_v14  ;;  %v2321_v29 = vrot.slane %v2312_v10, 5  ;;  %v2325_v0 = vrot.slane %v2314_v24, 3  ;;  %v3072_v7 = vrot.slane %v2314_v24, 4 }
 0x101   : > { %v2323_v31 = vrot.slane %v2313_v15, 4  ;;  %v3069_v14 = vsel %vm1951_vm4, %v3068_v55, %v3067_v11  ;;  %v4162_v34 = vld.sshfl [vmem:[%s4450_s23 + $0x2] sm:$0x2 pattern:$0x76325410]  ;;  %v2468_v52 = vrot.slane %v1940_v54, 5 }
 0x102   : > { %v2322_v35 = vsel %vm1951_vm4, %v2321_v29, %v2320_v27  ;;  %v2327_v39 = vrot.slane %v2315_v28, 2  ;;  %v3074_v13 = vrot.slane %v2315_v28, 3  ;;  %v3071_v3 = vsel %vm1954_vm5, %v3070_v60, %v3069_v14  ;;  %v4161_v29 = vld.sshfl [vmem:[%s4450_s23] sm:$0x2 pattern:$0x76325410] }
 0x103   : > { %v2324_v40 = vsel %vm1954_vm5, %v2323_v31, %v2322_v35  ;;  %v3073_v10 = vsel %vm1957_vm6, %v3072_v7, %v3071_v3  ;;  %v2840_v27 = vrot.slane %v4439_v18, 1  ;;  %v2462_v28 = vrot.slane %v1936_v37, 1  ;;  %v4166_v54 = vld.sshfl [vmem:[%s4450_s23 + $0xa] sm:$0x2 pattern:$0x76325410] }
 0x104   : > { %v2326_v47 = vsel %vm1957_vm6, %v2325_v0, %v2324_v40  ;;  %v3075_v51 = vsel %vm1960_vm7, %v3074_v13, %v3073_v10  ;;  %v2842_v31 = vrot.slane %v4443_v20, 7  ;;  %v2464_v18 = vrot.slane %v1938_v46, 7  ;;  %v4163_v46 = vld.sshfl [vmem:[%s4450_s23 + $0x4] sm:$0x2 pattern:$0x76325410] }
 0x105   : > { %v3077_v15 = vsel %vm1963_vm8, %v3076_v16, %v3075_v51  ;;  %v2841_v0 = vsel %vm1945_vm2, %v4441_v19, %v2840_v27  ;;  %v2844_v37 = vrot.slane %v4453_v23, 6  ;;  %v2689_v40 = vunpack.c.l.b16 %v4161_v29  ;;  %v4167_v16 = vld.sshfl [vmem:[%s4450_s23 + $0xc] sm:$0x2 pattern:$0x76325410] }
 0x106   : > { %v3078_v21 = vpack.c.b16 %v3077_v15, %v3077_v15  ;;  %v2690_v20 = vunpack.c.l.b16 %v4162_v34  ;;  %v2466_v19 = vrot.slane %v1939_v50, 6  ;;  %v4165_v50 = vld.sshfl [vmem:[%s4450_s23 + $0x8] sm:$0x2 pattern:$0x76325410]  ;;  %v2691_v60 = vunpack.c.l.b16 %v4163_v46 }
 0x107   : > { %v2697_v23 = vrot.slane %v2689_v40, 2  ;;  %v2472_v13 = vrot.slane %v1942_v63, 3  ;;  %v2852_v14 = vrot.slane %v4476_v38, 2  ;;  %v3208_v3 = vrot.slane %v2689_v40, 3 }
 0x108   : > { %v4608_v24 = vsel %vm2335_vm11, %v3078_v21, 0  ;;  %v3209_v10 = vrot.slane %v2690_v20, 2  ;;  %v4168_v27 = vld.sshfl [vmem:[%s4450_s23 + $0xe] sm:$0x2 pattern:$0x76325410] }
 0x109   : > { %v3211_v29 = vrot.slane %v2691_v60, 1 }
 0x18d   : > { %v2161_v59 = vpop.xlane.xlu0 %2160 }
 0x18e   : > { %v4580_v5 = vmax.f32 %v4574_v44, %v2161_v59  ;;  %v2328_v59 = vsel %vm1960_vm7, %v2327_v39, %v2326_v47  ;;  %v2463_v39 = vsel %vm1945_vm2, %v1937_v42, %v2462_v28  ;;  %v2846_v42 = vrot.slane %v4456_v26, 5 }
 0x18f   : > { %v2330_v61 = vsel %vm1963_vm8, %v2329_v43, %v2328_v59  ;;  %v2843_v43 = vsel %vm1948_vm3, %v2842_v31, %v2841_v0  ;;  %v2465_v36 = vsel %vm1948_vm3, %v2464_v18, %v2463_v39  ;;  %v2692_v59 = vunpack.c.l.b16 %v4164_v48 }
 0x190   : > { %v2163_v17 = vsub.f32 %v4574_v44, %v4580_v5  ;;  %2381 = vst.msk [vmem:[#allocation2] sm:$0xff] %vm316_vm9, %v4580_v5  ;;  %2168 = vperm.xlu0 %4311, %v4580_v5   ;;  %v2331_v9 = vpack.c.b16 %v2330_v61, %v2330_v61  ;;  %v2845_v41 = vsel %vm1951_vm4, %v2844_v37, %v2843_v43  ;;  %v2470_v61 = vrot.slane %v1941_v58, 4 }
 0x191   : > { %v2467_v55 = vsel %vm1951_vm4, %v2466_v19, %v2465_v36  ;;  %v2847_v26 = vsel %vm1954_vm5, %v2846_v42, %v2845_v41  ;;  %v2701_v30 = vrot.slane %v2692_v59, 7  ;;  %v2695_v28 = vunpack.c.l.b16 %v4167_v16 }
 0x192   : > { %v2337_v56 = vsel %vm2335_vm11, %v2331_v9, 0  ;;  %v2469_v7 = vsel %vm1954_vm5, %v2468_v52, %v2467_v55  ;;  %v2693_v9 = vunpack.c.l.b16 %v4165_v50  ;;  %v2849_v11 = vsel %vm1957_vm6, %v2848_v45, %v2847_v26 }
 0x193   : > { %4240 = vmatpush3.bf16.msra.mxu1 %v2337_v56  ;;  %4252 = vmatpush3.bf16.msra.mxu0 %v2337_v56  ;;  %v2471_v58 = vsel %vm1957_vm6, %v2470_v61, %v2469_v7  ;;  %v2694_v56 = vunpack.c.l.b16 %v4166_v54  ;;  %v2851_v33 = vsel %vm1960_vm7, %v2850_v49, %v2849_v11  ;;  %v3210_v0 = vsel %vm1945_vm2, %v3209_v10, %v3208_v3 }
 0x194   : > { %4245 = vmatprep.subr.bf16.mxu1 %v4361_v1  ;;  %4263 = vmatprep.subr.bf16.mxu0 %v4361_v1  ;;  %v2703_v51 = vrot.slane %v2693_v9, 6  ;;  %v2473_v21 = vsel %vm1960_vm7, %v2472_v13, %v2471_v58  ;;  %v2853_v31 = vsel %vm1963_vm8, %v2852_v14, %v2851_v33  ;;  %v2707_v18 = vrot.slane %v2695_v28, 4 }
 0x195   : > { %v2705_v34 = vrot.slane %v2694_v56, 5  ;;  %v2475_v6 = vsel %vm1963_vm8, %v2474_v57, %v2473_v21  ;;  %v2854_v39 = vpack.c.b16 %v2853_v31, %v2853_v31  ;;  %v3216_v36 = vrot.slane %v2694_v56, 6  ;;  %v2522_v57 = vld [vmem:[#allocation2 + $0x8] sm:$0xff] }
 0x196   : > { %v2476_v40 = vpack.c.b16 %v2475_v6, %v2475_v6  ;;  %v3218_v41 = vrot.slane %v2695_v28, 5 }
 0x20f   : > { %v2169_v35 = vpop.permute.xlu0 %2168 }
 0x210   : > { %v2171_v32 = vsub.f32 %v4563_v25, %v2169_v35  ;;  %v2698_v25 = vrot.slane %v2690_v20, 1  ;;  %v2696_v35 = vunpack.c.l.b16 %v4168_v27  ;;  %v3214_v20 = vrot.slane %v2693_v9, 7  ;;  %v2903_v27 = vld [vmem:[#allocation2 + $0x10] sm:$0xff] }
 0x212   : > { %v2172_v47 = vmul.f32 1.442695, %v2171_v32  ;;  %v2699_v4 = vsel %vm1945_vm2, %v2698_v25, %v2697_v23  ;;  %v3212_v32 = vsel %vm1948_vm3, %v3211_v29, %v3210_v0  ;;  %v2709_v43 = vrot.slane %v2696_v35, 3 }
 0x213   : > { %v2700_v53 = vsel %vm1948_vm3, %v2691_v60, %v2699_v4  ;;  %v3220_v25 = vrot.slane %v2696_v35, 4  ;;  %vm3753_vm2 = vsmask.f32 1280 }
 0x214   : > { %4313 = vpow2.f32 %v2172_v47  ;;  %v2702_v63 = vsel %vm1951_vm4, %v2701_v30, %v2700_v53  ;;  %v3213_v47 = vsel %vm1951_vm4, %v2692_v59, %v3212_v32  ;;  %vm3896_vm4 = vsmask.f32 7942 }
 0x215   : > { %v2704_v62 = vsel %vm1954_vm5, %v2703_v51, %v2702_v63  ;;  %v3215_v42 = vsel %vm1954_vm5, %v3214_v20, %v3213_v47 }
 0x216   : > { %v2706_v37 = vsel %vm1957_vm6, %v2705_v34, %v2704_v62  ;;  %v3217_v46 = vsel %vm1957_vm6, %v3216_v36, %v3215_v42  ;;  %v2164_v42 = vmul.f32 1.442695, %v2163_v17 }
 0x217   : > { %v2708_v19 = vsel %vm1960_vm7, %v2707_v18, %v2706_v37  ;;  %v3219_v52 = vsel %vm1960_vm7, %v3218_v41, %v3217_v46 }
 0x218   : > { %v2710_v48 = vsel %vm1963_vm8, %v2709_v43, %v2708_v19  ;;  %v3221_v55 = vsel %vm1963_vm8, %v3220_v25, %v3219_v52 }
 0x219   : > { %v2711_v23 = vpack.c.b16 %v2710_v48, %v2710_v48  ;;  %v3222_v45 = vpack.c.b16 %v3221_v55, %v3221_v55 }
 0x21e   : > { %v4653_v15 = vpop.eup %4313 }
 0x21f   : > { %v2188_v38 = vpack.c.bf16 %v4653_v15, %v4653_v15  ;;  %v2175_v6 = vsel %vm325_vm0, %v4653_v15, 0.0 }
 0x221   : > { %4242 = vmatmul.mubr.msk.bf16.vlgmr.msra.gmra.mrb[0].mxu1 %vm325_vm0, %v2188_v38 }
 0x222   : > { %4246 = vmatpush3.bf16.xpose.msra.mxu1 %v4531_v12  ;;  %4247 = vmatprep.mubr.msk.bf16.mxu1 %vm4363_vm1, %v4361_v1  ;;  %v2859_v12 = vsel %vm325_vm0, %v2854_v39, 0 }
 0x223   : > { %4257 = vmatprep.subr.bf16.mxu1 %v4361_v1 }
 0x229   : > { %4248 = vmatmul.mubr.msk.bf16.vlgmr.msra.gmra.mrb[4].mxu1 %vm325_vm0, %v2476_v40 }
 0x22a   : > { %4258 = vmatpush3.bf16.xpose.msra.mxu1 %v2859_v12  ;;  %4259 = vmatprep.mubr.msk.bf16.mxu1 %vm4363_vm1, %v4361_v1 }
 0x22b   : > { %4269 = vmatprep.subr.bf16.mxu1 %v4361_v1 }
 0x231   : > { %4260 = vmatmul.mubr.msk.bf16.vlgmr.msra.gmra.mrb[8].mxu1 %vm325_vm0, %v2711_v23 }
 0x232   : > { %4270 = vmatpush3.bf16.xpose.msra.mxu1 %v2859_v12  ;;  %4271 = vmatprep.mubr.msk.bf16.mxu1 %vm4363_vm1, %v4361_v1 }
 0x239   : > { %4272 = vmatmul.mubr.msk.bf16.vlgmr.msra.gmra.mrb[12].mxu1 %vm325_vm0, %v3222_v45  ;;  %v2158_v45 = vld [vmem:[#allocation3] sm:$0xff] }
 0x2f4   : > { %v4689_v50 = vpop.f32.mrb[0].mxu1 }
 0x2f5   : > { %v4243_v59 = vpop.f32.mrb[1].mxu1 }
 0x2f6   : > { %v2376_v26 = vpop.f32.mrb[2].mxu1 }
 0x2f7   : > { %v4244_v60 = vpop.f32.mrb[3].mxu1 }
 0x2fc   : > { %v2514_v61 = vpop.f32.mrb[4].mxu1 }
 0x2fd   : > { %v2520_v4 = vsel %vm1847_vm10, %v2514_v61, -1e+30  ;;  %v4249_v7 = vpop.f32.mrb[5].mxu1 }
 0x2fe   : > { %v2517_v49 = vpop.f32.mrb[6].mxu1  ;;  %v2525_v54 = vsel %vm325_vm0, %v2520_v4, -inf  ;;  %v2524_v7 = vld [vmem:[#allocation3 + $0x8] sm:$0xff] }
 0x2ff   : > { %2526 = vmax.xlane.f32.xlu1 %v2525_v54  ;;  %v4250_v9 = vpop.f32.mrb[7].mxu1 }
 0x304   : > { %v2895_v11 = vpop.f32.mrb[8].mxu1 }
 0x305   : > { %v2901_v30 = vsel %vm1847_vm10, %v2895_v11, -1e+30  ;;  %v4261_v13 = vpop.f32.mrb[9].mxu1  ;;  %v2905_v11 = vld [vmem:[#allocation3 + $0x10] sm:$0xff] }
 0x306   : > { %v2898_v14 = vpop.f32.mrb[10].mxu1  ;;  %v2906_v53 = vsel %vm325_vm0, %v2901_v30, -inf }
 0x307   : > { %2907 = vmax.xlane.f32.xlu1 %v2906_v53  ;;  %v4262_v58 = vpop.f32.mrb[11].mxu1 }
 0x30c   : > { %v3260_v16 = vpop.f32.mrb[12].mxu1 }
 0x30d   : > { %v3266_v56 = vsel %vm1847_vm10, %v3260_v16, -1e+30  ;;  %v4273_v3 = vpop.f32.mrb[13].mxu1 }
 0x30e   : > { %v3263_v10 = vpop.f32.mrb[14].mxu1  ;;  %v3271_v33 = vsel %vm325_vm0, %v3266_v56, -inf }
 0x30f   : > { %3272 = vmax.xlane.f32.xlu1 %v3271_v33  ;;  %v4274_v51 = vpop.f32.mrb[15].mxu1  ;;  %v3270_v10 = vld [vmem:[#allocation3 + $0x18] sm:$0xff] }
 0x38c   : > { %v2527_v63 = vpop.xlane.xlu1 %2526 }
 0x38d   : > { %v2528_v38 = vmax.f32 %v2522_v57, %v2527_v63 }
 0x38f   : > { %v2529_v21 = vsub.f32 %v2522_v57, %v2528_v38  ;;  %2600 = vst.msk [vmem:[#allocation2 + $0x8] sm:$0xff] %vm316_vm9, %v2528_v38  ;;  %2534 = vperm.xlu1 %4312, %v2528_v38  }
 0x391   : > { %v2530_v44 = vmul.f32 1.442695, %v2529_v21 }
 0x394   : > { %v2908_v28 = vpop.xlane.xlu1 %2907 }
 0x395   : > { %v2909_v29 = vmax.f32 %v2903_v27, %v2908_v28 }
 0x397   : > { %v2910_v31 = vsub.f32 %v2903_v27, %v2909_v29  ;;  %3127 = vst.msk [vmem:[#allocation2 + $0x10] sm:$0xff] %vm316_vm9, %v2909_v29  ;;  %2915 = vperm.xlu1 %4312, %v2909_v29  }
 0x399   : > { %v2911_v46 = vmul.f32 1.442695, %v2910_v31 }
 0x39c   : > { %v3273_v34 = vpop.xlane.xlu1 %3272 }
 0x39d   : > { %v3274_v0 = vmax.f32 %v3268_v22, %v3273_v34 }
 0x39f   : > { %v3275_v62 = vsub.f32 %v3268_v22, %v3274_v0  ;;  %3346 = vst.msk [vmem:[#allocation2 + $0x18] sm:$0xff] %vm316_vm9, %v3274_v0  ;;  %3280 = vperm.xlu1 %4312, %v3274_v0   ;;  %v4366_v22 = vmov 857870592  }
 0x3a0   : > { %v3402_v34 = vunpack.c.l.s4 %v4366_v22 }
 0x3a1   : > { %v3276_v17 = vmul.f32 1.442695, %v3275_v62 }
 0x3c3   : > { %2176 = vadd.xlane.f32.xlu1 %v2175_v6 }
 0x40e   : > { %v2535_v35 = vpop.permute.xlu1 %2534 }
 0x40f   : > { %v2537_v39 = vsub.f32 %v2520_v4, %v2535_v35  ;;  %v3403_v35 = vunpack.c.0.s8 %v3402_v34 }
 0x411   : > { %v2538_v18 = vmul.f32 1.442695, %v2537_v39 }
 0x413   : > { %4315 = vpow2.f32 %v2538_v18 }
 0x416   : > { %v2916_v32 = vpop.permute.xlu1 %2915 }
 0x417   : > { %v2918_v37 = vsub.f32 %v2901_v30, %v2916_v32  ;;  %v2181_v30 = vld [vmem:[#allocation4] sm:$0xff] }
 0x419   : > { %v2919_v40 = vmul.f32 1.442695, %v2918_v37  ;;  %v4742_v37 = vsub.s32 %v3403_v35, %v4418_v2 }
 0x41b   : > { %4317 = vpow2.f32 %v2919_v40  ;;  %v2547_v40 = vld [vmem:[#allocation4 + $0x8] sm:$0xff] }
 0x41d   : > { %v4316_v20 = vpop.eup %4315 }
 0x41e   : > { %v3281_v43 = vpop.permute.xlu1 %3280  ;;  %v2541_v47 = vsel %vm325_vm0, %v4316_v20, 0.0  ;;  %v2554_v12 = vpack.c.bf16 %v4316_v20, %v4316_v20 }
 0x41f   : > { %v3283_v19 = vsub.f32 %v3266_v56, %v3281_v43  ;;  %2542 = vadd.xlane.f32.xlu0 %v2541_v47 }
 0x420   : > { %4254 = vmatmul.mubr.msk.bf16.vlgmr.msra.gmra.mrb[4].mxu0 %vm325_vm0, %v2554_v12 }
 0x421   : > { %v3284_v36 = vmul.f32 1.442695, %v3283_v19  ;;  %4264 = vmatpush3.bf16.msra.mxu0 %v4608_v24  ;;  %4265 = vmatprep.mubr.msk.bf16.mxu0 %vm4363_vm1, %v4361_v1 }
 0x422   : > { %4275 = vmatprep.subr.bf16.mxu0 %v4361_v1 }
 0x423   : > { %4319 = vpow2.f32 %v3284_v36  ;;  %v3468_v36 = vld [vmem:[%s4739_s29] sm:$0x1] }
 0x424   : > { %4321 = vpow2.f32 %v2164_v42 }
 0x425   : > { %v4318_v15 = vpop.eup %4317  ;;  %4323 = vpow2.f32 %v2911_v46  ;;  %v3471_v46 = vld [vmem:[%s4739_s29 + $0x2] sm:$0x1] }
 0x426   : > { %v2922_v48 = vsel %vm325_vm0, %v4318_v15, 0.0  ;;  %v2935_v41 = vpack.c.bf16 %v4318_v15, %v4318_v15  ;;  %4325 = vpow2.f32 %v2530_v44  ;;  %v3474_v44 = vld [vmem:[%s4739_s29 + $0x4] sm:$0x1] }
 0x427   : > { %2923 = vadd.xlane.f32.xlu1 %v2922_v48  ;;  %4327 = vpow2.f32 %v3276_v17  ;;  %v3480_v17 = vld [vmem:[%s4739_s29 + $0x8] sm:$0x1] }
 0x428   : > { %4266 = vmatmul.mubr.msk.bf16.vlgmr.msra.gmra.mrb[8].mxu0 %vm325_vm0, %v2935_v41 }
 0x429   : > { %4276 = vmatpush3.bf16.msra.mxu0 %v4608_v24  ;;  %4277 = vmatprep.mubr.msk.bf16.mxu0 %vm4363_vm1, %v4361_v1  ;;  %vm3752_vm1 = vcmask 58369  }
 0x42a   : > { %vm4846_vm3 = vmand %vm3752_vm1, %vm3753_vm2 }
 0x42b   : > { %vm4894_vm5 = vmand %vm3752_vm1, %vm3896_vm4 }
 0x42d   : > { %v4320_v23 = vpop.eup %4319 }
 0x42e   : > { %v3287_v25 = vsel %vm325_vm0, %v4320_v23, 0.0  ;;  %v3300_v52 = vpack.c.bf16 %v4320_v23, %v4320_v23  ;;  %v4322_v5 = vpop.eup %4321 }
 0x42f   : > { %3288 = vadd.xlane.f32.xlu1 %v3287_v25  ;;  %v4324_v55 = vpop.eup %4323  ;;  %v2174_v59 = vmul.f32 %v4322_v5, %v2158_v45 }
 0x430   : > { %4278 = vmatmul.mubr.msk.bf16.vlgmr.msra.gmra.mrb[12].mxu0 %vm325_vm0, %v3300_v52  ;;  %v4326_v24 = vpop.eup %4325  ;;  %v2921_v13 = vmul.f32 %v4324_v55, %v2905_v11 }
 0x431   : > { %v4328_v1 = vpop.eup %4327  ;;  %v2540_v49 = vmul.f32 %v4326_v24, %v2524_v7 }
 0x432   : > { %v3286_v33 = vmul.f32 %v4328_v1, %v3270_v10 }
 0x435   : > { %2184 = vperm.xlu0 %4311, %v4322_v5   ;;  %v3477_v5 = vld [vmem:[%s4739_s29 + $0x6] sm:$0x1] }
 0x439   : > { %2931 = vperm.xlu0 %4311, %v4324_v55  }
 0x440   : > { %2550 = vperm.xlu1 %4312, %v4326_v24  }
 0x444   : > { %3296 = vperm.xlu1 %4312, %v4328_v1  }
 0x450   : > { %v2177_v26 = vpop.xlane.xlu1 %2176 }
 0x451   : > { %v2178_v60 = vadd.f32 %v2177_v26, %v2174_v59  ;;  %v3483_v59 = vld [vmem:[%s4739_s29 + $0xa] sm:$0x1]  ;;  %v3486_v26 = vld [vmem:[%s4739_s29 + $0xc] sm:$0x1] }
 0x453   : > { %2180 = vst.msk [vmem:[#allocation3] sm:$0xff] %vm316_vm9, %v2178_v60 }
 0x45a   : > { %v3350_v61 = vld [vmem:[#allocation3] sm:$0xff] }
 0x45b   : > { %4329 = vrcp.f32 %v3350_v61 }
 0x465   : > { %v4330_v4 = vpop.eup %4329 }
 0x466   : > { %3355 = vperm.xlu1 %4312, %v4330_v4  }
 0x4ac   : > { %v2543_v54 = vpop.xlane.xlu0 %2542 }
 0x4ad   : > { %v2544_v9 = vadd.f32 %v2543_v54, %v2540_v49 }
 0x4af   : > { %2545 = vst.msk [vmem:[#allocation3 + $0x8] sm:$0xff] %vm316_vm9, %v2544_v9 }
 0x4b4   : > { %v2924_v14 = vpop.xlane.xlu1 %2923  ;;  %v2185_v53 = vpop.permute.xlu0 %2184 }
 0x4b5   : > { %v2925_v58 = vadd.f32 %v2924_v14, %v2921_v13  ;;  %v2187_v16 = vmul.f32 %v2185_v53, %v2181_v30  ;;  %v3489_v14 = vld [vmem:[%s4739_s29 + $0xe] sm:$0x1] }
 0x4b6   : > { %v3493_v56 = vld [vmem:[#allocation3 + $0x8] sm:$0xff] }
 0x4b7   : > { %2926 = vst.msk [vmem:[#allocation3 + $0x10] sm:$0xff] %vm316_vm9, %v2925_v58  ;;  %v2379_v3 = vadd.f32 %v4689_v50, %v2187_v16  ;;  %4331 = vrcp.f32 %v3493_v56 }
 0x4b9   : > { %2380 = vst.msk [vmem:[#allocation4] sm:$0xff] %vm325_vm0, %v2379_v3 }
 0x4bc   : > { %v3289_v51 = vpop.xlane.xlu1 %3288 }
 0x4bd   : > { %v3290_v57 = vadd.f32 %v3289_v51, %v3286_v33 }
 0x4be   : > { %v3636_v63 = vld [vmem:[#allocation3 + $0x10] sm:$0xff] }
 0x4bf   : > { %3291 = vst.msk [vmem:[#allocation3 + $0x18] sm:$0xff] %vm316_vm9, %v3290_v57  ;;  %4333 = vrcp.f32 %v3636_v63 }
 0x4c0   : > { %v2551_v50 = vpop.permute.xlu1 %2550  ;;  %v3352_v31 = vld [vmem:[#allocation4] sm:$0xff] }
 0x4c1   : > { %v4332_v38 = vpop.eup %4331  ;;  %v2553_v41 = vmul.f32 %v2551_v50, %v2547_v40 }
 0x4c2   : > { %3499 = vperm.xlu0 %4311, %v4332_v38   ;;  %v2928_v38 = vld [vmem:[#allocation4 + $0x10] sm:$0xff] }
 0x4c4   : > { %v4730_v29 = vpop.permute.xlu1 %3296 }
 0x4c6   : > { %v3780_v21 = vld [vmem:[#allocation3 + $0x18] sm:$0xff] }
 0x4c7   : > { %4335 = vrcp.f32 %v3780_v21  ;;  %v2932_v21 = vpop.permute.xlu0 %2931 }
 0x4c9   : > { %v4334_v27 = vpop.eup %4333 }
 0x4ca   : > { %3642 = vperm.xlu1 %4312, %v4334_v27  }
 0x4d1   : > { %v4336_v28 = vpop.eup %4335 }
 0x4d2   : > { %3786 = vperm.xlu0 %4311, %v4336_v28   ;;  %v2934_v28 = vmul.f32 %v2932_v21, %v2928_v38 }
 0x4e5   : > { %v3356_v0 = vpop.permute.xlu1 %3355 }
 0x4e6   : > { %v3358_v62 = vmul.f32 %v3356_v0, %v3352_v31 }
 0x4e8   : > { %v3359_v6 = vpack.c.bf16 %v3358_v62, %v3358_v62  ;;  %v3293_v62 = vld [vmem:[#allocation4 + $0x18] sm:$0xff] }
 0x4ea   : > { %v3367_v39 = vrot.slane %v3359_v6, %v4431_v8  ;;  %v3299_v6 = vmul.f32 %v4730_v29, %v3293_v62 }
 0x4ec   : > { %v3368_v18 = vcombine.high %v3367_v39, %v3367_v39  ;;  %v3375_v32 = vrot.slane %v3367_v39, %v4431_v8 }
 0x4ee   : > { %v3382_v20 = vrot.slane %v3368_v18, %v4431_v8  ;;  %v3383_v43 = vcombine.high %v3375_v32, %v3375_v32  ;;  %v3386_v47 = vunpack.i.h.s16 %v3375_v32  ;;  %v4197_v12 = vpack.i.b16 %v3375_v32, %v3375_v32 }
 0x4f0   : > { %v3384_v15 = vcombine.high %v3382_v20, %v3382_v20  ;;  %v3388_v2 = vunpack.i.h.s16 %v3382_v20  ;;  %v3390_v42 = vunpack.i.h.s16 %v3383_v43  ;;  %v3394_v48 = vpack.i.b16 %v3386_v47, %v3386_v47 }
 0x4f1   : > { %v4198_v23 = vpack.i.b16 %v3382_v20, %v3382_v20  ;;  %v4199_v25 = vpack.i.b16 %v3383_v43, %v3383_v43  ;;  %v3407_v52 = vrot.slane %v4197_v12, %v4742_v37 }
 0x4f2   : > { %v3392_v55 = vunpack.i.h.s16 %v3384_v15  ;;  %v3396_v24 = vpack.i.b16 %v3388_v2, %v3388_v2  ;;  %v3398_v1 = vpack.i.b16 %v3390_v42, %v3390_v42  ;;  %v4200_v45 = vpack.i.b16 %v3384_v15, %v3384_v15 }
 0x4f3   : > { %v3414_v60 = vrot.slane %v3394_v48, %v4742_v37  ;;  %v3421_v61 = vrot.slane %v4198_v23, %v4742_v37  ;;  %v3435_v4 = vrot.slane %v4199_v25, %v4742_v37  ;;  %v3469_v7 = vsel %vm4746_vm14, %v3407_v52, %v3468_v36  ;;  %v2592_v49 = vpop.f32.mrb[4].mxu0 }
 0x4f4   : > { %v3400_v54 = vpack.i.b16 %v3392_v55, %v3392_v55  ;;  %v3428_v9 = vrot.slane %v3396_v24, %v4742_v37  ;;  %v3442_v11 = vrot.slane %v3398_v1, %v4742_v37  ;;  %v3449_v30 = vrot.slane %v4200_v45, %v4742_v37  ;;  %3470 = vst [vmem:[%s4739_s29] sm:$0x1] %v3469_v7  ;;  %v4255_v13 = vpop.f32.mrb[5].mxu0 }
 0x4f5   : > { %v3472_v53 = vsel %vm4746_vm14, %v3414_v60, %v3471_v46  ;;  %v3475_v58 = vsel %vm4746_vm14, %v3421_v61, %v3474_v44  ;;  %v3481_v16 = vsel %vm4746_vm14, %v3435_v4, %v3480_v17  ;;  %v2598_v56 = vadd.f32 %v2592_v49, %v2553_v41  ;;  %v2595_v3 = vpop.f32.mrb[6].mxu0 }
 0x4f6   : > { %v3456_v10 = vrot.slane %v3400_v54, %v4742_v37  ;;  %3473 = vst [vmem:[%s4739_s29 + $0x2] sm:$0x1] %v3472_v53  ;;  %3476 = vst [vmem:[%s4739_s29 + $0x4] sm:$0x1] %v3475_v58  ;;  %v3478_v33 = vsel %vm4746_vm14, %v3428_v9, %v3477_v5  ;;  %v3484_v51 = vsel %vm4746_vm14, %v3442_v11, %v3483_v59  ;;  %v4256_v63 = vpop.f32.mrb[7].mxu0 }
 0x4f7   : > { %3482 = vst [vmem:[%s4739_s29 + $0x8] sm:$0x1] %v3481_v16  ;;  %v3487_v57 = vsel %vm4746_vm14, %v3449_v30, %v3486_v26  ;;  %3479 = vst [vmem:[%s4739_s29 + $0x6] sm:$0x1] %v3478_v33 }
 0x4f8   : > { %3485 = vst [vmem:[%s4739_s29 + $0xa] sm:$0x1] %v3484_v51  ;;  %3488 = vst [vmem:[%s4739_s29 + $0xc] sm:$0x1] %v3487_v57  ;;  %v3490_v27 = vsel %vm4746_vm14, %v3456_v10, %v3489_v14 }
 0x4f9   : > { %2599 = vst.msk [vmem:[#allocation4 + $0x8] sm:$0xff] %vm325_vm0, %v2598_v56  ;;  %3491 = vst [vmem:[%s4739_s29 + $0xe] sm:$0x1] %v3490_v27 }
 0x4fb   : > { %v3119_v50 = vpop.f32.mrb[8].mxu0  ;;  %v3611_v4 = vld [vmem:[%s4739_s29] sm:$0x1] }
 0x4fc   : > { %v3125_v31 = vadd.f32 %v3119_v50, %v2934_v28  ;;  %v4267_v22 = vpop.f32.mrb[9].mxu0 }
 0x4fd   : > { %v3122_v34 = vpop.f32.mrb[10].mxu0  ;;  %v3614_v53 = vld [vmem:[%s4739_s29 + $0x2] sm:$0x1]  ;;  %v3617_v58 = vld [vmem:[%s4739_s29 + $0x4] sm:$0x1] }
 0x4fe   : > { %3126 = vst.msk [vmem:[#allocation4 + $0x10] sm:$0xff] %vm325_vm0, %v3125_v31  ;;  %v4268_v0 = vpop.f32.mrb[11].mxu0  ;;  %v3623_v16 = vld [vmem:[%s4739_s29 + $0x8] sm:$0x1]  ;;  %v3620_v10 = vld [vmem:[%s4739_s29 + $0x6] sm:$0x1] }
 0x4ff   : > { %v3626_v51 = vld [vmem:[%s4739_s29 + $0xa] sm:$0x1]  ;;  %v3629_v57 = vld [vmem:[%s4739_s29 + $0xc] sm:$0x1] }
 0x500   : > { %v3496_v43 = vld [vmem:[#allocation4 + $0x8] sm:$0xff]  ;;  %v3632_v22 = vld [vmem:[%s4739_s29 + $0xe] sm:$0x1] }
 0x503   : > { %v3338_v35 = vpop.f32.mrb[12].mxu0 }
 0x504   : > { %v3344_v39 = vadd.f32 %v3338_v35, %v3299_v6  ;;  %v4279_v18 = vpop.f32.mrb[13].mxu0 }
 0x505   : > { %v3341_v32 = vpop.f32.mrb[14].mxu0  ;;  %v3639_v46 = vld [vmem:[#allocation4 + $0x10] sm:$0xff] }
 0x506   : > { %3345 = vst.msk [vmem:[#allocation4 + $0x18] sm:$0xff] %vm325_vm0, %v3344_v39  ;;  %v4280_v40 = vpop.f32.mrb[15].mxu0  ;;  %vm4798_vm0 = vmand %vm3465_vm12, %vm3609_vm15 }
 0x50d   : > { %v3783_v31 = vld [vmem:[#allocation4 + $0x18] sm:$0xff] }
 0x541   : > { %v3500_v20 = vpop.permute.xlu0 %3499 }
 0x542   : > { %v3502_v47 = vmul.f32 %v3500_v20, %v3496_v43  ;;  %v3755_v43 = vld [vmem:[%s4739_s29] sm:$0x2] }
 0x544   : > { %v3503_v12 = vpack.c.bf16 %v3502_v47, %v3502_v47 }
 0x546   : > { %v3511_v19 = vrot.slane %v3503_v12, %v4431_v8 }
 0x548   : > { %v3512_v36 = vcombine.high %v3511_v19, %v3511_v19  ;;  %v3519_v15 = vrot.slane %v3511_v19, %v4431_v8 }
 0x549   : > { %v3643_v2 = vpop.permute.xlu1 %3642 }
 0x54a   : > { %v3526_v29 = vrot.slane %v3512_v36, %v4431_v8  ;;  %v3527_v42 = vcombine.high %v3519_v15, %v3519_v15  ;;  %v3530_v48 = vunpack.i.h.s16 %v3519_v15  ;;  %v4201_v41 = vpack.i.b16 %v3519_v15, %v3519_v15 }
 0x54b   : > { %v3645_v23 = vmul.f32 %v3643_v2, %v3639_v46  ;;  %v3767_v46 = vld [vmem:[%s4739_s29 + $0x8] sm:$0x2] }
 0x54c   : > { %v3528_v52 = vcombine.high %v3526_v29, %v3526_v29  ;;  %v3532_v44 = vunpack.i.h.s16 %v3526_v29  ;;  %v3534_v5 = vunpack.i.h.s16 %v3527_v42  ;;  %v3538_v17 = vpack.i.b16 %v3530_v48, %v3530_v48  ;;  %v3758_v48 = vld [vmem:[%s4739_s29 + $0x2] sm:$0x2] }
 0x54d   : > { %v4202_v55 = vpack.i.b16 %v3526_v29, %v3526_v29  ;;  %v4203_v24 = vpack.i.b16 %v3527_v42, %v3527_v42  ;;  %v3551_v1 = vrot.slane %v4201_v41, %v4742_v37  ;;  %v3646_v45 = vpack.c.bf16 %v3645_v23, %v3645_v23  ;;  %v3761_v41 = vld [vmem:[%s4739_s29 + $0x4] sm:$0x2] }
 0x54e   : > { %v3536_v59 = vunpack.i.h.s16 %v3528_v52  ;;  %v3540_v26 = vpack.i.b16 %v3532_v44, %v3532_v44  ;;  %v3542_v60 = vpack.i.b16 %v3534_v5, %v3534_v5  ;;  %v4204_v61 = vpack.i.b16 %v3528_v52, %v3528_v52  ;;  %v3764_v5 = vld [vmem:[%s4739_s29 + $0x6] sm:$0x2] }
 0x54f   : > { %v3558_v7 = vrot.slane %v3538_v17, %v4742_v37  ;;  %v3565_v49 = vrot.slane %v4202_v55, %v4742_v37  ;;  %v3579_v54 = vrot.slane %v4203_v24, %v4742_v37  ;;  %v3612_v9 = vsel %vm4798_vm0, %v3551_v1, %v3611_v4  ;;  %v3770_v17 = vld [vmem:[%s4739_s29 + $0xa] sm:$0x2]  ;;  %v3773_v55 = vld [vmem:[%s4739_s29 + $0xc] sm:$0x2] }
 0x550   : > { %v3544_v11 = vpack.i.b16 %v3536_v59, %v3536_v59  ;;  %v3572_v30 = vrot.slane %v3540_v26, %v4742_v37  ;;  %v3586_v13 = vrot.slane %v3542_v60, %v4742_v37  ;;  %v3593_v14 = vrot.slane %v4204_v61, %v4742_v37  ;;  %3613 = vst [vmem:[%s4739_s29] sm:$0x1] %v3612_v9 }
 0x551   : > { %v3615_v56 = vsel %vm4798_vm0, %v3558_v7, %v3614_v53  ;;  %v3618_v3 = vsel %vm4798_vm0, %v3565_v49, %v3617_v58  ;;  %v3624_v33 = vsel %vm4798_vm0, %v3579_v54, %v3623_v16  ;;  %v3654_v63 = vrot.slane %v3646_v45, %v4431_v8  ;;  %v3787_v38 = vpop.permute.xlu0 %3786  ;;  %v3776_v7 = vld [vmem:[%s4739_s29 + $0xe] sm:$0x2] }
 0x552   : > { %v3600_v21 = vrot.slane %v3544_v11, %v4742_v37  ;;  %3616 = vst [vmem:[%s4739_s29 + $0x2] sm:$0x1] %v3615_v56  ;;  %3619 = vst [vmem:[%s4739_s29 + $0x4] sm:$0x1] %v3618_v3  ;;  %v3621_v27 = vsel %vm4798_vm0, %v3572_v30, %v3620_v10  ;;  %v3627_v28 = vsel %vm4798_vm0, %v3586_v13, %v3626_v51 }
 0x553   : > { %3625 = vst [vmem:[%s4739_s29 + $0x8] sm:$0x1] %v3624_v33  ;;  %v3630_v50 = vsel %vm4798_vm0, %v3593_v14, %v3629_v57  ;;  %3622 = vst [vmem:[%s4739_s29 + $0x6] sm:$0x1] %v3621_v27  ;;  %v3655_v34 = vcombine.high %v3654_v63, %v3654_v63  ;;  %v3662_v0 = vrot.slane %v3654_v63, %v4431_v8 }
 0x554   : > { %3628 = vst [vmem:[%s4739_s29 + $0xa] sm:$0x1] %v3627_v28  ;;  %3631 = vst [vmem:[%s4739_s29 + $0xc] sm:$0x1] %v3630_v50  ;;  %v3789_v62 = vmul.f32 %v3787_v38, %v3783_v31  ;;  %v3633_v6 = vsel %vm4798_vm0, %v3600_v21, %v3632_v22 }
 0x555   : > { %3634 = vst [vmem:[%s4739_s29 + $0xe] sm:$0x1] %v3633_v6  ;;  %v3669_v35 = vrot.slane %v3655_v34, %v4431_v8  ;;  %v3670_v39 = vcombine.high %v3662_v0, %v3662_v0  ;;  %v3673_v18 = vunpack.i.h.s16 %v3662_v0  ;;  %v4205_v32 = vpack.i.b16 %v3662_v0, %v3662_v0 }
 0x556   : > { %v3790_v40 = vpack.c.bf16 %v3789_v62, %v3789_v62 }
 0x557   : > { %v3671_v47 = vcombine.high %v3669_v35, %v3669_v35  ;;  %v3675_v12 = vunpack.i.h.s16 %v3669_v35  ;;  %v3677_v19 = vunpack.i.h.s16 %v3670_v39  ;;  %v3681_v36 = vpack.i.b16 %v3673_v18, %v3673_v18 }
 0x558   : > { %v4206_v15 = vpack.i.b16 %v3669_v35, %v3669_v35  ;;  %v4207_v2 = vpack.i.b16 %v3670_v39, %v3670_v39  ;;  %v3694_v29 = vrot.slane %v4205_v32, %v4742_v37  ;;  %v3798_v42 = vrot.slane %v3790_v40, %v4431_v8 }
 0x559   : > { %v3679_v23 = vunpack.i.h.s16 %v3671_v47  ;;  %v3683_v25 = vpack.i.b16 %v3675_v12, %v3675_v12  ;;  %v3685_v52 = vpack.i.b16 %v3677_v19, %v3677_v19  ;;  %v4208_v44 = vpack.i.b16 %v3671_v47, %v3671_v47 }
 0x55a   : > { %v3701_v24 = vrot.slane %v3681_v36, %v4742_v37  ;;  %v3708_v1 = vrot.slane %v4206_v15, %v4742_v37  ;;  %v3722_v45 = vrot.slane %v4207_v2, %v4742_v37  ;;  %v3756_v59 = vsel %vm4846_vm3, %v3694_v29, %v3755_v43 }
 0x55b   : > { %v3687_v26 = vpack.i.b16 %v3679_v23, %v3679_v23  ;;  %v3715_v60 = vrot.slane %v3683_v25, %v4742_v37  ;;  %v3729_v61 = vrot.slane %v3685_v52, %v4742_v37  ;;  %v3736_v4 = vrot.slane %v4208_v44, %v4742_v37  ;;  %3757 = vst [vmem:[%s4739_s29] sm:$0x2] %v3756_v59 }
 0x55c   : > { %v3759_v49 = vsel %vm4846_vm3, %v3701_v24, %v3758_v48  ;;  %v3762_v54 = vsel %vm4846_vm3, %v3708_v1, %v3761_v41  ;;  %v3768_v9 = vsel %vm4846_vm3, %v3722_v45, %v3767_v46  ;;  %v3799_v11 = vcombine.high %v3798_v42, %v3798_v42 }
 0x55d   : > { %v3743_v30 = vrot.slane %v3687_v26, %v4742_v37  ;;  %3760 = vst [vmem:[%s4739_s29 + $0x2] sm:$0x2] %v3759_v49  ;;  %3763 = vst [vmem:[%s4739_s29 + $0x4] sm:$0x2] %v3762_v54  ;;  %v3765_v13 = vsel %vm4846_vm3, %v3715_v60, %v3764_v5  ;;  %v3771_v14 = vsel %vm4846_vm3, %v3729_v61, %v3770_v17 }
 0x55e   : > { %3769 = vst [vmem:[%s4739_s29 + $0x8] sm:$0x2] %v3768_v9  ;;  %v3774_v53 = vsel %vm4846_vm3, %v3736_v4, %v3773_v55  ;;  %3766 = vst [vmem:[%s4739_s29 + $0x6] sm:$0x2] %v3765_v13  ;;  %v3806_v58 = vrot.slane %v3798_v42, %v4431_v8  ;;  %v3813_v16 = vrot.slane %v3799_v11, %v4431_v8 }
 0x55f   : > { %3772 = vst [vmem:[%s4739_s29 + $0xa] sm:$0x2] %v3771_v14  ;;  %3775 = vst [vmem:[%s4739_s29 + $0xc] sm:$0x2] %v3774_v53  ;;  %v3777_v56 = vsel %vm4846_vm3, %v3743_v30, %v3776_v7 }
 0x560   : > { %3778 = vst [vmem:[%s4739_s29 + $0xe] sm:$0x2] %v3777_v56  ;;  %v3814_v3 = vcombine.high %v3806_v58, %v3806_v58  ;;  %v3815_v10 = vcombine.high %v3813_v16, %v3813_v16  ;;  %v3817_v33 = vunpack.i.h.s16 %v3806_v58  ;;  %v3819_v51 = vunpack.i.h.s16 %v3813_v16 }
 0x561   : > { %v4209_v57 = vpack.i.b16 %v3806_v58, %v3806_v58  ;;  %v4210_v63 = vpack.i.b16 %v3813_v16, %v3813_v16 }
 0x562   : > { %v3821_v8 = vunpack.i.h.s16 %v3814_v3  ;;  %v3823_v21 = vunpack.i.h.s16 %v3815_v10  ;;  %v3825_v27 = vpack.i.b16 %v3817_v33, %v3817_v33  ;;  %v3827_v28 = vpack.i.b16 %v3819_v51, %v3819_v51  ;;  %v3898_v50 = vld [vmem:[%s4739_s29] sm:$0x2] }
 0x563   : > { %v4211_v31 = vpack.i.b16 %v3814_v3, %v3814_v3  ;;  %v4212_v22 = vpack.i.b16 %v3815_v10, %v3815_v10  ;;  %v3838_v34 = vrot.slane %v4209_v57, %v4742_v37  ;;  %v3852_v0 = vrot.slane %v4210_v63, %v4742_v37 }
 0x564   : > { %v3829_v62 = vpack.i.b16 %v3821_v8, %v3821_v8  ;;  %v3831_v6 = vpack.i.b16 %v3823_v21, %v3823_v21  ;;  %v3845_v35 = vrot.slane %v3825_v27, %v4742_v37  ;;  %v3859_v39 = vrot.slane %v3827_v28, %v4742_v37  ;;  %v3901_v18 = vld [vmem:[%s4739_s29 + $0x2] sm:$0x2]  ;;  %v3904_v32 = vld [vmem:[%s4739_s29 + $0x4] sm:$0x2] }
 0x565   : > { %v3910_v40 = vld [vmem:[%s4739_s29 + $0x8] sm:$0x2]  ;;  %v3866_v20 = vrot.slane %v4211_v31, %v4742_v37  ;;  %v3880_v43 = vrot.slane %v4212_v22, %v4742_v37  ;;  %v3899_v47 = vsel %vm4894_vm5, %v3838_v34, %v3898_v50  ;;  %v3905_v12 = vsel %vm4894_vm5, %v3852_v0, %v3904_v32  ;;  %v3907_v19 = vld [vmem:[%s4739_s29 + $0x6] sm:$0x2] }
 0x566   : > { %v3913_v36 = vld [vmem:[%s4739_s29 + $0xa] sm:$0x2]  ;;  %v3916_v15 = vld [vmem:[%s4739_s29 + $0xc] sm:$0x2]  ;;  %v3873_v2 = vrot.slane %v3829_v62, %v4742_v37  ;;  %v3887_v29 = vrot.slane %v3831_v6, %v4742_v37  ;;  %3900 = vst [vmem:[%s4739_s29] sm:$0x2] %v3899_v47  ;;  %v3902_v42 = vsel %vm4894_vm5, %v3845_v35, %v3901_v18  ;;  %v3908_v48 = vsel %vm4894_vm5, %v3859_v39, %v3907_v19 }
 0x567   : > { %3906 = vst [vmem:[%s4739_s29 + $0x4] sm:$0x2] %v3905_v12  ;;  %3903 = vst [vmem:[%s4739_s29 + $0x2] sm:$0x2] %v3902_v42  ;;  %v3911_v41 = vsel %vm4894_vm5, %v3866_v20, %v3910_v40  ;;  %v3917_v46 = vsel %vm4894_vm5, %v3880_v43, %v3916_v15  ;;  %v3919_v23 = vld [vmem:[%s4739_s29 + $0xe] sm:$0x2] }
 0x568   : > { %3909 = vst [vmem:[%s4739_s29 + $0x6] sm:$0x2] %v3908_v48  ;;  %3912 = vst [vmem:[%s4739_s29 + $0x8] sm:$0x2] %v3911_v41  ;;  %v3914_v37 = vsel %vm4894_vm5, %v3873_v2, %v3913_v36  ;;  %v3920_v25 = vsel %vm4894_vm5, %v3887_v29, %v3919_v23 }
 0x569   : > { %3918 = vst [vmem:[%s4739_s29 + $0xc] sm:$0x2] %v3917_v46  ;;  %3915 = vst [vmem:[%s4739_s29 + $0xa] sm:$0x2] %v3914_v37 }
 0x56a   : > { %3921 = vst [vmem:[%s4739_s29 + $0xe] sm:$0x2] %v3920_v25 }
 0x56b PF: > { %s13_s14 = sadd.s32 1, %s4359_s14   ;;  %s4959_s12 = smov %s4355_s13 }
 0x56c   : > { %p10_p5 = scmp.ge.s32.totalorder %s13_s14, 4   ;;  %s4960_s13 = smov %s4962_s15 }
 0x56e   :  { %12 = sbr.rel (!%p10_p5) target bundleno = 2 (0x2), region = 108 }

</bundles_post_ra>
